<compile_context>
chip_gen: v7x
topology: tpu7x:2x2x1
jax: 0.10.0
libtpu: 0.0.40
codegen_flags: <defaults>
</compile_context>

<pallas_src>
import functools

import jax
import jax.numpy as jnp
from jax import lax
from jax.experimental import pallas as pl
from jax.experimental.pallas import tpu as pltpu


def _round_up(n, m):
    return (n + m - 1) // m * m


def recur_scan_kernel(pre_ref, wh_ref, hs_ref, h_ref, *, unroll, mxu_bf16):
    """Serial recurrence over a block of TT time steps.

    pre_ref : (TT, Bp, Hp)  precomputed x_t @ Wx + b  (f32, padded)
    wh_ref  : (Hp, Hp)      recurrent weight          (f32, zero-padded)
    hs_ref  : (TT, Bp, Hp)  output hidden states (lane-dense)
    h_ref   : (Bp, Hp)      VMEM scratch: memory carried across grid steps
    """
    # Recur initializes memory to zero at the very first time step.
    @pl.when(pl.program_id(0) == 0)
    def _():
        h_ref[...] = jnp.zeros_like(h_ref)

    # Load the carried memory ONCE per grid block; inside the block the hidden
    # state lives as a fori_loop carry (a single 8x128 f32 vreg here), so
    # there is no VMEM store/load on the per-step critical chain.
    h0 = h_ref[...]

    # Hoisted: Wh loaded once per grid block; same RHS for every per-step dot
    # so the MXU weight registers can stay resident across the block.
    wh = wh_ref[...]
    if mxu_bf16:
        wh = wh.astype(jnp.bfloat16)

    tt = pre_ref.shape[0]  # static

    def step(i, h):
        lhs = h.astype(jnp.bfloat16) if mxu_bf16 else h
        h_new = jnp.tanh(
            pre_ref[i]
            + jnp.dot(lhs, wh, preferred_element_type=jnp.float32)
        )
        hs_ref[i] = h_new.astype(hs_ref.dtype)
        return h_new

    h_last = lax.fori_loop(0, tt, step, h0, unroll=unroll)

    # Write the memory back ONCE so the next grid block picks it up.
    h_ref[...] = h_last


def recur_pallas(x, wx, wh, b, wo, bo, *, tt=256, mxu_bf16=False):
    """x: (batch, channels, path) -> (batch, out_dim, path)."""
    B, C, T = x.shape
    H = wh.shape[0]
    O = wo.shape[1]

    # ---- TPU-friendly padded sizes ------------------------------------------
    Bp = _round_up(B, 8)      # sublane multiple
    Hp = _round_up(H, 128)    # lane-dense hidden dim (unmasked vst)

    # Cap tt against a conservative VMEM budget: 2x-buffered pre + hs blocks
    # (4 * tt * Bp * Hp * 4B) must fit comfortably under the smallest scoped
    # default (16 MiB on v5e; 32 MiB scoped / 64 MiB physical on v7x).
    vmem_budget = 12 * 1024 * 1024
    bytes_per_t = 4 * Bp * Hp * 4
    tt_cap = max(1, vmem_budget // bytes_per_t)
    tt = max(1, min(tt, T, tt_cap))
    Tp = _round_up(T, tt)

    # Partial unroll once the block is large (bounds code size / live ranges),
    # full unroll for small blocks (LLO scheduling visibility).
    unroll = tt if tt <= 64 else 8

    # ---- pad the SMALL operands (not the big pre slab) ----------------------
    f32 = jnp.float32
    x_p = jnp.pad(x.astype(f32), ((0, Bp - B), (0, 0), (0, Tp - T)))
    wx_p = jnp.pad(wx.astype(f32), ((0, 0), (0, Hp - H)))
    b_p = jnp.pad(b.astype(f32).reshape(1, H), ((0, 0), (0, Hp - H)))
    wh_p = jnp.pad(wh.astype(f32), ((0, Hp - H), (0, Hp - H)))

    # ---- hoisted input projection: one big GEMM over all T steps ------------
    # Produced directly in padded (Tp, Bp, Hp) layout; bias add fuses into the
    # GEMM epilogue. Padded time/batch rows carry only the bias -> the kernel
    # does a little wasted (sliced-off) work there, never wrong work.
    pre = jnp.einsum(
        "bct,ch->tbh", x_p, wx_p, precision=lax.Precision.HIGHEST
    ) + b_p

    # ---- serial scan over time, tt steps per grid iteration -----------------
    hs = pl.pallas_call(
        functools.partial(recur_scan_kernel, unroll=unroll, mxu_bf16=mxu_bf16),
        out_shape=jax.ShapeDtypeStruct((Tp, Bp, Hp), jnp.float32),
        grid_spec=pltpu.PrefetchScalarGridSpec(
            num_scalar_prefetch=0,
            grid=(Tp // tt,),
            in_specs=[
                pl.BlockSpec((tt, Bp, Hp), lambda t: (t, 0, 0)),  # pre block
                pl.BlockSpec((Hp, Hp), lambda t: (0, 0)),         # Wh (grid-invariant)
            ],
            out_specs=pl.BlockSpec((tt, Bp, Hp), lambda t: (t, 0, 0)),
            scratch_shapes=[pltpu.VMEM((Bp, Hp), jnp.float32)],   # persistent memory
        ),
        compiler_params=pltpu.CompilerParams(
            dimension_semantics=("arbitrary",),   # time is a true recurrence
        ),
    )(pre, wh_p)

    # ---- deferred output projection (one big GEMM after the scan) -----------
    hs = hs[:T, :B, :H]
    out = jnp.einsum(
        "tbh,ho->bot", hs, wo.astype(f32), precision=lax.Precision.HIGHEST
    ) + bo.astype(f32)[:, :, None]
    return out.astype(x.dtype)


def recur_reference(x, wx, wh, b, wo, bo):
    """Pure-JAX reference matching the PyTorch Recur semantics."""
    B, C, T = x.shape
    H = wh.shape[0]
    dot = functools.partial(jnp.dot, precision=lax.Precision.HIGHEST)
    h = jnp.zeros((B, H), jnp.float32)
    outs = []
    for t in range(T):
        inp = x[:, :, t]
        h = jnp.tanh(dot(inp, wx) + dot(h, wh) + b)
        outs.append(dot(h, wo) + bo)
    return jnp.stack(outs, axis=-1)


if __name__ == "__main__":
    B, C, T = 2, 4, 64      # batch, channels, path (sequence) length
    H, O = 32, 4            # memory_shape = (H,), module output dim

    key = jax.random.PRNGKey(0)
    kx, kwx, kwh, kb, kwo, kbo = jax.random.split(key, 6)

    x = jax.random.normal(kx, (B, C, T), jnp.float32)
    wx = jax.random.normal(kwx, (C, H), jnp.float32) * 0.2
    wh = jax.random.normal(kwh, (H, H), jnp.float32) * 0.2
    b = jax.random.normal(kb, (1, H), jnp.float32) * 0.1
    wo = jax.random.normal(kwo, (H, O), jnp.float32) * 0.2
    bo = jax.random.normal(kbo, (1, O), jnp.float32) * 0.1

    out = jax.jit(recur_pallas)(x, wx, wh, b, wo, bo)
    out = jax.block_until_ready(out)

    ref = recur_reference(x, wx, wh, b, wo, bo)
    assert out.shape == (B, O, T), out.shape
    err = float(jnp.max(jnp.abs(out - ref)))
    assert jnp.allclose(out, ref, atol=1e-4, rtol=1e-4), err

    print("KERNEL_OK")
</pallas_src>

<mosaic_0001>
module attributes {stable_mosaic.version = 11 : i64} {
  func.func @recur_scan_kernel(%arg0: i32, %arg1: memref<64x8x128xf32, #tpu.memory_space<vmem>>, %arg2: memref<128x128xf32, #tpu.memory_space<vmem>>, %arg3: memref<64x8x128xf32, #tpu.memory_space<vmem>>, %arg4: memref<8x128xf32, #tpu.memory_space<vmem>>) attributes {dimension_semantics = [#tpu.dimension_semantics<arbitrary>], iteration_bounds = array<i64: 1>, scalar_prefetch = 0 : i64, scratch_operands = 1 : i64, tpu.core_type = #tpu.core_type<tc>, window_params = [{transform_indices = @transform_0, window_bounds = array<i64: 64, 8, 128>}, {pipeline_mode = #tpu.pipeline_mode<synchronous>, transform_indices = @transform_1, window_bounds = array<i64: 128, 128>}, {transform_indices = @transform_2, window_bounds = array<i64: 64, 8, 128>}]} {
    %c0_i32 = arith.constant 0 : i32
    %0 = arith.cmpi eq, %arg0, %c0_i32 : i32
    %1 = arith.extui %0 : i1 to i32
    %c0_i32_0 = arith.constant 0 : i32
    %2 = arith.cmpi ne, %1, %c0_i32_0 : i32
    scf.if %2 {
      %cst_326 = arith.constant 0.000000e+00 : f32
      %646 = vector.broadcast %cst_326 : f32 to vector<8x128xf32>
      %c0_327 = arith.constant 0 : index
      %c0_328 = arith.constant 0 : index
      %647 = vector.load %arg4[%c0_327, %c0_328] : memref<8x128xf32, #tpu.memory_space<vmem>>, vector<8x128xf32>
      tpu.vector_store %arg4[%c0_327, %c0_328], %646 {strides = array<i32>} : memref<8x128xf32, #tpu.memory_space<vmem>>, vector<8x128xf32>,
    } else {
    }
    %c0 = arith.constant 0 : index
    %c0_1 = arith.constant 0 : index
    %3 = vector.load %arg4[%c0, %c0_1] : memref<8x128xf32, #tpu.memory_space<vmem>>, vector<8x128xf32>
    %c0_2 = arith.constant 0 : index
    %c0_3 = arith.constant 0 : index
    %4 = vector.load %arg2[%c0_2, %c0_3] : memref<128x128xf32, #tpu.memory_space<vmem>>, vector<128x128xf32>
    %c0_i32_4 = arith.constant 0 : i32
    %5 = arith.index_cast %c0_i32_4 : i32 to index
    %c0_5 = arith.constant 0 : index
    %c0_6 = arith.constant 0 : index
    %6 = vector.load %arg1[%5, %c0_5, %c0_6] : memref<64x8x128xf32, #tpu.memory_space<vmem>>, vector<1x8x128xf32>
    %7 = vector.shape_cast %6 : vector<1x8x128xf32> to vector<8x128xf32>
    %cst = arith.constant dense<0.000000e+00> : vector<8x128xf32>
    %8 = tpu.matmul %3, %4, %cst {dimension_numbers = #tpu.dot_dimension_numbers<[1], [0], [0], [1], [0, 0, 1, 1], [], []>} : vector<8x128xf32>, vector<128x128xf32>, vector<8x128xf32> -> vector<8x128xf32>
    %9 = arith.addf %7, %8 : vector<8x128xf32>
    %10 = math.tanh %9 : vector<8x128xf32>
    %11 = arith.index_cast %c0_i32_4 : i32 to index
    %c0_7 = arith.constant 0 : index
    %c0_8 = arith.constant 0 : index
    %12 = vector.load %arg3[%11, %c0_7, %c0_8] : memref<64x8x128xf32, #tpu.memory_space<vmem>>, vector<1x8x128xf32>
    %13 = vector.shape_cast %12 : vector<1x8x128xf32> to vector<8x128xf32>
    %14 = vector.shape_cast %10 : vector<8x128xf32> to vector<1x8x128xf32>
    tpu.vector_store %arg3[%11, %c0_7, %c0_8], %14 {strides = array<i32>} : memref<64x8x128xf32, #tpu.memory_space<vmem>>, vector<1x8x128xf32>,
    %c1_i32 = arith.constant 1 : i32
    %15 = arith.index_cast %c1_i32 : i32 to index
    %c0_9 = arith.constant 0 : index
    %c0_10 = arith.constant 0 : index
    %16 = vector.load %arg1[%15, %c0_9, %c0_10] : memref<64x8x128xf32, #tpu.memory_space<vmem>>, vector<1x8x128xf32>
    %17 = vector.shape_cast %16 : vector<1x8x128xf32> to vector<8x128xf32>
    %cst_11 = arith.constant dense<0.000000e+00> : vector<8x128xf32>
    %18 = tpu.matmul %10, %4, %cst_11 {dimension_numbers = #tpu.dot_dimension_numbers<[1], [0], [0], [1], [0, 0, 1, 1], [], []>} : vector<8x128xf32>, vector<128x128xf32>, vector<8x128xf32> -> vector<8x128xf32>
    %19 = arith.addf %17, %18 : vector<8x128xf32>
    %20 = math.tanh %19 : vector<8x128xf32>
    %21 = arith.index_cast %c1_i32 : i32 to index
    %c0_12 = arith.constant 0 : index
    %c0_13 = arith.constant 0 : index
    %22 = vector.load %arg3[%21, %c0_12, %c0_13] : memref<64x8x128xf32, #tpu.memory_space<vmem>>, vector<1x8x128xf32>
    %23 = vector.shape_cast %22 : vector<1x8x128xf32> to vector<8x128xf32>
    %24 = vector.shape_cast %20 : vector<8x128xf32> to vector<1x8x128xf32>
    tpu.vector_store %arg3[%21, %c0_12, %c0_13], %24 {strides = array<i32>} : memref<64x8x128xf32, #tpu.memory_space<vmem>>, vector<1x8x128xf32>,
    %c2_i32 = arith.constant 2 : i32
    %25 = arith.index_cast %c2_i32 : i32 to index
    %c0_14 = arith.constant 0 : index
    %c0_15 = arith.constant 0 : index
    %26 = vector.load %arg1[%25, %c0_14, %c0_15] : memref<64x8x128xf32, #tpu.memory_space<vmem>>, vector<1x8x128xf32>
    %27 = vector.shape_cast %26 : vector<1x8x128xf32> to vector<8x128xf32>
    %cst_16 = arith.constant dense<0.000000e+00> : vector<8x128xf32>
    %28 = tpu.matmul %20, %4, %cst_16 {dimension_numbers = #tpu.dot_dimension_numbers<[1], [0], [0], [1], [0, 0, 1, 1], [], []>} : vector<8x128xf32>, vector<128x128xf32>, vector<8x128xf32> -> vector<8x128xf32>
    %29 = arith.addf %27, %28 : vector<8x128xf32>
    %30 = math.tanh %29 : vector<8x128xf32>
    %31 = arith.index_cast %c2_i32 : i32 to index
    %c0_17 = arith.constant 0 : index
    %c0_18 = arith.constant 0 : index
    %32 = vector.load %arg3[%31, %c0_17, %c0_18] : memref<64x8x128xf32, #tpu.memory_space<vmem>>, vector<1x8x128xf32>
    %33 = vector.shape_cast %32 : vector<1x8x128xf32> to vector<8x128xf32>
    %34 = vector.shape_cast %30 : vector<8x128xf32> to vector<1x8x128xf32>
    tpu.vector_store %arg3[%31, %c0_17, %c0_18], %34 {strides = array<i32>} : memref<64x8x128xf32, #tpu.memory_space<vmem>>, vector<1x8x128xf32>,
    %c3_i32 = arith.constant 3 : i32
    %35 = arith.index_cast %c3_i32 : i32 to index
    %c0_19 = arith.constant 0 : index
    %c0_20 = arith.constant 0 : index
    %36 = vector.load %arg1[%35, %c0_19, %c0_20] : memref<64x8x128xf32, #tpu.memory_space<vmem>>, vector<1x8x128xf32>
    %37 = vector.shape_cast %36 : vector<1x8x128xf32> to vector<8x128xf32>
    %cst_21 = arith.constant dense<0.000000e+00> : vector<8x128xf32>
    %38 = tpu.matmul %30, %4, %cst_21 {dimension_numbers = #tpu.dot_dimension_numbers<[1], [0], [0], [1], [0, 0, 1, 1], [], []>} : vector<8x128xf32>, vector<128x128xf32>, vector<8x128xf32> -> vector<8x128xf32>
    %39 = arith.addf %37, %38 : vector<8x128xf32>
    %40 = math.tanh %39 : vector<8x128xf32>
    %41 = arith.index_cast %c3_i32 : i32 to index
    %c0_22 = arith.constant 0 : index
    %c0_23 = arith.constant 0 : index
    %42 = vector.load %arg3[%41, %c0_22, %c0_23] : memref<64x8x128xf32, #tpu.memory_space<vmem>>, vector<1x8x128xf32>
    %43 = vector.shape_cast %42 : vector<1x8x128xf32> to vector<8x128xf32>
    %44 = vector.shape_cast %40 : vector<8x128xf32> to vector<1x8x128xf32>
    tpu.vector_store %arg3[%41, %c0_22, %c0_23], %44 {strides = array<i32>} : memref<64x8x128xf32, #tpu.memory_space<vmem>>, vector<1x8x128xf32>,
    %c4_i32 = arith.constant 4 : i32
    %45 = arith.index_cast %c4_i32 : i32 to index
    %c0_24 = arith.constant 0 : index
    %c0_25 = arith.constant 0 : index
    %46 = vector.load %arg1[%45, %c0_24, %c0_25] : memref<64x8x128xf32, #tpu.memory_space<vmem>>, vector<1x8x128xf32>
    %47 = vector.shape_cast %46 : vector<1x8x128xf32> to vector<8x128xf32>
    %cst_26 = arith.constant dense<0.000000e+00> : vector<8x128xf32>
    %48 = tpu.matmul %40, %4, %cst_26 {dimension_numbers = #tpu.dot_dimension_numbers<[1], [0], [0], [1], [0, 0, 1, 1], [], []>} : vector<8x128xf32>, vector<128x128xf32>, vector<8x128xf32> -> vector<8x128xf32>
    %49 = arith.addf %47, %48 : vector<8x128xf32>
    %50 = math.tanh %49 : vector<8x128xf32>
    %51 = arith.index_cast %c4_i32 : i32 to index
    %c0_27 = arith.constant 0 : index
    %c0_28 = arith.constant 0 : index
    %52 = vector.load %arg3[%51, %c0_27, %c0_28] : memref<64x8x128xf32, #tpu.memory_space<vmem>>, vector<1x8x128xf32>
    %53 = vector.shape_cast %52 : vector<1x8x128xf32> to vector<8x128xf32>
    %54 = vector.shape_cast %50 : vector<8x128xf32> to vector<1x8x128xf32>
    tpu.vector_store %arg3[%51, %c0_27, %c0_28], %54 {strides = array<i32>} : memref<64x8x128xf32, #tpu.memory_space<vmem>>, vector<1x8x128xf32>,
    %c5_i32 = arith.constant 5 : i32
    %55 = arith.index_cast %c5_i32 : i32 to index
    %c0_29 = arith.constant 0 : index
    %c0_30 = arith.constant 0 : index
    %56 = vector.load %arg1[%55, %c0_29, %c0_30] : memref<64x8x128xf32, #tpu.memory_space<vmem>>, vector<1x8x128xf32>
    %57 = vector.shape_cast %56 : vector<1x8x128xf32> to vector<8x128xf32>
    %cst_31 = arith.constant dense<0.000000e+00> : vector<8x128xf32>
    %58 = tpu.matmul %50, %4, %cst_31 {dimension_numbers = #tpu.dot_dimension_numbers<[1], [0], [0], [1], [0, 0, 1, 1], [], []>} : vector<8x128xf32>, vector<128x128xf32>, vector<8x128xf32> -> vector<8x128xf32>
    %59 = arith.addf %57, %58 : vector<8x128xf32>
    %60 = math.tanh %59 : vector<8x128xf32>
    %61 = arith.index_cast %c5_i32 : i32 to index
    %c0_32 = arith.constant 0 : index
    %c0_33 = arith.constant 0 : index
    %62 = vector.load %arg3[%61, %c0_32, %c0_33] : memref<64x8x128xf32, #tpu.memory_space<vmem>>, vector<1x8x128xf32>
    %63 = vector.shape_cast %62 : vector<1x8x128xf32> to vector<8x128xf32>
    %64 = vector.shape_cast %60 : vector<8x128xf32> to vector<1x8x128xf32>
    tpu.vector_store %arg3[%61, %c0_32, %c0_33], %64 {strides = array<i32>} : memref<64x8x128xf32, #tpu.memory_space<vmem>>, vector<1x8x128xf32>,
    %c6_i32 = arith.constant 6 : i32
    %65 = arith.index_cast %c6_i32 : i32 to index
    %c0_34 = arith.constant 0 : index
    %c0_35 = arith.constant 0 : index
    %66 = vector.load %arg1[%65, %c0_34, %c0_35] : memref<64x8x128xf32, #tpu.memory_space<vmem>>, vector<1x8x128xf32>
    %67 = vector.shape_cast %66 : vector<1x8x128xf32> to vector<8x128xf32>
    %cst_36 = arith.constant dense<0.000000e+00> : vector<8x128xf32>
    %68 = tpu.matmul %60, %4, %cst_36 {dimension_numbers = #tpu.dot_dimension_numbers<[1], [0], [0], [1], [0, 0, 1, 1], [], []>} : vector<8x128xf32>, vector<128x128xf32>, vector<8x128xf32> -> vector<8x128xf32>
    %69 = arith.addf %67, %68 : vector<8x128xf32>
    %70 = math.tanh %69 : vector<8x128xf32>
    %71 = arith.index_cast %c6_i32 : i32 to index
    %c0_37 = arith.constant 0 : index
    %c0_38 = arith.constant 0 : index
    %72 = vector.load %arg3[%71, %c0_37, %c0_38] : memref<64x8x128xf32, #tpu.memory_space<vmem>>, vector<1x8x128xf32>
    %73 = vector.shape_cast %72 : vector<1x8x128xf32> to vector<8x128xf32>
    %74 = vector.shape_cast %70 : vector<8x128xf32> to vector<1x8x128xf32>
    tpu.vector_store %arg3[%71, %c0_37, %c0_38], %74 {strides = array<i32>} : memref<64x8x128xf32, #tpu.memory_space<vmem>>, vector<1x8x128xf32>,
    %c7_i32 = arith.constant 7 : i32
    %75 = arith.index_cast %c7_i32 : i32 to index
    %c0_39 = arith.constant 0 : index
    %c0_40 = arith.constant 0 : index
    %76 = vector.load %arg1[%75, %c0_39, %c0_40] : memref<64x8x128xf32, #tpu.memory_space<vmem>>, vector<1x8x128xf32>
    %77 = vector.shape_cast %76 : vector<1x8x128xf32> to vector<8x128xf32>
    %cst_41 = arith.constant dense<0.000000e+00> : vector<8x128xf32>
    %78 = tpu.matmul %70, %4, %cst_41 {dimension_numbers = #tpu.dot_dimension_numbers<[1], [0], [0], [1], [0, 0, 1, 1], [], []>} : vector<8x128xf32>, vector<128x128xf32>, vector<8x128xf32> -> vector<8x128xf32>
    %79 = arith.addf %77, %78 : vector<8x128xf32>
    %80 = math.tanh %79 : vector<8x128xf32>
    %81 = arith.index_cast %c7_i32 : i32 to index
    %c0_42 = arith.constant 0 : index
    %c0_43 = arith.constant 0 : index
    %82 = vector.load %arg3[%81, %c0_42, %c0_43] : memref<64x8x128xf32, #tpu.memory_space<vmem>>, vector<1x8x128xf32>
    %83 = vector.shape_cast %82 : vector<1x8x128xf32> to vector<8x128xf32>
    %84 = vector.shape_cast %80 : vector<8x128xf32> to vector<1x8x128xf32>
    tpu.vector_store %arg3[%81, %c0_42, %c0_43], %84 {strides = array<i32>} : memref<64x8x128xf32, #tpu.memory_space<vmem>>, vector<1x8x128xf32>,
    %c8_i32 = arith.constant 8 : i32
    %85 = arith.index_cast %c8_i32 : i32 to index
    %c0_44 = arith.constant 0 : index
    %c0_45 = arith.constant 0 : index
    %86 = vector.load %arg1[%85, %c0_44, %c0_45] : memref<64x8x128xf32, #tpu.memory_space<vmem>>, vector<1x8x128xf32>
    %87 = vector.shape_cast %86 : vector<1x8x128xf32> to vector<8x128xf32>
    %cst_46 = arith.constant dense<0.000000e+00> : vector<8x128xf32>
    %88 = tpu.matmul %80, %4, %cst_46 {dimension_numbers = #tpu.dot_dimension_numbers<[1], [0], [0], [1], [0, 0, 1, 1], [], []>} : vector<8x128xf32>, vector<128x128xf32>, vector<8x128xf32> -> vector<8x128xf32>
    %89 = arith.addf %87, %88 : vector<8x128xf32>
    %90 = math.tanh %89 : vector<8x128xf32>
    %91 = arith.index_cast %c8_i32 : i32 to index
    %c0_47 = arith.constant 0 : index
    %c0_48 = arith.constant 0 : index
    %92 = vector.load %arg3[%91, %c0_47, %c0_48] : memref<64x8x128xf32, #tpu.memory_space<vmem>>, vector<1x8x128xf32>
    %93 = vector.shape_cast %92 : vector<1x8x128xf32> to vector<8x128xf32>
    %94 = vector.shape_cast %90 : vector<8x128xf32> to vector<1x8x128xf32>
    tpu.vector_store %arg3[%91, %c0_47, %c0_48], %94 {strides = array<i32>} : memref<64x8x128xf32, #tpu.memory_space<vmem>>, vector<1x8x128xf32>,
    %c9_i32 = arith.constant 9 : i32
    %95 = arith.index_cast %c9_i32 : i32 to index
    %c0_49 = arith.constant 0 : index
    %c0_50 = arith.constant 0 : index
    %96 = vector.load %arg1[%95, %c0_49, %c0_50] : memref<64x8x128xf32, #tpu.memory_space<vmem>>, vector<1x8x128xf32>
    %97 = vector.shape_cast %96 : vector<1x8x128xf32> to vector<8x128xf32>
    %cst_51 = arith.constant dense<0.000000e+00> : vector<8x128xf32>
    %98 = tpu.matmul %90, %4, %cst_51 {dimension_numbers = #tpu.dot_dimension_numbers<[1], [0], [0], [1], [0, 0, 1, 1], [], []>} : vector<8x128xf32>, vector<128x128xf32>, vector<8x128xf32> -> vector<8x128xf32>
    %99 = arith.addf %97, %98 : vector<8x128xf32>
    %100 = math.tanh %99 : vector<8x128xf32>
    %101 = arith.index_cast %c9_i32 : i32 to index
    %c0_52 = arith.constant 0 : index
    %c0_53 = arith.constant 0 : index
    %102 = vector.load %arg3[%101, %c0_52, %c0_53] : memref<64x8x128xf32, #tpu.memory_space<vmem>>, vector<1x8x128xf32>
    %103 = vector.shape_cast %102 : vector<1x8x128xf32> to vector<8x128xf32>
    %104 = vector.shape_cast %100 : vector<8x128xf32> to vector<1x8x128xf32>
    tpu.vector_store %arg3[%101, %c0_52, %c0_53], %104 {strides = array<i32>} : memref<64x8x128xf32, #tpu.memory_space<vmem>>, vector<1x8x128xf32>,
    %c10_i32 = arith.constant 10 : i32
    %105 = arith.index_cast %c10_i32 : i32 to index
    %c0_54 = arith.constant 0 : index
    %c0_55 = arith.constant 0 : index
    %106 = vector.load %arg1[%105, %c0_54, %c0_55] : memref<64x8x128xf32, #tpu.memory_space<vmem>>, vector<1x8x128xf32>
    %107 = vector.shape_cast %106 : vector<1x8x128xf32> to vector<8x128xf32>
    %cst_56 = arith.constant dense<0.000000e+00> : vector<8x128xf32>
    %108 = tpu.matmul %100, %4, %cst_56 {dimension_numbers = #tpu.dot_dimension_numbers<[1], [0], [0], [1], [0, 0, 1, 1], [], []>} : vector<8x128xf32>, vector<128x128xf32>, vector<8x128xf32> -> vector<8x128xf32>
    %109 = arith.addf %107, %108 : vector<8x128xf32>
    %110 = math.tanh %109 : vector<8x128xf32>
    %111 = arith.index_cast %c10_i32 : i32 to index
    %c0_57 = arith.constant 0 : index
    %c0_58 = arith.constant 0 : index
    %112 = vector.load %arg3[%111, %c0_57, %c0_58] : memref<64x8x128xf32, #tpu.memory_space<vmem>>, vector<1x8x128xf32>
    %113 = vector.shape_cast %112 : vector<1x8x128xf32> to vector<8x128xf32>
    %114 = vector.shape_cast %110 : vector<8x128xf32> to vector<1x8x128xf32>
    tpu.vector_store %arg3[%111, %c0_57, %c0_58], %114 {strides = array<i32>} : memref<64x8x128xf32, #tpu.memory_space<vmem>>, vector<1x8x128xf32>,
    %c11_i32 = arith.constant 11 : i32
    %115 = arith.index_cast %c11_i32 : i32 to index
    %c0_59 = arith.constant 0 : index
    %c0_60 = arith.constant 0 : index
    %116 = vector.load %arg1[%115, %c0_59, %c0_60] : memref<64x8x128xf32, #tpu.memory_space<vmem>>, vector<1x8x128xf32>
    %117 = vector.shape_cast %116 : vector<1x8x128xf32> to vector<8x128xf32>
    %cst_61 = arith.constant dense<0.000000e+00> : vector<8x128xf32>
    %118 = tpu.matmul %110, %4, %cst_61 {dimension_numbers = #tpu.dot_dimension_numbers<[1], [0], [0], [1], [0, 0, 1, 1], [], []>} : vector<8x128xf32>, vector<128x128xf32>, vector<8x128xf32> -> vector<8x128xf32>
    %119 = arith.addf %117, %118 : vector<8x128xf32>
    %120 = math.tanh %119 : vector<8x128xf32>
    %121 = arith.index_cast %c11_i32 : i32 to index
    %c0_62 = arith.constant 0 : index
    %c0_63 = arith.constant 0 : index
    %122 = vector.load %arg3[%121, %c0_62, %c0_63] : memref<64x8x128xf32, #tpu.memory_space<vmem>>, vector<1x8x128xf32>
    %123 = vector.shape_cast %122 : vector<1x8x128xf32> to vector<8x128xf32>
    %124 = vector.shape_cast %120 : vector<8x128xf32> to vector<1x8x128xf32>
    tpu.vector_store %arg3[%121, %c0_62, %c0_63], %124 {strides = array<i32>} : memref<64x8x128xf32, #tpu.memory_space<vmem>>, vector<1x8x128xf32>,
    %c12_i32 = arith.constant 12 : i32
    %125 = arith.index_cast %c12_i32 : i32 to index
    %c0_64 = arith.constant 0 : index
    %c0_65 = arith.constant 0 : index
    %126 = vector.load %arg1[%125, %c0_64, %c0_65] : memref<64x8x128xf32, #tpu.memory_space<vmem>>, vector<1x8x128xf32>
    %127 = vector.shape_cast %126 : vector<1x8x128xf32> to vector<8x128xf32>
    %cst_66 = arith.constant dense<0.000000e+00> : vector<8x128xf32>
    %128 = tpu.matmul %120, %4, %cst_66 {dimension_numbers = #tpu.dot_dimension_numbers<[1], [0], [0], [1], [0, 0, 1, 1], [], []>} : vector<8x128xf32>, vector<128x128xf32>, vector<8x128xf32> -> vector<8x128xf32>
    %129 = arith.addf %127, %128 : vector<8x128xf32>
    %130 = math.tanh %129 : vector<8x128xf32>
    %131 = arith.index_cast %c12_i32 : i32 to index
    %c0_67 = arith.constant 0 : index
    %c0_68 = arith.constant 0 : index
    %132 = vector.load %arg3[%131, %c0_67, %c0_68] : memref<64x8x128xf32, #tpu.memory_space<vmem>>, vector<1x8x128xf32>
    %133 = vector.shape_cast %132 : vector<1x8x128xf32> to vector<8x128xf32>
    %134 = vector.shape_cast %130 : vector<8x128xf32> to vector<1x8x128xf32>
    tpu.vector_store %arg3[%131, %c0_67, %c0_68], %134 {strides = array<i32>} : memref<64x8x128xf32, #tpu.memory_space<vmem>>, vector<1x8x128xf32>,
    %c13_i32 = arith.constant 13 : i32
    %135 = arith.index_cast %c13_i32 : i32 to index
    %c0_69 = arith.constant 0 : index
    %c0_70 = arith.constant 0 : index
    %136 = vector.load %arg1[%135, %c0_69, %c0_70] : memref<64x8x128xf32, #tpu.memory_space<vmem>>, vector<1x8x128xf32>
    %137 = vector.shape_cast %136 : vector<1x8x128xf32> to vector<8x128xf32>
    %cst_71 = arith.constant dense<0.000000e+00> : vector<8x128xf32>
    %138 = tpu.matmul %130, %4, %cst_71 {dimension_numbers = #tpu.dot_dimension_numbers<[1], [0], [0], [1], [0, 0, 1, 1], [], []>} : vector<8x128xf32>, vector<128x128xf32>, vector<8x128xf32> -> vector<8x128xf32>
    %139 = arith.addf %137, %138 : vector<8x128xf32>
    %140 = math.tanh %139 : vector<8x128xf32>
    %141 = arith.index_cast %c13_i32 : i32 to index
    %c0_72 = arith.constant 0 : index
    %c0_73 = arith.constant 0 : index
    %142 = vector.load %arg3[%141, %c0_72, %c0_73] : memref<64x8x128xf32, #tpu.memory_space<vmem>>, vector<1x8x128xf32>
    %143 = vector.shape_cast %142 : vector<1x8x128xf32> to vector<8x128xf32>
    %144 = vector.shape_cast %140 : vector<8x128xf32> to vector<1x8x128xf32>
    tpu.vector_store %arg3[%141, %c0_72, %c0_73], %144 {strides = array<i32>} : memref<64x8x128xf32, #tpu.memory_space<vmem>>, vector<1x8x128xf32>,
    %c14_i32 = arith.constant 14 : i32
    %145 = arith.index_cast %c14_i32 : i32 to index
    %c0_74 = arith.constant 0 : index
    %c0_75 = arith.constant 0 : index
    %146 = vector.load %arg1[%145, %c0_74, %c0_75] : memref<64x8x128xf32, #tpu.memory_space<vmem>>, vector<1x8x128xf32>
    %147 = vector.shape_cast %146 : vector<1x8x128xf32> to vector<8x128xf32>
    %cst_76 = arith.constant dense<0.000000e+00> : vector<8x128xf32>
    %148 = tpu.matmul %140, %4, %cst_76 {dimension_numbers = #tpu.dot_dimension_numbers<[1], [0], [0], [1], [0, 0, 1, 1], [], []>} : vector<8x128xf32>, vector<128x128xf32>, vector<8x128xf32> -> vector<8x128xf32>
    %149 = arith.addf %147, %148 : vector<8x128xf32>
    %150 = math.tanh %149 : vector<8x128xf32>
    %151 = arith.index_cast %c14_i32 : i32 to index
    %c0_77 = arith.constant 0 : index
    %c0_78 = arith.constant 0 : index
    %152 = vector.load %arg3[%151, %c0_77, %c0_78] : memref<64x8x128xf32, #tpu.memory_space<vmem>>, vector<1x8x128xf32>
    %153 = vector.shape_cast %152 : vector<1x8x128xf32> to vector<8x128xf32>
    %154 = vector.shape_cast %150 : vector<8x128xf32> to vector<1x8x128xf32>
    tpu.vector_store %arg3[%151, %c0_77, %c0_78], %154 {strides = array<i32>} : memref<64x8x128xf32, #tpu.memory_space<vmem>>, vector<1x8x128xf32>,
    %c15_i32 = arith.constant 15 : i32
    %155 = arith.index_cast %c15_i32 : i32 to index
    %c0_79 = arith.constant 0 : index
    %c0_80 = arith.constant 0 : index
    %156 = vector.load %arg1[%155, %c0_79, %c0_80] : memref<64x8x128xf32, #tpu.memory_space<vmem>>, vector<1x8x128xf32>
    %157 = vector.shape_cast %156 : vector<1x8x128xf32> to vector<8x128xf32>
    %cst_81 = arith.constant dense<0.000000e+00> : vector<8x128xf32>
    %158 = tpu.matmul %150, %4, %cst_81 {dimension_numbers = #tpu.dot_dimension_numbers<[1], [0], [0], [1], [0, 0, 1, 1], [], []>} : vector<8x128xf32>, vector<128x128xf32>, vector<8x128xf32> -> vector<8x128xf32>
    %159 = arith.addf %157, %158 : vector<8x128xf32>
    %160 = math.tanh %159 : vector<8x128xf32>
    %161 = arith.index_cast %c15_i32 : i32 to index
    %c0_82 = arith.constant 0 : index
    %c0_83 = arith.constant 0 : index
    %162 = vector.load %arg3[%161, %c0_82, %c0_83] : memref<64x8x128xf32, #tpu.memory_space<vmem>>, vector<1x8x128xf32>
    %163 = vector.shape_cast %162 : vector<1x8x128xf32> to vector<8x128xf32>
    %164 = vector.shape_cast %160 : vector<8x128xf32> to vector<1x8x128xf32>
    tpu.vector_store %arg3[%161, %c0_82, %c0_83], %164 {strides = array<i32>} : memref<64x8x128xf32, #tpu.memory_space<vmem>>, vector<1x8x128xf32>,
    %c16_i32 = arith.constant 16 : i32
    %165 = arith.index_cast %c16_i32 : i32 to index
    %c0_84 = arith.constant 0 : index
    %c0_85 = arith.constant 0 : index
    %166 = vector.load %arg1[%165, %c0_84, %c0_85] : memref<64x8x128xf32, #tpu.memory_space<vmem>>, vector<1x8x128xf32>
    %167 = vector.shape_cast %166 : vector<1x8x128xf32> to vector<8x128xf32>
    %cst_86 = arith.constant dense<0.000000e+00> : vector<8x128xf32>
    %168 = tpu.matmul %160, %4, %cst_86 {dimension_numbers = #tpu.dot_dimension_numbers<[1], [0], [0], [1], [0, 0, 1, 1], [], []>} : vector<8x128xf32>, vector<128x128xf32>, vector<8x128xf32> -> vector<8x128xf32>
    %169 = arith.addf %167, %168 : vector<8x128xf32>
    %170 = math.tanh %169 : vector<8x128xf32>
    %171 = arith.index_cast %c16_i32 : i32 to index
    %c0_87 = arith.constant 0 : index
    %c0_88 = arith.constant 0 : index
    %172 = vector.load %arg3[%171, %c0_87, %c0_88] : memref<64x8x128xf32, #tpu.memory_space<vmem>>, vector<1x8x128xf32>
    %173 = vector.shape_cast %172 : vector<1x8x128xf32> to vector<8x128xf32>
    %174 = vector.shape_cast %170 : vector<8x128xf32> to vector<1x8x128xf32>
    tpu.vector_store %arg3[%171, %c0_87, %c0_88], %174 {strides = array<i32>} : memref<64x8x128xf32, #tpu.memory_space<vmem>>, vector<1x8x128xf32>,
    %c17_i32 = arith.constant 17 : i32
    %175 = arith.index_cast %c17_i32 : i32 to index
    %c0_89 = arith.constant 0 : index
    %c0_90 = arith.constant 0 : index
    %176 = vector.load %arg1[%175, %c0_89, %c0_90] : memref<64x8x128xf32, #tpu.memory_space<vmem>>, vector<1x8x128xf32>
    %177 = vector.shape_cast %176 : vector<1x8x128xf32> to vector<8x128xf32>
    %cst_91 = arith.constant dense<0.000000e+00> : vector<8x128xf32>
    %178 = tpu.matmul %170, %4, %cst_91 {dimension_numbers = #tpu.dot_dimension_numbers<[1], [0], [0], [1], [0, 0, 1, 1], [], []>} : vector<8x128xf32>, vector<128x128xf32>, vector<8x128xf32> -> vector<8x128xf32>
    %179 = arith.addf %177, %178 : vector<8x128xf32>
    %180 = math.tanh %179 : vector<8x128xf32>
    %181 = arith.index_cast %c17_i32 : i32 to index
    %c0_92 = arith.constant 0 : index
    %c0_93 = arith.constant 0 : index
    %182 = vector.load %arg3[%181, %c0_92, %c0_93] : memref<64x8x128xf32, #tpu.memory_space<vmem>>, vector<1x8x128xf32>
    %183 = vector.shape_cast %182 : vector<1x8x128xf32> to vector<8x128xf32>
    %184 = vector.shape_cast %180 : vector<8x128xf32> to vector<1x8x128xf32>
    tpu.vector_store %arg3[%181, %c0_92, %c0_93], %184 {strides = array<i32>} : memref<64x8x128xf32, #tpu.memory_space<vmem>>, vector<1x8x128xf32>,
    %c18_i32 = arith.constant 18 : i32
    %185 = arith.index_cast %c18_i32 : i32 to index
    %c0_94 = arith.constant 0 : index
    %c0_95 = arith.constant 0 : index
    %186 = vector.load %arg1[%185, %c0_94, %c0_95] : memref<64x8x128xf32, #tpu.memory_space<vmem>>, vector<1x8x128xf32>
    %187 = vector.shape_cast %186 : vector<1x8x128xf32> to vector<8x128xf32>
    %cst_96 = arith.constant dense<0.000000e+00> : vector<8x128xf32>
    %188 = tpu.matmul %180, %4, %cst_96 {dimension_numbers = #tpu.dot_dimension_numbers<[1], [0], [0], [1], [0, 0, 1, 1], [], []>} : vector<8x128xf32>, vector<128x128xf32>, vector<8x128xf32> -> vector<8x128xf32>
    %189 = arith.addf %187, %188 : vector<8x128xf32>
    %190 = math.tanh %189 : vector<8x128xf32>
    %191 = arith.index_cast %c18_i32 : i32 to index
    %c0_97 = arith.constant 0 : index
    %c0_98 = arith.constant 0 : index
    %192 = vector.load %arg3[%191, %c0_97, %c0_98] : memref<64x8x128xf32, #tpu.memory_space<vmem>>, vector<1x8x128xf32>
    %193 = vector.shape_cast %192 : vector<1x8x128xf32> to vector<8x128xf32>
    %194 = vector.shape_cast %190 : vector<8x128xf32> to vector<1x8x128xf32>
    tpu.vector_store %arg3[%191, %c0_97, %c0_98], %194 {strides = array<i32>} : memref<64x8x128xf32, #tpu.memory_space<vmem>>, vector<1x8x128xf32>,
    %c19_i32 = arith.constant 19 : i32
    %195 = arith.index_cast %c19_i32 : i32 to index
    %c0_99 = arith.constant 0 : index
    %c0_100 = arith.constant 0 : index
    %196 = vector.load %arg1[%195, %c0_99, %c0_100] : memref<64x8x128xf32, #tpu.memory_space<vmem>>, vector<1x8x128xf32>
    %197 = vector.shape_cast %196 : vector<1x8x128xf32> to vector<8x128xf32>
    %cst_101 = arith.constant dense<0.000000e+00> : vector<8x128xf32>
    %198 = tpu.matmul %190, %4, %cst_101 {dimension_numbers = #tpu.dot_dimension_numbers<[1], [0], [0], [1], [0, 0, 1, 1], [], []>} : vector<8x128xf32>, vector<128x128xf32>, vector<8x128xf32> -> vector<8x128xf32>
    %199 = arith.addf %197, %198 : vector<8x128xf32>
    %200 = math.tanh %199 : vector<8x128xf32>
    %201 = arith.index_cast %c19_i32 : i32 to index
    %c0_102 = arith.constant 0 : index
    %c0_103 = arith.constant 0 : index
    %202 = vector.load %arg3[%201, %c0_102, %c0_103] : memref<64x8x128xf32, #tpu.memory_space<vmem>>, vector<1x8x128xf32>
    %203 = vector.shape_cast %202 : vector<1x8x128xf32> to vector<8x128xf32>
    %204 = vector.shape_cast %200 : vector<8x128xf32> to vector<1x8x128xf32>
    tpu.vector_store %arg3[%201, %c0_102, %c0_103], %204 {strides = array<i32>} : memref<64x8x128xf32, #tpu.memory_space<vmem>>, vector<1x8x128xf32>,
    %c20_i32 = arith.constant 20 : i32
    %205 = arith.index_cast %c20_i32 : i32 to index
    %c0_104 = arith.constant 0 : index
    %c0_105 = arith.constant 0 : index
    %206 = vector.load %arg1[%205, %c0_104, %c0_105] : memref<64x8x128xf32, #tpu.memory_space<vmem>>, vector<1x8x128xf32>
    %207 = vector.shape_cast %206 : vector<1x8x128xf32> to vector<8x128xf32>
    %cst_106 = arith.constant dense<0.000000e+00> : vector<8x128xf32>
    %208 = tpu.matmul %200, %4, %cst_106 {dimension_numbers = #tpu.dot_dimension_numbers<[1], [0], [0], [1], [0, 0, 1, 1], [], []>} : vector<8x128xf32>, vector<128x128xf32>, vector<8x128xf32> -> vector<8x128xf32>
    %209 = arith.addf %207, %208 : vector<8x128xf32>
    %210 = math.tanh %209 : vector<8x128xf32>
    %211 = arith.index_cast %c20_i32 : i32 to index
    %c0_107 = arith.constant 0 : index
    %c0_108 = arith.constant 0 : index
    %212 = vector.load %arg3[%211, %c0_107, %c0_108] : memref<64x8x128xf32, #tpu.memory_space<vmem>>, vector<1x8x128xf32>
    %213 = vector.shape_cast %212 : vector<1x8x128xf32> to vector<8x128xf32>
    %214 = vector.shape_cast %210 : vector<8x128xf32> to vector<1x8x128xf32>
    tpu.vector_store %arg3[%211, %c0_107, %c0_108], %214 {strides = array<i32>} : memref<64x8x128xf32, #tpu.memory_space<vmem>>, vector<1x8x128xf32>,
    %c21_i32 = arith.constant 21 : i32
    %215 = arith.index_cast %c21_i32 : i32 to index
    %c0_109 = arith.constant 0 : index
    %c0_110 = arith.constant 0 : index
    %216 = vector.load %arg1[%215, %c0_109, %c0_110] : memref<64x8x128xf32, #tpu.memory_space<vmem>>, vector<1x8x128xf32>
    %217 = vector.shape_cast %216 : vector<1x8x128xf32> to vector<8x128xf32>
    %cst_111 = arith.constant dense<0.000000e+00> : vector<8x128xf32>
    %218 = tpu.matmul %210, %4, %cst_111 {dimension_numbers = #tpu.dot_dimension_numbers<[1], [0], [0], [1], [0, 0, 1, 1], [], []>} : vector<8x128xf32>, vector<128x128xf32>, vector<8x128xf32> -> vector<8x128xf32>
    %219 = arith.addf %217, %218 : vector<8x128xf32>
    %220 = math.tanh %219 : vector<8x128xf32>
    %221 = arith.index_cast %c21_i32 : i32 to index
    %c0_112 = arith.constant 0 : index
    %c0_113 = arith.constant 0 : index
    %222 = vector.load %arg3[%221, %c0_112, %c0_113] : memref<64x8x128xf32, #tpu.memory_space<vmem>>, vector<1x8x128xf32>
    %223 = vector.shape_cast %222 : vector<1x8x128xf32> to vector<8x128xf32>
    %224 = vector.shape_cast %220 : vector<8x128xf32> to vector<1x8x128xf32>
    tpu.vector_store %arg3[%221, %c0_112, %c0_113], %224 {strides = array<i32>} : memref<64x8x128xf32, #tpu.memory_space<vmem>>, vector<1x8x128xf32>,
    %c22_i32 = arith.constant 22 : i32
    %225 = arith.index_cast %c22_i32 : i32 to index
    %c0_114 = arith.constant 0 : index
    %c0_115 = arith.constant 0 : index
    %226 = vector.load %arg1[%225, %c0_114, %c0_115] : memref<64x8x128xf32, #tpu.memory_space<vmem>>, vector<1x8x128xf32>
    %227 = vector.shape_cast %226 : vector<1x8x128xf32> to vector<8x128xf32>
    %cst_116 = arith.constant dense<0.000000e+00> : vector<8x128xf32>
    %228 = tpu.matmul %220, %4, %cst_116 {dimension_numbers = #tpu.dot_dimension_numbers<[1], [0], [0], [1], [0, 0, 1, 1], [], []>} : vector<8x128xf32>, vector<128x128xf32>, vector<8x128xf32> -> vector<8x128xf32>
    %229 = arith.addf %227, %228 : vector<8x128xf32>
    %230 = math.tanh %229 : vector<8x128xf32>
    %231 = arith.index_cast %c22_i32 : i32 to index
    %c0_117 = arith.constant 0 : index
    %c0_118 = arith.constant 0 : index
    %232 = vector.load %arg3[%231, %c0_117, %c0_118] : memref<64x8x128xf32, #tpu.memory_space<vmem>>, vector<1x8x128xf32>
    %233 = vector.shape_cast %232 : vector<1x8x128xf32> to vector<8x128xf32>
    %234 = vector.shape_cast %230 : vector<8x128xf32> to vector<1x8x128xf32>
    tpu.vector_store %arg3[%231, %c0_117, %c0_118], %234 {strides = array<i32>} : memref<64x8x128xf32, #tpu.memory_space<vmem>>, vector<1x8x128xf32>,
    %c23_i32 = arith.constant 23 : i32
    %235 = arith.index_cast %c23_i32 : i32 to index
    %c0_119 = arith.constant 0 : index
    %c0_120 = arith.constant 0 : index
    %236 = vector.load %arg1[%235, %c0_119, %c0_120] : memref<64x8x128xf32, #tpu.memory_space<vmem>>, vector<1x8x128xf32>
    %237 = vector.shape_cast %236 : vector<1x8x128xf32> to vector<8x128xf32>
    %cst_121 = arith.constant dense<0.000000e+00> : vector<8x128xf32>
    %238 = tpu.matmul %230, %4, %cst_121 {dimension_numbers = #tpu.dot_dimension_numbers<[1], [0], [0], [1], [0, 0, 1, 1], [], []>} : vector<8x128xf32>, vector<128x128xf32>, vector<8x128xf32> -> vector<8x128xf32>
    %239 = arith.addf %237, %238 : vector<8x128xf32>
    %240 = math.tanh %239 : vector<8x128xf32>
    %241 = arith.index_cast %c23_i32 : i32 to index
    %c0_122 = arith.constant 0 : index
    %c0_123 = arith.constant 0 : index
    %242 = vector.load %arg3[%241, %c0_122, %c0_123] : memref<64x8x128xf32, #tpu.memory_space<vmem>>, vector<1x8x128xf32>
    %243 = vector.shape_cast %242 : vector<1x8x128xf32> to vector<8x128xf32>
    %244 = vector.shape_cast %240 : vector<8x128xf32> to vector<1x8x128xf32>
    tpu.vector_store %arg3[%241, %c0_122, %c0_123], %244 {strides = array<i32>} : memref<64x8x128xf32, #tpu.memory_space<vmem>>, vector<1x8x128xf32>,
    %c24_i32 = arith.constant 24 : i32
    %245 = arith.index_cast %c24_i32 : i32 to index
    %c0_124 = arith.constant 0 : index
    %c0_125 = arith.constant 0 : index
    %246 = vector.load %arg1[%245, %c0_124, %c0_125] : memref<64x8x128xf32, #tpu.memory_space<vmem>>, vector<1x8x128xf32>
    %247 = vector.shape_cast %246 : vector<1x8x128xf32> to vector<8x128xf32>
    %cst_126 = arith.constant dense<0.000000e+00> : vector<8x128xf32>
    %248 = tpu.matmul %240, %4, %cst_126 {dimension_numbers = #tpu.dot_dimension_numbers<[1], [0], [0], [1], [0, 0, 1, 1], [], []>} : vector<8x128xf32>, vector<128x128xf32>, vector<8x128xf32> -> vector<8x128xf32>
    %249 = arith.addf %247, %248 : vector<8x128xf32>
    %250 = math.tanh %249 : vector<8x128xf32>
    %251 = arith.index_cast %c24_i32 : i32 to index
    %c0_127 = arith.constant 0 : index
    %c0_128 = arith.constant 0 : index
    %252 = vector.load %arg3[%251, %c0_127, %c0_128] : memref<64x8x128xf32, #tpu.memory_space<vmem>>, vector<1x8x128xf32>
    %253 = vector.shape_cast %252 : vector<1x8x128xf32> to vector<8x128xf32>
    %254 = vector.shape_cast %250 : vector<8x128xf32> to vector<1x8x128xf32>
    tpu.vector_store %arg3[%251, %c0_127, %c0_128], %254 {strides = array<i32>} : memref<64x8x128xf32, #tpu.memory_space<vmem>>, vector<1x8x128xf32>,
    %c25_i32 = arith.constant 25 : i32
    %255 = arith.index_cast %c25_i32 : i32 to index
    %c0_129 = arith.constant 0 : index
    %c0_130 = arith.constant 0 : index
    %256 = vector.load %arg1[%255, %c0_129, %c0_130] : memref<64x8x128xf32, #tpu.memory_space<vmem>>, vector<1x8x128xf32>
    %257 = vector.shape_cast %256 : vector<1x8x128xf32> to vector<8x128xf32>
    %cst_131 = arith.constant dense<0.000000e+00> : vector<8x128xf32>
    %258 = tpu.matmul %250, %4, %cst_131 {dimension_numbers = #tpu.dot_dimension_numbers<[1], [0], [0], [1], [0, 0, 1, 1], [], []>} : vector<8x128xf32>, vector<128x128xf32>, vector<8x128xf32> -> vector<8x128xf32>
    %259 = arith.addf %257, %258 : vector<8x128xf32>
    %260 = math.tanh %259 : vector<8x128xf32>
    %261 = arith.index_cast %c25_i32 : i32 to index
    %c0_132 = arith.constant 0 : index
    %c0_133 = arith.constant 0 : index
    %262 = vector.load %arg3[%261, %c0_132, %c0_133] : memref<64x8x128xf32, #tpu.memory_space<vmem>>, vector<1x8x128xf32>
    %263 = vector.shape_cast %262 : vector<1x8x128xf32> to vector<8x128xf32>
    %264 = vector.shape_cast %260 : vector<8x128xf32> to vector<1x8x128xf32>
    tpu.vector_store %arg3[%261, %c0_132, %c0_133], %264 {strides = array<i32>} : memref<64x8x128xf32, #tpu.memory_space<vmem>>, vector<1x8x128xf32>,
    %c26_i32 = arith.constant 26 : i32
    %265 = arith.index_cast %c26_i32 : i32 to index
    %c0_134 = arith.constant 0 : index
    %c0_135 = arith.constant 0 : index
    %266 = vector.load %arg1[%265, %c0_134, %c0_135] : memref<64x8x128xf32, #tpu.memory_space<vmem>>, vector<1x8x128xf32>
    %267 = vector.shape_cast %266 : vector<1x8x128xf32> to vector<8x128xf32>
    %cst_136 = arith.constant dense<0.000000e+00> : vector<8x128xf32>
    %268 = tpu.matmul %260, %4, %cst_136 {dimension_numbers = #tpu.dot_dimension_numbers<[1], [0], [0], [1], [0, 0, 1, 1], [], []>} : vector<8x128xf32>, vector<128x128xf32>, vector<8x128xf32> -> vector<8x128xf32>
    %269 = arith.addf %267, %268 : vector<8x128xf32>
    %270 = math.tanh %269 : vector<8x128xf32>
    %271 = arith.index_cast %c26_i32 : i32 to index
    %c0_137 = arith.constant 0 : index
    %c0_138 = arith.constant 0 : index
    %272 = vector.load %arg3[%271, %c0_137, %c0_138] : memref<64x8x128xf32, #tpu.memory_space<vmem>>, vector<1x8x128xf32>
    %273 = vector.shape_cast %272 : vector<1x8x128xf32> to vector<8x128xf32>
    %274 = vector.shape_cast %270 : vector<8x128xf32> to vector<1x8x128xf32>
    tpu.vector_store %arg3[%271, %c0_137, %c0_138], %274 {strides = array<i32>} : memref<64x8x128xf32, #tpu.memory_space<vmem>>, vector<1x8x128xf32>,
    %c27_i32 = arith.constant 27 : i32
    %275 = arith.index_cast %c27_i32 : i32 to index
    %c0_139 = arith.constant 0 : index
    %c0_140 = arith.constant 0 : index
    %276 = vector.load %arg1[%275, %c0_139, %c0_140] : memref<64x8x128xf32, #tpu.memory_space<vmem>>, vector<1x8x128xf32>
    %277 = vector.shape_cast %276 : vector<1x8x128xf32> to vector<8x128xf32>
    %cst_141 = arith.constant dense<0.000000e+00> : vector<8x128xf32>
    %278 = tpu.matmul %270, %4, %cst_141 {dimension_numbers = #tpu.dot_dimension_numbers<[1], [0], [0], [1], [0, 0, 1, 1], [], []>} : vector<8x128xf32>, vector<128x128xf32>, vector<8x128xf32> -> vector<8x128xf32>
    %279 = arith.addf %277, %278 : vector<8x128xf32>
    %280 = math.tanh %279 : vector<8x128xf32>
    %281 = arith.index_cast %c27_i32 : i32 to index
    %c0_142 = arith.constant 0 : index
    %c0_143 = arith.constant 0 : index
    %282 = vector.load %arg3[%281, %c0_142, %c0_143] : memref<64x8x128xf32, #tpu.memory_space<vmem>>, vector<1x8x128xf32>
    %283 = vector.shape_cast %282 : vector<1x8x128xf32> to vector<8x128xf32>
    %284 = vector.shape_cast %280 : vector<8x128xf32> to vector<1x8x128xf32>
    tpu.vector_store %arg3[%281, %c0_142, %c0_143], %284 {strides = array<i32>} : memref<64x8x128xf32, #tpu.memory_space<vmem>>, vector<1x8x128xf32>,
    %c28_i32 = arith.constant 28 : i32
    %285 = arith.index_cast %c28_i32 : i32 to index
    %c0_144 = arith.constant 0 : index
    %c0_145 = arith.constant 0 : index
    %286 = vector.load %arg1[%285, %c0_144, %c0_145] : memref<64x8x128xf32, #tpu.memory_space<vmem>>, vector<1x8x128xf32>
    %287 = vector.shape_cast %286 : vector<1x8x128xf32> to vector<8x128xf32>
    %cst_146 = arith.constant dense<0.000000e+00> : vector<8x128xf32>
    %288 = tpu.matmul %280, %4, %cst_146 {dimension_numbers = #tpu.dot_dimension_numbers<[1], [0], [0], [1], [0, 0, 1, 1], [], []>} : vector<8x128xf32>, vector<128x128xf32>, vector<8x128xf32> -> vector<8x128xf32>
    %289 = arith.addf %287, %288 : vector<8x128xf32>
    %290 = math.tanh %289 : vector<8x128xf32>
    %291 = arith.index_cast %c28_i32 : i32 to index
    %c0_147 = arith.constant 0 : index
    %c0_148 = arith.constant 0 : index
    %292 = vector.load %arg3[%291, %c0_147, %c0_148] : memref<64x8x128xf32, #tpu.memory_space<vmem>>, vector<1x8x128xf32>
    %293 = vector.shape_cast %292 : vector<1x8x128xf32> to vector<8x128xf32>
    %294 = vector.shape_cast %290 : vector<8x128xf32> to vector<1x8x128xf32>
    tpu.vector_store %arg3[%291, %c0_147, %c0_148], %294 {strides = array<i32>} : memref<64x8x128xf32, #tpu.memory_space<vmem>>, vector<1x8x128xf32>,
    %c29_i32 = arith.constant 29 : i32
    %295 = arith.index_cast %c29_i32 : i32 to index
    %c0_149 = arith.constant 0 : index
    %c0_150 = arith.constant 0 : index
    %296 = vector.load %arg1[%295, %c0_149, %c0_150] : memref<64x8x128xf32, #tpu.memory_space<vmem>>, vector<1x8x128xf32>
    %297 = vector.shape_cast %296 : vector<1x8x128xf32> to vector<8x128xf32>
    %cst_151 = arith.constant dense<0.000000e+00> : vector<8x128xf32>
    %298 = tpu.matmul %290, %4, %cst_151 {dimension_numbers = #tpu.dot_dimension_numbers<[1], [0], [0], [1], [0, 0, 1, 1], [], []>} : vector<8x128xf32>, vector<128x128xf32>, vector<8x128xf32> -> vector<8x128xf32>
    %299 = arith.addf %297, %298 : vector<8x128xf32>
    %300 = math.tanh %299 : vector<8x128xf32>
    %301 = arith.index_cast %c29_i32 : i32 to index
    %c0_152 = arith.constant 0 : index
    %c0_153 = arith.constant 0 : index
    %302 = vector.load %arg3[%301, %c0_152, %c0_153] : memref<64x8x128xf32, #tpu.memory_space<vmem>>, vector<1x8x128xf32>
    %303 = vector.shape_cast %302 : vector<1x8x128xf32> to vector<8x128xf32>
    %304 = vector.shape_cast %300 : vector<8x128xf32> to vector<1x8x128xf32>
    tpu.vector_store %arg3[%301, %c0_152, %c0_153], %304 {strides = array<i32>} : memref<64x8x128xf32, #tpu.memory_space<vmem>>, vector<1x8x128xf32>,
    %c30_i32 = arith.constant 30 : i32
    %305 = arith.index_cast %c30_i32 : i32 to index
    %c0_154 = arith.constant 0 : index
    %c0_155 = arith.constant 0 : index
    %306 = vector.load %arg1[%305, %c0_154, %c0_155] : memref<64x8x128xf32, #tpu.memory_space<vmem>>, vector<1x8x128xf32>
    %307 = vector.shape_cast %306 : vector<1x8x128xf32> to vector<8x128xf32>
    %cst_156 = arith.constant dense<0.000000e+00> : vector<8x128xf32>
    %308 = tpu.matmul %300, %4, %cst_156 {dimension_numbers = #tpu.dot_dimension_numbers<[1], [0], [0], [1], [0, 0, 1, 1], [], []>} : vector<8x128xf32>, vector<128x128xf32>, vector<8x128xf32> -> vector<8x128xf32>
    %309 = arith.addf %307, %308 : vector<8x128xf32>
    %310 = math.tanh %309 : vector<8x128xf32>
    %311 = arith.index_cast %c30_i32 : i32 to index
    %c0_157 = arith.constant 0 : index
    %c0_158 = arith.constant 0 : index
    %312 = vector.load %arg3[%311, %c0_157, %c0_158] : memref<64x8x128xf32, #tpu.memory_space<vmem>>, vector<1x8x128xf32>
    %313 = vector.shape_cast %312 : vector<1x8x128xf32> to vector<8x128xf32>
    %314 = vector.shape_cast %310 : vector<8x128xf32> to vector<1x8x128xf32>
    tpu.vector_store %arg3[%311, %c0_157, %c0_158], %314 {strides = array<i32>} : memref<64x8x128xf32, #tpu.memory_space<vmem>>, vector<1x8x128xf32>,
    %c31_i32 = arith.constant 31 : i32
    %315 = arith.index_cast %c31_i32 : i32 to index
    %c0_159 = arith.constant 0 : index
    %c0_160 = arith.constant 0 : index
    %316 = vector.load %arg1[%315, %c0_159, %c0_160] : memref<64x8x128xf32, #tpu.memory_space<vmem>>, vector<1x8x128xf32>
    %317 = vector.shape_cast %316 : vector<1x8x128xf32> to vector<8x128xf32>
    %cst_161 = arith.constant dense<0.000000e+00> : vector<8x128xf32>
    %318 = tpu.matmul %310, %4, %cst_161 {dimension_numbers = #tpu.dot_dimension_numbers<[1], [0], [0], [1], [0, 0, 1, 1], [], []>} : vector<8x128xf32>, vector<128x128xf32>, vector<8x128xf32> -> vector<8x128xf32>
    %319 = arith.addf %317, %318 : vector<8x128xf32>
    %320 = math.tanh %319 : vector<8x128xf32>
    %321 = arith.index_cast %c31_i32 : i32 to index
    %c0_162 = arith.constant 0 : index
    %c0_163 = arith.constant 0 : index
    %322 = vector.load %arg3[%321, %c0_162, %c0_163] : memref<64x8x128xf32, #tpu.memory_space<vmem>>, vector<1x8x128xf32>
    %323 = vector.shape_cast %322 : vector<1x8x128xf32> to vector<8x128xf32>
    %324 = vector.shape_cast %320 : vector<8x128xf32> to vector<1x8x128xf32>
    tpu.vector_store %arg3[%321, %c0_162, %c0_163], %324 {strides = array<i32>} : memref<64x8x128xf32, #tpu.memory_space<vmem>>, vector<1x8x128xf32>,
    %c32_i32 = arith.constant 32 : i32
    %325 = arith.index_cast %c32_i32 : i32 to index
    %c0_164 = arith.constant 0 : index
    %c0_165 = arith.constant 0 : index
    %326 = vector.load %arg1[%325, %c0_164, %c0_165] : memref<64x8x128xf32, #tpu.memory_space<vmem>>, vector<1x8x128xf32>
    %327 = vector.shape_cast %326 : vector<1x8x128xf32> to vector<8x128xf32>
    %cst_166 = arith.constant dense<0.000000e+00> : vector<8x128xf32>
    %328 = tpu.matmul %320, %4, %cst_166 {dimension_numbers = #tpu.dot_dimension_numbers<[1], [0], [0], [1], [0, 0, 1, 1], [], []>} : vector<8x128xf32>, vector<128x128xf32>, vector<8x128xf32> -> vector<8x128xf32>
    %329 = arith.addf %327, %328 : vector<8x128xf32>
    %330 = math.tanh %329 : vector<8x128xf32>
    %331 = arith.index_cast %c32_i32 : i32 to index
    %c0_167 = arith.constant 0 : index
    %c0_168 = arith.constant 0 : index
    %332 = vector.load %arg3[%331, %c0_167, %c0_168] : memref<64x8x128xf32, #tpu.memory_space<vmem>>, vector<1x8x128xf32>
    %333 = vector.shape_cast %332 : vector<1x8x128xf32> to vector<8x128xf32>
    %334 = vector.shape_cast %330 : vector<8x128xf32> to vector<1x8x128xf32>
    tpu.vector_store %arg3[%331, %c0_167, %c0_168], %334 {strides = array<i32>} : memref<64x8x128xf32, #tpu.memory_space<vmem>>, vector<1x8x128xf32>,
    %c33_i32 = arith.constant 33 : i32
    %335 = arith.index_cast %c33_i32 : i32 to index
    %c0_169 = arith.constant 0 : index
    %c0_170 = arith.constant 0 : index
    %336 = vector.load %arg1[%335, %c0_169, %c0_170] : memref<64x8x128xf32, #tpu.memory_space<vmem>>, vector<1x8x128xf32>
    %337 = vector.shape_cast %336 : vector<1x8x128xf32> to vector<8x128xf32>
    %cst_171 = arith.constant dense<0.000000e+00> : vector<8x128xf32>
    %338 = tpu.matmul %330, %4, %cst_171 {dimension_numbers = #tpu.dot_dimension_numbers<[1], [0], [0], [1], [0, 0, 1, 1], [], []>} : vector<8x128xf32>, vector<128x128xf32>, vector<8x128xf32> -> vector<8x128xf32>
    %339 = arith.addf %337, %338 : vector<8x128xf32>
    %340 = math.tanh %339 : vector<8x128xf32>
    %341 = arith.index_cast %c33_i32 : i32 to index
    %c0_172 = arith.constant 0 : index
    %c0_173 = arith.constant 0 : index
    %342 = vector.load %arg3[%341, %c0_172, %c0_173] : memref<64x8x128xf32, #tpu.memory_space<vmem>>, vector<1x8x128xf32>
    %343 = vector.shape_cast %342 : vector<1x8x128xf32> to vector<8x128xf32>
    %344 = vector.shape_cast %340 : vector<8x128xf32> to vector<1x8x128xf32>
    tpu.vector_store %arg3[%341, %c0_172, %c0_173], %344 {strides = array<i32>} : memref<64x8x128xf32, #tpu.memory_space<vmem>>, vector<1x8x128xf32>,
    %c34_i32 = arith.constant 34 : i32
    %345 = arith.index_cast %c34_i32 : i32 to index
    %c0_174 = arith.constant 0 : index
    %c0_175 = arith.constant 0 : index
    %346 = vector.load %arg1[%345, %c0_174, %c0_175] : memref<64x8x128xf32, #tpu.memory_space<vmem>>, vector<1x8x128xf32>
    %347 = vector.shape_cast %346 : vector<1x8x128xf32> to vector<8x128xf32>
    %cst_176 = arith.constant dense<0.000000e+00> : vector<8x128xf32>
    %348 = tpu.matmul %340, %4, %cst_176 {dimension_numbers = #tpu.dot_dimension_numbers<[1], [0], [0], [1], [0, 0, 1, 1], [], []>} : vector<8x128xf32>, vector<128x128xf32>, vector<8x128xf32> -> vector<8x128xf32>
    %349 = arith.addf %347, %348 : vector<8x128xf32>
    %350 = math.tanh %349 : vector<8x128xf32>
    %351 = arith.index_cast %c34_i32 : i32 to index
    %c0_177 = arith.constant 0 : index
    %c0_178 = arith.constant 0 : index
    %352 = vector.load %arg3[%351, %c0_177, %c0_178] : memref<64x8x128xf32, #tpu.memory_space<vmem>>, vector<1x8x128xf32>
    %353 = vector.shape_cast %352 : vector<1x8x128xf32> to vector<8x128xf32>
    %354 = vector.shape_cast %350 : vector<8x128xf32> to vector<1x8x128xf32>
    tpu.vector_store %arg3[%351, %c0_177, %c0_178], %354 {strides = array<i32>} : memref<64x8x128xf32, #tpu.memory_space<vmem>>, vector<1x8x128xf32>,
    %c35_i32 = arith.constant 35 : i32
    %355 = arith.index_cast %c35_i32 : i32 to index
    %c0_179 = arith.constant 0 : index
    %c0_180 = arith.constant 0 : index
    %356 = vector.load %arg1[%355, %c0_179, %c0_180] : memref<64x8x128xf32, #tpu.memory_space<vmem>>, vector<1x8x128xf32>
    %357 = vector.shape_cast %356 : vector<1x8x128xf32> to vector<8x128xf32>
    %cst_181 = arith.constant dense<0.000000e+00> : vector<8x128xf32>
    %358 = tpu.matmul %350, %4, %cst_181 {dimension_numbers = #tpu.dot_dimension_numbers<[1], [0], [0], [1], [0, 0, 1, 1], [], []>} : vector<8x128xf32>, vector<128x128xf32>, vector<8x128xf32> -> vector<8x128xf32>
    %359 = arith.addf %357, %358 : vector<8x128xf32>
    %360 = math.tanh %359 : vector<8x128xf32>
    %361 = arith.index_cast %c35_i32 : i32 to index
    %c0_182 = arith.constant 0 : index
    %c0_183 = arith.constant 0 : index
    %362 = vector.load %arg3[%361, %c0_182, %c0_183] : memref<64x8x128xf32, #tpu.memory_space<vmem>>, vector<1x8x128xf32>
    %363 = vector.shape_cast %362 : vector<1x8x128xf32> to vector<8x128xf32>
    %364 = vector.shape_cast %360 : vector<8x128xf32> to vector<1x8x128xf32>
    tpu.vector_store %arg3[%361, %c0_182, %c0_183], %364 {strides = array<i32>} : memref<64x8x128xf32, #tpu.memory_space<vmem>>, vector<1x8x128xf32>,
    %c36_i32 = arith.constant 36 : i32
    %365 = arith.index_cast %c36_i32 : i32 to index
    %c0_184 = arith.constant 0 : index
    %c0_185 = arith.constant 0 : index
    %366 = vector.load %arg1[%365, %c0_184, %c0_185] : memref<64x8x128xf32, #tpu.memory_space<vmem>>, vector<1x8x128xf32>
    %367 = vector.shape_cast %366 : vector<1x8x128xf32> to vector<8x128xf32>
    %cst_186 = arith.constant dense<0.000000e+00> : vector<8x128xf32>
    %368 = tpu.matmul %360, %4, %cst_186 {dimension_numbers = #tpu.dot_dimension_numbers<[1], [0], [0], [1], [0, 0, 1, 1], [], []>} : vector<8x128xf32>, vector<128x128xf32>, vector<8x128xf32> -> vector<8x128xf32>
    %369 = arith.addf %367, %368 : vector<8x128xf32>
    %370 = math.tanh %369 : vector<8x128xf32>
    %371 = arith.index_cast %c36_i32 : i32 to index
    %c0_187 = arith.constant 0 : index
    %c0_188 = arith.constant 0 : index
    %372 = vector.load %arg3[%371, %c0_187, %c0_188] : memref<64x8x128xf32, #tpu.memory_space<vmem>>, vector<1x8x128xf32>
    %373 = vector.shape_cast %372 : vector<1x8x128xf32> to vector<8x128xf32>
    %374 = vector.shape_cast %370 : vector<8x128xf32> to vector<1x8x128xf32>
    tpu.vector_store %arg3[%371, %c0_187, %c0_188], %374 {strides = array<i32>} : memref<64x8x128xf32, #tpu.memory_space<vmem>>, vector<1x8x128xf32>,
    %c37_i32 = arith.constant 37 : i32
    %375 = arith.index_cast %c37_i32 : i32 to index
    %c0_189 = arith.constant 0 : index
    %c0_190 = arith.constant 0 : index
    %376 = vector.load %arg1[%375, %c0_189, %c0_190] : memref<64x8x128xf32, #tpu.memory_space<vmem>>, vector<1x8x128xf32>
    %377 = vector.shape_cast %376 : vector<1x8x128xf32> to vector<8x128xf32>
    %cst_191 = arith.constant dense<0.000000e+00> : vector<8x128xf32>
    %378 = tpu.matmul %370, %4, %cst_191 {dimension_numbers = #tpu.dot_dimension_numbers<[1], [0], [0], [1], [0, 0, 1, 1], [], []>} : vector<8x128xf32>, vector<128x128xf32>, vector<8x128xf32> -> vector<8x128xf32>
    %379 = arith.addf %377, %378 : vector<8x128xf32>
    %380 = math.tanh %379 : vector<8x128xf32>
    %381 = arith.index_cast %c37_i32 : i32 to index
    %c0_192 = arith.constant 0 : index
    %c0_193 = arith.constant 0 : index
    %382 = vector.load %arg3[%381, %c0_192, %c0_193] : memref<64x8x128xf32, #tpu.memory_space<vmem>>, vector<1x8x128xf32>
    %383 = vector.shape_cast %382 : vector<1x8x128xf32> to vector<8x128xf32>
    %384 = vector.shape_cast %380 : vector<8x128xf32> to vector<1x8x128xf32>
    tpu.vector_store %arg3[%381, %c0_192, %c0_193], %384 {strides = array<i32>} : memref<64x8x128xf32, #tpu.memory_space<vmem>>, vector<1x8x128xf32>,
    %c38_i32 = arith.constant 38 : i32
    %385 = arith.index_cast %c38_i32 : i32 to index
    %c0_194 = arith.constant 0 : index
    %c0_195 = arith.constant 0 : index
    %386 = vector.load %arg1[%385, %c0_194, %c0_195] : memref<64x8x128xf32, #tpu.memory_space<vmem>>, vector<1x8x128xf32>
    %387 = vector.shape_cast %386 : vector<1x8x128xf32> to vector<8x128xf32>
    %cst_196 = arith.constant dense<0.000000e+00> : vector<8x128xf32>
    %388 = tpu.matmul %380, %4, %cst_196 {dimension_numbers = #tpu.dot_dimension_numbers<[1], [0], [0], [1], [0, 0, 1, 1], [], []>} : vector<8x128xf32>, vector<128x128xf32>, vector<8x128xf32> -> vector<8x128xf32>
    %389 = arith.addf %387, %388 : vector<8x128xf32>
    %390 = math.tanh %389 : vector<8x128xf32>
    %391 = arith.index_cast %c38_i32 : i32 to index
    %c0_197 = arith.constant 0 : index
    %c0_198 = arith.constant 0 : index
    %392 = vector.load %arg3[%391, %c0_197, %c0_198] : memref<64x8x128xf32, #tpu.memory_space<vmem>>, vector<1x8x128xf32>
    %393 = vector.shape_cast %392 : vector<1x8x128xf32> to vector<8x128xf32>
    %394 = vector.shape_cast %390 : vector<8x128xf32> to vector<1x8x128xf32>
    tpu.vector_store %arg3[%391, %c0_197, %c0_198], %394 {strides = array<i32>} : memref<64x8x128xf32, #tpu.memory_space<vmem>>, vector<1x8x128xf32>,
    %c39_i32 = arith.constant 39 : i32
    %395 = arith.index_cast %c39_i32 : i32 to index
    %c0_199 = arith.constant 0 : index
    %c0_200 = arith.constant 0 : index
    %396 = vector.load %arg1[%395, %c0_199, %c0_200] : memref<64x8x128xf32, #tpu.memory_space<vmem>>, vector<1x8x128xf32>
    %397 = vector.shape_cast %396 : vector<1x8x128xf32> to vector<8x128xf32>
    %cst_201 = arith.constant dense<0.000000e+00> : vector<8x128xf32>
    %398 = tpu.matmul %390, %4, %cst_201 {dimension_numbers = #tpu.dot_dimension_numbers<[1], [0], [0], [1], [0, 0, 1, 1], [], []>} : vector<8x128xf32>, vector<128x128xf32>, vector<8x128xf32> -> vector<8x128xf32>
    %399 = arith.addf %397, %398 : vector<8x128xf32>
    %400 = math.tanh %399 : vector<8x128xf32>
    %401 = arith.index_cast %c39_i32 : i32 to index
    %c0_202 = arith.constant 0 : index
    %c0_203 = arith.constant 0 : index
    %402 = vector.load %arg3[%401, %c0_202, %c0_203] : memref<64x8x128xf32, #tpu.memory_space<vmem>>, vector<1x8x128xf32>
    %403 = vector.shape_cast %402 : vector<1x8x128xf32> to vector<8x128xf32>
    %404 = vector.shape_cast %400 : vector<8x128xf32> to vector<1x8x128xf32>
    tpu.vector_store %arg3[%401, %c0_202, %c0_203], %404 {strides = array<i32>} : memref<64x8x128xf32, #tpu.memory_space<vmem>>, vector<1x8x128xf32>,
    %c40_i32 = arith.constant 40 : i32
    %405 = arith.index_cast %c40_i32 : i32 to index
    %c0_204 = arith.constant 0 : index
    %c0_205 = arith.constant 0 : index
    %406 = vector.load %arg1[%405, %c0_204, %c0_205] : memref<64x8x128xf32, #tpu.memory_space<vmem>>, vector<1x8x128xf32>
    %407 = vector.shape_cast %406 : vector<1x8x128xf32> to vector<8x128xf32>
    %cst_206 = arith.constant dense<0.000000e+00> : vector<8x128xf32>
    %408 = tpu.matmul %400, %4, %cst_206 {dimension_numbers = #tpu.dot_dimension_numbers<[1], [0], [0], [1], [0, 0, 1, 1], [], []>} : vector<8x128xf32>, vector<128x128xf32>, vector<8x128xf32> -> vector<8x128xf32>
    %409 = arith.addf %407, %408 : vector<8x128xf32>
    %410 = math.tanh %409 : vector<8x128xf32>
    %411 = arith.index_cast %c40_i32 : i32 to index
    %c0_207 = arith.constant 0 : index
    %c0_208 = arith.constant 0 : index
    %412 = vector.load %arg3[%411, %c0_207, %c0_208] : memref<64x8x128xf32, #tpu.memory_space<vmem>>, vector<1x8x128xf32>
    %413 = vector.shape_cast %412 : vector<1x8x128xf32> to vector<8x128xf32>
    %414 = vector.shape_cast %410 : vector<8x128xf32> to vector<1x8x128xf32>
    tpu.vector_store %arg3[%411, %c0_207, %c0_208], %414 {strides = array<i32>} : memref<64x8x128xf32, #tpu.memory_space<vmem>>, vector<1x8x128xf32>,
    %c41_i32 = arith.constant 41 : i32
    %415 = arith.index_cast %c41_i32 : i32 to index
    %c0_209 = arith.constant 0 : index
    %c0_210 = arith.constant 0 : index
    %416 = vector.load %arg1[%415, %c0_209, %c0_210] : memref<64x8x128xf32, #tpu.memory_space<vmem>>, vector<1x8x128xf32>
    %417 = vector.shape_cast %416 : vector<1x8x128xf32> to vector<8x128xf32>
    %cst_211 = arith.constant dense<0.000000e+00> : vector<8x128xf32>
    %418 = tpu.matmul %410, %4, %cst_211 {dimension_numbers = #tpu.dot_dimension_numbers<[1], [0], [0], [1], [0, 0, 1, 1], [], []>} : vector<8x128xf32>, vector<128x128xf32>, vector<8x128xf32> -> vector<8x128xf32>
    %419 = arith.addf %417, %418 : vector<8x128xf32>
    %420 = math.tanh %419 : vector<8x128xf32>
    %421 = arith.index_cast %c41_i32 : i32 to index
    %c0_212 = arith.constant 0 : index
    %c0_213 = arith.constant 0 : index
    %422 = vector.load %arg3[%421, %c0_212, %c0_213] : memref<64x8x128xf32, #tpu.memory_space<vmem>>, vector<1x8x128xf32>
    %423 = vector.shape_cast %422 : vector<1x8x128xf32> to vector<8x128xf32>
    %424 = vector.shape_cast %420 : vector<8x128xf32> to vector<1x8x128xf32>
    tpu.vector_store %arg3[%421, %c0_212, %c0_213], %424 {strides = array<i32>} : memref<64x8x128xf32, #tpu.memory_space<vmem>>, vector<1x8x128xf32>,
    %c42_i32 = arith.constant 42 : i32
    %425 = arith.index_cast %c42_i32 : i32 to index
    %c0_214 = arith.constant 0 : index
    %c0_215 = arith.constant 0 : index
    %426 = vector.load %arg1[%425, %c0_214, %c0_215] : memref<64x8x128xf32, #tpu.memory_space<vmem>>, vector<1x8x128xf32>
    %427 = vector.shape_cast %426 : vector<1x8x128xf32> to vector<8x128xf32>
    %cst_216 = arith.constant dense<0.000000e+00> : vector<8x128xf32>
    %428 = tpu.matmul %420, %4, %cst_216 {dimension_numbers = #tpu.dot_dimension_numbers<[1], [0], [0], [1], [0, 0, 1, 1], [], []>} : vector<8x128xf32>, vector<128x128xf32>, vector<8x128xf32> -> vector<8x128xf32>
    %429 = arith.addf %427, %428 : vector<8x128xf32>
    %430 = math.tanh %429 : vector<8x128xf32>
    %431 = arith.index_cast %c42_i32 : i32 to index
    %c0_217 = arith.constant 0 : index
    %c0_218 = arith.constant 0 : index
    %432 = vector.load %arg3[%431, %c0_217, %c0_218] : memref<64x8x128xf32, #tpu.memory_space<vmem>>, vector<1x8x128xf32>
    %433 = vector.shape_cast %432 : vector<1x8x128xf32> to vector<8x128xf32>
    %434 = vector.shape_cast %430 : vector<8x128xf32> to vector<1x8x128xf32>
    tpu.vector_store %arg3[%431, %c0_217, %c0_218], %434 {strides = array<i32>} : memref<64x8x128xf32, #tpu.memory_space<vmem>>, vector<1x8x128xf32>,
    %c43_i32 = arith.constant 43 : i32
    %435 = arith.index_cast %c43_i32 : i32 to index
    %c0_219 = arith.constant 0 : index
    %c0_220 = arith.constant 0 : index
    %436 = vector.load %arg1[%435, %c0_219, %c0_220] : memref<64x8x128xf32, #tpu.memory_space<vmem>>, vector<1x8x128xf32>
    %437 = vector.shape_cast %436 : vector<1x8x128xf32> to vector<8x128xf32>
    %cst_221 = arith.constant dense<0.000000e+00> : vector<8x128xf32>
    %438 = tpu.matmul %430, %4, %cst_221 {dimension_numbers = #tpu.dot_dimension_numbers<[1], [0], [0], [1], [0, 0, 1, 1], [], []>} : vector<8x128xf32>, vector<128x128xf32>, vector<8x128xf32> -> vector<8x128xf32>
    %439 = arith.addf %437, %438 : vector<8x128xf32>
    %440 = math.tanh %439 : vector<8x128xf32>
    %441 = arith.index_cast %c43_i32 : i32 to index
    %c0_222 = arith.constant 0 : index
    %c0_223 = arith.constant 0 : index
    %442 = vector.load %arg3[%441, %c0_222, %c0_223] : memref<64x8x128xf32, #tpu.memory_space<vmem>>, vector<1x8x128xf32>
    %443 = vector.shape_cast %442 : vector<1x8x128xf32> to vector<8x128xf32>
    %444 = vector.shape_cast %440 : vector<8x128xf32> to vector<1x8x128xf32>
    tpu.vector_store %arg3[%441, %c0_222, %c0_223], %444 {strides = array<i32>} : memref<64x8x128xf32, #tpu.memory_space<vmem>>, vector<1x8x128xf32>,
    %c44_i32 = arith.constant 44 : i32
    %445 = arith.index_cast %c44_i32 : i32 to index
    %c0_224 = arith.constant 0 : index
    %c0_225 = arith.constant 0 : index
    %446 = vector.load %arg1[%445, %c0_224, %c0_225] : memref<64x8x128xf32, #tpu.memory_space<vmem>>, vector<1x8x128xf32>
    %447 = vector.shape_cast %446 : vector<1x8x128xf32> to vector<8x128xf32>
    %cst_226 = arith.constant dense<0.000000e+00> : vector<8x128xf32>
    %448 = tpu.matmul %440, %4, %cst_226 {dimension_numbers = #tpu.dot_dimension_numbers<[1], [0], [0], [1], [0, 0, 1, 1], [], []>} : vector<8x128xf32>, vector<128x128xf32>, vector<8x128xf32> -> vector<8x128xf32>
    %449 = arith.addf %447, %448 : vector<8x128xf32>
    %450 = math.tanh %449 : vector<8x128xf32>
    %451 = arith.index_cast %c44_i32 : i32 to index
    %c0_227 = arith.constant 0 : index
    %c0_228 = arith.constant 0 : index
    %452 = vector.load %arg3[%451, %c0_227, %c0_228] : memref<64x8x128xf32, #tpu.memory_space<vmem>>, vector<1x8x128xf32>
    %453 = vector.shape_cast %452 : vector<1x8x128xf32> to vector<8x128xf32>
    %454 = vector.shape_cast %450 : vector<8x128xf32> to vector<1x8x128xf32>
    tpu.vector_store %arg3[%451, %c0_227, %c0_228], %454 {strides = array<i32>} : memref<64x8x128xf32, #tpu.memory_space<vmem>>, vector<1x8x128xf32>,
    %c45_i32 = arith.constant 45 : i32
    %455 = arith.index_cast %c45_i32 : i32 to index
    %c0_229 = arith.constant 0 : index
    %c0_230 = arith.constant 0 : index
    %456 = vector.load %arg1[%455, %c0_229, %c0_230] : memref<64x8x128xf32, #tpu.memory_space<vmem>>, vector<1x8x128xf32>
    %457 = vector.shape_cast %456 : vector<1x8x128xf32> to vector<8x128xf32>
    %cst_231 = arith.constant dense<0.000000e+00> : vector<8x128xf32>
    %458 = tpu.matmul %450, %4, %cst_231 {dimension_numbers = #tpu.dot_dimension_numbers<[1], [0], [0], [1], [0, 0, 1, 1], [], []>} : vector<8x128xf32>, vector<128x128xf32>, vector<8x128xf32> -> vector<8x128xf32>
    %459 = arith.addf %457, %458 : vector<8x128xf32>
    %460 = math.tanh %459 : vector<8x128xf32>
    %461 = arith.index_cast %c45_i32 : i32 to index
    %c0_232 = arith.constant 0 : index
    %c0_233 = arith.constant 0 : index
    %462 = vector.load %arg3[%461, %c0_232, %c0_233] : memref<64x8x128xf32, #tpu.memory_space<vmem>>, vector<1x8x128xf32>
    %463 = vector.shape_cast %462 : vector<1x8x128xf32> to vector<8x128xf32>
    %464 = vector.shape_cast %460 : vector<8x128xf32> to vector<1x8x128xf32>
    tpu.vector_store %arg3[%461, %c0_232, %c0_233], %464 {strides = array<i32>} : memref<64x8x128xf32, #tpu.memory_space<vmem>>, vector<1x8x128xf32>,
    %c46_i32 = arith.constant 46 : i32
    %465 = arith.index_cast %c46_i32 : i32 to index
    %c0_234 = arith.constant 0 : index
    %c0_235 = arith.constant 0 : index
    %466 = vector.load %arg1[%465, %c0_234, %c0_235] : memref<64x8x128xf32, #tpu.memory_space<vmem>>, vector<1x8x128xf32>
    %467 = vector.shape_cast %466 : vector<1x8x128xf32> to vector<8x128xf32>
    %cst_236 = arith.constant dense<0.000000e+00> : vector<8x128xf32>
    %468 = tpu.matmul %460, %4, %cst_236 {dimension_numbers = #tpu.dot_dimension_numbers<[1], [0], [0], [1], [0, 0, 1, 1], [], []>} : vector<8x128xf32>, vector<128x128xf32>, vector<8x128xf32> -> vector<8x128xf32>
    %469 = arith.addf %467, %468 : vector<8x128xf32>
    %470 = math.tanh %469 : vector<8x128xf32>
    %471 = arith.index_cast %c46_i32 : i32 to index
    %c0_237 = arith.constant 0 : index
    %c0_238 = arith.constant 0 : index
    %472 = vector.load %arg3[%471, %c0_237, %c0_238] : memref<64x8x128xf32, #tpu.memory_space<vmem>>, vector<1x8x128xf32>
    %473 = vector.shape_cast %472 : vector<1x8x128xf32> to vector<8x128xf32>
    %474 = vector.shape_cast %470 : vector<8x128xf32> to vector<1x8x128xf32>
    tpu.vector_store %arg3[%471, %c0_237, %c0_238], %474 {strides = array<i32>} : memref<64x8x128xf32, #tpu.memory_space<vmem>>, vector<1x8x128xf32>,
    %c47_i32 = arith.constant 47 : i32
    %475 = arith.index_cast %c47_i32 : i32 to index
    %c0_239 = arith.constant 0 : index
    %c0_240 = arith.constant 0 : index
    %476 = vector.load %arg1[%475, %c0_239, %c0_240] : memref<64x8x128xf32, #tpu.memory_space<vmem>>, vector<1x8x128xf32>
    %477 = vector.shape_cast %476 : vector<1x8x128xf32> to vector<8x128xf32>
    %cst_241 = arith.constant dense<0.000000e+00> : vector<8x128xf32>
    %478 = tpu.matmul %470, %4, %cst_241 {dimension_numbers = #tpu.dot_dimension_numbers<[1], [0], [0], [1], [0, 0, 1, 1], [], []>} : vector<8x128xf32>, vector<128x128xf32>, vector<8x128xf32> -> vector<8x128xf32>
    %479 = arith.addf %477, %478 : vector<8x128xf32>
    %480 = math.tanh %479 : vector<8x128xf32>
    %481 = arith.index_cast %c47_i32 : i32 to index
    %c0_242 = arith.constant 0 : index
    %c0_243 = arith.constant 0 : index
    %482 = vector.load %arg3[%481, %c0_242, %c0_243] : memref<64x8x128xf32, #tpu.memory_space<vmem>>, vector<1x8x128xf32>
    %483 = vector.shape_cast %482 : vector<1x8x128xf32> to vector<8x128xf32>
    %484 = vector.shape_cast %480 : vector<8x128xf32> to vector<1x8x128xf32>
    tpu.vector_store %arg3[%481, %c0_242, %c0_243], %484 {strides = array<i32>} : memref<64x8x128xf32, #tpu.memory_space<vmem>>, vector<1x8x128xf32>,
    %c48_i32 = arith.constant 48 : i32
    %485 = arith.index_cast %c48_i32 : i32 to index
    %c0_244 = arith.constant 0 : index
    %c0_245 = arith.constant 0 : index
    %486 = vector.load %arg1[%485, %c0_244, %c0_245] : memref<64x8x128xf32, #tpu.memory_space<vmem>>, vector<1x8x128xf32>
    %487 = vector.shape_cast %486 : vector<1x8x128xf32> to vector<8x128xf32>
    %cst_246 = arith.constant dense<0.000000e+00> : vector<8x128xf32>
    %488 = tpu.matmul %480, %4, %cst_246 {dimension_numbers = #tpu.dot_dimension_numbers<[1], [0], [0], [1], [0, 0, 1, 1], [], []>} : vector<8x128xf32>, vector<128x128xf32>, vector<8x128xf32> -> vector<8x128xf32>
    %489 = arith.addf %487, %488 : vector<8x128xf32>
    %490 = math.tanh %489 : vector<8x128xf32>
    %491 = arith.index_cast %c48_i32 : i32 to index
    %c0_247 = arith.constant 0 : index
    %c0_248 = arith.constant 0 : index
    %492 = vector.load %arg3[%491, %c0_247, %c0_248] : memref<64x8x128xf32, #tpu.memory_space<vmem>>, vector<1x8x128xf32>
    %493 = vector.shape_cast %492 : vector<1x8x128xf32> to vector<8x128xf32>
    %494 = vector.shape_cast %490 : vector<8x128xf32> to vector<1x8x128xf32>
    tpu.vector_store %arg3[%491, %c0_247, %c0_248], %494 {strides = array<i32>} : memref<64x8x128xf32, #tpu.memory_space<vmem>>, vector<1x8x128xf32>,
    %c49_i32 = arith.constant 49 : i32
    %495 = arith.index_cast %c49_i32 : i32 to index
    %c0_249 = arith.constant 0 : index
    %c0_250 = arith.constant 0 : index
    %496 = vector.load %arg1[%495, %c0_249, %c0_250] : memref<64x8x128xf32, #tpu.memory_space<vmem>>, vector<1x8x128xf32>
    %497 = vector.shape_cast %496 : vector<1x8x128xf32> to vector<8x128xf32>
    %cst_251 = arith.constant dense<0.000000e+00> : vector<8x128xf32>
    %498 = tpu.matmul %490, %4, %cst_251 {dimension_numbers = #tpu.dot_dimension_numbers<[1], [0], [0], [1], [0, 0, 1, 1], [], []>} : vector<8x128xf32>, vector<128x128xf32>, vector<8x128xf32> -> vector<8x128xf32>
    %499 = arith.addf %497, %498 : vector<8x128xf32>
    %500 = math.tanh %499 : vector<8x128xf32>
    %501 = arith.index_cast %c49_i32 : i32 to index
    %c0_252 = arith.constant 0 : index
    %c0_253 = arith.constant 0 : index
    %502 = vector.load %arg3[%501, %c0_252, %c0_253] : memref<64x8x128xf32, #tpu.memory_space<vmem>>, vector<1x8x128xf32>
    %503 = vector.shape_cast %502 : vector<1x8x128xf32> to vector<8x128xf32>
    %504 = vector.shape_cast %500 : vector<8x128xf32> to vector<1x8x128xf32>
    tpu.vector_store %arg3[%501, %c0_252, %c0_253], %504 {strides = array<i32>} : memref<64x8x128xf32, #tpu.memory_space<vmem>>, vector<1x8x128xf32>,
    %c50_i32 = arith.constant 50 : i32
    %505 = arith.index_cast %c50_i32 : i32 to index
    %c0_254 = arith.constant 0 : index
    %c0_255 = arith.constant 0 : index
    %506 = vector.load %arg1[%505, %c0_254, %c0_255] : memref<64x8x128xf32, #tpu.memory_space<vmem>>, vector<1x8x128xf32>
    %507 = vector.shape_cast %506 : vector<1x8x128xf32> to vector<8x128xf32>
    %cst_256 = arith.constant dense<0.000000e+00> : vector<8x128xf32>
    %508 = tpu.matmul %500, %4, %cst_256 {dimension_numbers = #tpu.dot_dimension_numbers<[1], [0], [0], [1], [0, 0, 1, 1], [], []>} : vector<8x128xf32>, vector<128x128xf32>, vector<8x128xf32> -> vector<8x128xf32>
    %509 = arith.addf %507, %508 : vector<8x128xf32>
    %510 = math.tanh %509 : vector<8x128xf32>
    %511 = arith.index_cast %c50_i32 : i32 to index
    %c0_257 = arith.constant 0 : index
    %c0_258 = arith.constant 0 : index
    %512 = vector.load %arg3[%511, %c0_257, %c0_258] : memref<64x8x128xf32, #tpu.memory_space<vmem>>, vector<1x8x128xf32>
    %513 = vector.shape_cast %512 : vector<1x8x128xf32> to vector<8x128xf32>
    %514 = vector.shape_cast %510 : vector<8x128xf32> to vector<1x8x128xf32>
    tpu.vector_store %arg3[%511, %c0_257, %c0_258], %514 {strides = array<i32>} : memref<64x8x128xf32, #tpu.memory_space<vmem>>, vector<1x8x128xf32>,
    %c51_i32 = arith.constant 51 : i32
    %515 = arith.index_cast %c51_i32 : i32 to index
    %c0_259 = arith.constant 0 : index
    %c0_260 = arith.constant 0 : index
    %516 = vector.load %arg1[%515, %c0_259, %c0_260] : memref<64x8x128xf32, #tpu.memory_space<vmem>>, vector<1x8x128xf32>
    %517 = vector.shape_cast %516 : vector<1x8x128xf32> to vector<8x128xf32>
    %cst_261 = arith.constant dense<0.000000e+00> : vector<8x128xf32>
    %518 = tpu.matmul %510, %4, %cst_261 {dimension_numbers = #tpu.dot_dimension_numbers<[1], [0], [0], [1], [0, 0, 1, 1], [], []>} : vector<8x128xf32>, vector<128x128xf32>, vector<8x128xf32> -> vector<8x128xf32>
    %519 = arith.addf %517, %518 : vector<8x128xf32>
    %520 = math.tanh %519 : vector<8x128xf32>
    %521 = arith.index_cast %c51_i32 : i32 to index
    %c0_262 = arith.constant 0 : index
    %c0_263 = arith.constant 0 : index
    %522 = vector.load %arg3[%521, %c0_262, %c0_263] : memref<64x8x128xf32, #tpu.memory_space<vmem>>, vector<1x8x128xf32>
    %523 = vector.shape_cast %522 : vector<1x8x128xf32> to vector<8x128xf32>
    %524 = vector.shape_cast %520 : vector<8x128xf32> to vector<1x8x128xf32>
    tpu.vector_store %arg3[%521, %c0_262, %c0_263], %524 {strides = array<i32>} : memref<64x8x128xf32, #tpu.memory_space<vmem>>, vector<1x8x128xf32>,
    %c52_i32 = arith.constant 52 : i32
    %525 = arith.index_cast %c52_i32 : i32 to index
    %c0_264 = arith.constant 0 : index
    %c0_265 = arith.constant 0 : index
    %526 = vector.load %arg1[%525, %c0_264, %c0_265] : memref<64x8x128xf32, #tpu.memory_space<vmem>>, vector<1x8x128xf32>
    %527 = vector.shape_cast %526 : vector<1x8x128xf32> to vector<8x128xf32>
    %cst_266 = arith.constant dense<0.000000e+00> : vector<8x128xf32>
    %528 = tpu.matmul %520, %4, %cst_266 {dimension_numbers = #tpu.dot_dimension_numbers<[1], [0], [0], [1], [0, 0, 1, 1], [], []>} : vector<8x128xf32>, vector<128x128xf32>, vector<8x128xf32> -> vector<8x128xf32>
    %529 = arith.addf %527, %528 : vector<8x128xf32>
    %530 = math.tanh %529 : vector<8x128xf32>
    %531 = arith.index_cast %c52_i32 : i32 to index
    %c0_267 = arith.constant 0 : index
    %c0_268 = arith.constant 0 : index
    %532 = vector.load %arg3[%531, %c0_267, %c0_268] : memref<64x8x128xf32, #tpu.memory_space<vmem>>, vector<1x8x128xf32>
    %533 = vector.shape_cast %532 : vector<1x8x128xf32> to vector<8x128xf32>
    %534 = vector.shape_cast %530 : vector<8x128xf32> to vector<1x8x128xf32>
    tpu.vector_store %arg3[%531, %c0_267, %c0_268], %534 {strides = array<i32>} : memref<64x8x128xf32, #tpu.memory_space<vmem>>, vector<1x8x128xf32>,
    %c53_i32 = arith.constant 53 : i32
    %535 = arith.index_cast %c53_i32 : i32 to index
    %c0_269 = arith.constant 0 : index
    %c0_270 = arith.constant 0 : index
    %536 = vector.load %arg1[%535, %c0_269, %c0_270] : memref<64x8x128xf32, #tpu.memory_space<vmem>>, vector<1x8x128xf32>
    %537 = vector.shape_cast %536 : vector<1x8x128xf32> to vector<8x128xf32>
    %cst_271 = arith.constant dense<0.000000e+00> : vector<8x128xf32>
    %538 = tpu.matmul %530, %4, %cst_271 {dimension_numbers = #tpu.dot_dimension_numbers<[1], [0], [0], [1], [0, 0, 1, 1], [], []>} : vector<8x128xf32>, vector<128x128xf32>, vector<8x128xf32> -> vector<8x128xf32>
    %539 = arith.addf %537, %538 : vector<8x128xf32>
    %540 = math.tanh %539 : vector<8x128xf32>
    %541 = arith.index_cast %c53_i32 : i32 to index
    %c0_272 = arith.constant 0 : index
    %c0_273 = arith.constant 0 : index
    %542 = vector.load %arg3[%541, %c0_272, %c0_273] : memref<64x8x128xf32, #tpu.memory_space<vmem>>, vector<1x8x128xf32>
    %543 = vector.shape_cast %542 : vector<1x8x128xf32> to vector<8x128xf32>
    %544 = vector.shape_cast %540 : vector<8x128xf32> to vector<1x8x128xf32>
    tpu.vector_store %arg3[%541, %c0_272, %c0_273], %544 {strides = array<i32>} : memref<64x8x128xf32, #tpu.memory_space<vmem>>, vector<1x8x128xf32>,
    %c54_i32 = arith.constant 54 : i32
    %545 = arith.index_cast %c54_i32 : i32 to index
    %c0_274 = arith.constant 0 : index
    %c0_275 = arith.constant 0 : index
    %546 = vector.load %arg1[%545, %c0_274, %c0_275] : memref<64x8x128xf32, #tpu.memory_space<vmem>>, vector<1x8x128xf32>
    %547 = vector.shape_cast %546 : vector<1x8x128xf32> to vector<8x128xf32>
    %cst_276 = arith.constant dense<0.000000e+00> : vector<8x128xf32>
    %548 = tpu.matmul %540, %4, %cst_276 {dimension_numbers = #tpu.dot_dimension_numbers<[1], [0], [0], [1], [0, 0, 1, 1], [], []>} : vector<8x128xf32>, vector<128x128xf32>, vector<8x128xf32> -> vector<8x128xf32>
    %549 = arith.addf %547, %548 : vector<8x128xf32>
    %550 = math.tanh %549 : vector<8x128xf32>
    %551 = arith.index_cast %c54_i32 : i32 to index
    %c0_277 = arith.constant 0 : index
    %c0_278 = arith.constant 0 : index
    %552 = vector.load %arg3[%551, %c0_277, %c0_278] : memref<64x8x128xf32, #tpu.memory_space<vmem>>, vector<1x8x128xf32>
    %553 = vector.shape_cast %552 : vector<1x8x128xf32> to vector<8x128xf32>
    %554 = vector.shape_cast %550 : vector<8x128xf32> to vector<1x8x128xf32>
    tpu.vector_store %arg3[%551, %c0_277, %c0_278], %554 {strides = array<i32>} : memref<64x8x128xf32, #tpu.memory_space<vmem>>, vector<1x8x128xf32>,
    %c55_i32 = arith.constant 55 : i32
    %555 = arith.index_cast %c55_i32 : i32 to index
    %c0_279 = arith.constant 0 : index
    %c0_280 = arith.constant 0 : index
    %556 = vector.load %arg1[%555, %c0_279, %c0_280] : memref<64x8x128xf32, #tpu.memory_space<vmem>>, vector<1x8x128xf32>
    %557 = vector.shape_cast %556 : vector<1x8x128xf32> to vector<8x128xf32>
    %cst_281 = arith.constant dense<0.000000e+00> : vector<8x128xf32>
    %558 = tpu.matmul %550, %4, %cst_281 {dimension_numbers = #tpu.dot_dimension_numbers<[1], [0], [0], [1], [0, 0, 1, 1], [], []>} : vector<8x128xf32>, vector<128x128xf32>, vector<8x128xf32> -> vector<8x128xf32>
    %559 = arith.addf %557, %558 : vector<8x128xf32>
    %560 = math.tanh %559 : vector<8x128xf32>
    %561 = arith.index_cast %c55_i32 : i32 to index
    %c0_282 = arith.constant 0 : index
    %c0_283 = arith.constant 0 : index
    %562 = vector.load %arg3[%561, %c0_282, %c0_283] : memref<64x8x128xf32, #tpu.memory_space<vmem>>, vector<1x8x128xf32>
    %563 = vector.shape_cast %562 : vector<1x8x128xf32> to vector<8x128xf32>
    %564 = vector.shape_cast %560 : vector<8x128xf32> to vector<1x8x128xf32>
    tpu.vector_store %arg3[%561, %c0_282, %c0_283], %564 {strides = array<i32>} : memref<64x8x128xf32, #tpu.memory_space<vmem>>, vector<1x8x128xf32>,
    %c56_i32 = arith.constant 56 : i32
    %565 = arith.index_cast %c56_i32 : i32 to index
    %c0_284 = arith.constant 0 : index
    %c0_285 = arith.constant 0 : index
    %566 = vector.load %arg1[%565, %c0_284, %c0_285] : memref<64x8x128xf32, #tpu.memory_space<vmem>>, vector<1x8x128xf32>
    %567 = vector.shape_cast %566 : vector<1x8x128xf32> to vector<8x128xf32>
    %cst_286 = arith.constant dense<0.000000e+00> : vector<8x128xf32>
    %568 = tpu.matmul %560, %4, %cst_286 {dimension_numbers = #tpu.dot_dimension_numbers<[1], [0], [0], [1], [0, 0, 1, 1], [], []>} : vector<8x128xf32>, vector<128x128xf32>, vector<8x128xf32> -> vector<8x128xf32>
    %569 = arith.addf %567, %568 : vector<8x128xf32>
    %570 = math.tanh %569 : vector<8x128xf32>
    %571 = arith.index_cast %c56_i32 : i32 to index
    %c0_287 = arith.constant 0 : index
    %c0_288 = arith.constant 0 : index
    %572 = vector.load %arg3[%571, %c0_287, %c0_288] : memref<64x8x128xf32, #tpu.memory_space<vmem>>, vector<1x8x128xf32>
    %573 = vector.shape_cast %572 : vector<1x8x128xf32> to vector<8x128xf32>
    %574 = vector.shape_cast %570 : vector<8x128xf32> to vector<1x8x128xf32>
    tpu.vector_store %arg3[%571, %c0_287, %c0_288], %574 {strides = array<i32>} : memref<64x8x128xf32, #tpu.memory_space<vmem>>, vector<1x8x128xf32>,
    %c57_i32 = arith.constant 57 : i32
    %575 = arith.index_cast %c57_i32 : i32 to index
    %c0_289 = arith.constant 0 : index
    %c0_290 = arith.constant 0 : index
    %576 = vector.load %arg1[%575, %c0_289, %c0_290] : memref<64x8x128xf32, #tpu.memory_space<vmem>>, vector<1x8x128xf32>
    %577 = vector.shape_cast %576 : vector<1x8x128xf32> to vector<8x128xf32>
    %cst_291 = arith.constant dense<0.000000e+00> : vector<8x128xf32>
    %578 = tpu.matmul %570, %4, %cst_291 {dimension_numbers = #tpu.dot_dimension_numbers<[1], [0], [0], [1], [0, 0, 1, 1], [], []>} : vector<8x128xf32>, vector<128x128xf32>, vector<8x128xf32> -> vector<8x128xf32>
    %579 = arith.addf %577, %578 : vector<8x128xf32>
    %580 = math.tanh %579 : vector<8x128xf32>
    %581 = arith.index_cast %c57_i32 : i32 to index
    %c0_292 = arith.constant 0 : index
    %c0_293 = arith.constant 0 : index
    %582 = vector.load %arg3[%581, %c0_292, %c0_293] : memref<64x8x128xf32, #tpu.memory_space<vmem>>, vector<1x8x128xf32>
    %583 = vector.shape_cast %582 : vector<1x8x128xf32> to vector<8x128xf32>
    %584 = vector.shape_cast %580 : vector<8x128xf32> to vector<1x8x128xf32>
    tpu.vector_store %arg3[%581, %c0_292, %c0_293], %584 {strides = array<i32>} : memref<64x8x128xf32, #tpu.memory_space<vmem>>, vector<1x8x128xf32>,
    %c58_i32 = arith.constant 58 : i32
    %585 = arith.index_cast %c58_i32 : i32 to index
    %c0_294 = arith.constant 0 : index
    %c0_295 = arith.constant 0 : index
    %586 = vector.load %arg1[%585, %c0_294, %c0_295] : memref<64x8x128xf32, #tpu.memory_space<vmem>>, vector<1x8x128xf32>
    %587 = vector.shape_cast %586 : vector<1x8x128xf32> to vector<8x128xf32>
    %cst_296 = arith.constant dense<0.000000e+00> : vector<8x128xf32>
    %588 = tpu.matmul %580, %4, %cst_296 {dimension_numbers = #tpu.dot_dimension_numbers<[1], [0], [0], [1], [0, 0, 1, 1], [], []>} : vector<8x128xf32>, vector<128x128xf32>, vector<8x128xf32> -> vector<8x128xf32>
    %589 = arith.addf %587, %588 : vector<8x128xf32>
    %590 = math.tanh %589 : vector<8x128xf32>
    %591 = arith.index_cast %c58_i32 : i32 to index
    %c0_297 = arith.constant 0 : index
    %c0_298 = arith.constant 0 : index
    %592 = vector.load %arg3[%591, %c0_297, %c0_298] : memref<64x8x128xf32, #tpu.memory_space<vmem>>, vector<1x8x128xf32>
    %593 = vector.shape_cast %592 : vector<1x8x128xf32> to vector<8x128xf32>
    %594 = vector.shape_cast %590 : vector<8x128xf32> to vector<1x8x128xf32>
    tpu.vector_store %arg3[%591, %c0_297, %c0_298], %594 {strides = array<i32>} : memref<64x8x128xf32, #tpu.memory_space<vmem>>, vector<1x8x128xf32>,
    %c59_i32 = arith.constant 59 : i32
    %595 = arith.index_cast %c59_i32 : i32 to index
    %c0_299 = arith.constant 0 : index
    %c0_300 = arith.constant 0 : index
    %596 = vector.load %arg1[%595, %c0_299, %c0_300] : memref<64x8x128xf32, #tpu.memory_space<vmem>>, vector<1x8x128xf32>
    %597 = vector.shape_cast %596 : vector<1x8x128xf32> to vector<8x128xf32>
    %cst_301 = arith.constant dense<0.000000e+00> : vector<8x128xf32>
    %598 = tpu.matmul %590, %4, %cst_301 {dimension_numbers = #tpu.dot_dimension_numbers<[1], [0], [0], [1], [0, 0, 1, 1], [], []>} : vector<8x128xf32>, vector<128x128xf32>, vector<8x128xf32> -> vector<8x128xf32>
    %599 = arith.addf %597, %598 : vector<8x128xf32>
    %600 = math.tanh %599 : vector<8x128xf32>
    %601 = arith.index_cast %c59_i32 : i32 to index
    %c0_302 = arith.constant 0 : index
    %c0_303 = arith.constant 0 : index
    %602 = vector.load %arg3[%601, %c0_302, %c0_303] : memref<64x8x128xf32, #tpu.memory_space<vmem>>, vector<1x8x128xf32>
    %603 = vector.shape_cast %602 : vector<1x8x128xf32> to vector<8x128xf32>
    %604 = vector.shape_cast %600 : vector<8x128xf32> to vector<1x8x128xf32>
    tpu.vector_store %arg3[%601, %c0_302, %c0_303], %604 {strides = array<i32>} : memref<64x8x128xf32, #tpu.memory_space<vmem>>, vector<1x8x128xf32>,
    %c60_i32 = arith.constant 60 : i32
    %605 = arith.index_cast %c60_i32 : i32 to index
    %c0_304 = arith.constant 0 : index
    %c0_305 = arith.constant 0 : index
    %606 = vector.load %arg1[%605, %c0_304, %c0_305] : memref<64x8x128xf32, #tpu.memory_space<vmem>>, vector<1x8x128xf32>
    %607 = vector.shape_cast %606 : vector<1x8x128xf32> to vector<8x128xf32>
    %cst_306 = arith.constant dense<0.000000e+00> : vector<8x128xf32>
    %608 = tpu.matmul %600, %4, %cst_306 {dimension_numbers = #tpu.dot_dimension_numbers<[1], [0], [0], [1], [0, 0, 1, 1], [], []>} : vector<8x128xf32>, vector<128x128xf32>, vector<8x128xf32> -> vector<8x128xf32>
    %609 = arith.addf %607, %608 : vector<8x128xf32>
    %610 = math.tanh %609 : vector<8x128xf32>
    %611 = arith.index_cast %c60_i32 : i32 to index
    %c0_307 = arith.constant 0 : index
    %c0_308 = arith.constant 0 : index
    %612 = vector.load %arg3[%611, %c0_307, %c0_308] : memref<64x8x128xf32, #tpu.memory_space<vmem>>, vector<1x8x128xf32>
    %613 = vector.shape_cast %612 : vector<1x8x128xf32> to vector<8x128xf32>
    %614 = vector.shape_cast %610 : vector<8x128xf32> to vector<1x8x128xf32>
    tpu.vector_store %arg3[%611, %c0_307, %c0_308], %614 {strides = array<i32>} : memref<64x8x128xf32, #tpu.memory_space<vmem>>, vector<1x8x128xf32>,
    %c61_i32 = arith.constant 61 : i32
    %615 = arith.index_cast %c61_i32 : i32 to index
    %c0_309 = arith.constant 0 : index
    %c0_310 = arith.constant 0 : index
    %616 = vector.load %arg1[%615, %c0_309, %c0_310] : memref<64x8x128xf32, #tpu.memory_space<vmem>>, vector<1x8x128xf32>
    %617 = vector.shape_cast %616 : vector<1x8x128xf32> to vector<8x128xf32>
    %cst_311 = arith.constant dense<0.000000e+00> : vector<8x128xf32>
    %618 = tpu.matmul %610, %4, %cst_311 {dimension_numbers = #tpu.dot_dimension_numbers<[1], [0], [0], [1], [0, 0, 1, 1], [], []>} : vector<8x128xf32>, vector<128x128xf32>, vector<8x128xf32> -> vector<8x128xf32>
    %619 = arith.addf %617, %618 : vector<8x128xf32>
    %620 = math.tanh %619 : vector<8x128xf32>
    %621 = arith.index_cast %c61_i32 : i32 to index
    %c0_312 = arith.constant 0 : index
    %c0_313 = arith.constant 0 : index
    %622 = vector.load %arg3[%621, %c0_312, %c0_313] : memref<64x8x128xf32, #tpu.memory_space<vmem>>, vector<1x8x128xf32>
    %623 = vector.shape_cast %622 : vector<1x8x128xf32> to vector<8x128xf32>
    %624 = vector.shape_cast %620 : vector<8x128xf32> to vector<1x8x128xf32>
    tpu.vector_store %arg3[%621, %c0_312, %c0_313], %624 {strides = array<i32>} : memref<64x8x128xf32, #tpu.memory_space<vmem>>, vector<1x8x128xf32>,
    %c62_i32 = arith.constant 62 : i32
    %625 = arith.index_cast %c62_i32 : i32 to index
    %c0_314 = arith.constant 0 : index
    %c0_315 = arith.constant 0 : index
    %626 = vector.load %arg1[%625, %c0_314, %c0_315] : memref<64x8x128xf32, #tpu.memory_space<vmem>>, vector<1x8x128xf32>
    %627 = vector.shape_cast %626 : vector<1x8x128xf32> to vector<8x128xf32>
    %cst_316 = arith.constant dense<0.000000e+00> : vector<8x128xf32>
    %628 = tpu.matmul %620, %4, %cst_316 {dimension_numbers = #tpu.dot_dimension_numbers<[1], [0], [0], [1], [0, 0, 1, 1], [], []>} : vector<8x128xf32>, vector<128x128xf32>, vector<8x128xf32> -> vector<8x128xf32>
    %629 = arith.addf %627, %628 : vector<8x128xf32>
    %630 = math.tanh %629 : vector<8x128xf32>
    %631 = arith.index_cast %c62_i32 : i32 to index
    %c0_317 = arith.constant 0 : index
    %c0_318 = arith.constant 0 : index
    %632 = vector.load %arg3[%631, %c0_317, %c0_318] : memref<64x8x128xf32, #tpu.memory_space<vmem>>, vector<1x8x128xf32>
    %633 = vector.shape_cast %632 : vector<1x8x128xf32> to vector<8x128xf32>
    %634 = vector.shape_cast %630 : vector<8x128xf32> to vector<1x8x128xf32>
    tpu.vector_store %arg3[%631, %c0_317, %c0_318], %634 {strides = array<i32>} : memref<64x8x128xf32, #tpu.memory_space<vmem>>, vector<1x8x128xf32>,
    %c63_i32 = arith.constant 63 : i32
    %635 = arith.index_cast %c63_i32 : i32 to index
    %c0_319 = arith.constant 0 : index
    %c0_320 = arith.constant 0 : index
    %636 = vector.load %arg1[%635, %c0_319, %c0_320] : memref<64x8x128xf32, #tpu.memory_space<vmem>>, vector<1x8x128xf32>
    %637 = vector.shape_cast %636 : vector<1x8x128xf32> to vector<8x128xf32>
    %cst_321 = arith.constant dense<0.000000e+00> : vector<8x128xf32>
    %638 = tpu.matmul %630, %4, %cst_321 {dimension_numbers = #tpu.dot_dimension_numbers<[1], [0], [0], [1], [0, 0, 1, 1], [], []>} : vector<8x128xf32>, vector<128x128xf32>, vector<8x128xf32> -> vector<8x128xf32>
    %639 = arith.addf %637, %638 : vector<8x128xf32>
    %640 = math.tanh %639 : vector<8x128xf32>
    %641 = arith.index_cast %c63_i32 : i32 to index
    %c0_322 = arith.constant 0 : index
    %c0_323 = arith.constant 0 : index
    %642 = vector.load %arg3[%641, %c0_322, %c0_323] : memref<64x8x128xf32, #tpu.memory_space<vmem>>, vector<1x8x128xf32>
    %643 = vector.shape_cast %642 : vector<1x8x128xf32> to vector<8x128xf32>
    %644 = vector.shape_cast %640 : vector<8x128xf32> to vector<1x8x128xf32>
    tpu.vector_store %arg3[%641, %c0_322, %c0_323], %644 {strides = array<i32>} : memref<64x8x128xf32, #tpu.memory_space<vmem>>, vector<1x8x128xf32>,
    %c64_i32 = arith.constant 64 : i32
    %c0_324 = arith.constant 0 : index
    %c0_325 = arith.constant 0 : index
    %645 = vector.load %arg4[%c0_324, %c0_325] : memref<8x128xf32, #tpu.memory_space<vmem>>, vector<8x128xf32>
    tpu.vector_store %arg4[%c0_324, %c0_325], %640 {strides = array<i32>} : memref<8x128xf32, #tpu.memory_space<vmem>>, vector<8x128xf32>,
    return
  }
  func.func @transform_0(%arg0: i32) -> (i32, i32, i32) {
    %c0_i32 = arith.constant 0 : i32
    %c0_i32_0 = arith.constant 0 : i32
    %c0_i32_1 = arith.constant 0 : i32
    return %arg0, %c0_i32, %c0_i32_0 : i32, i32, i32
  }
  func.func @transform_1(%arg0: i32) -> (i32, i32) {
    %c0_i32 = arith.constant 0 : i32
    %c0_i32_0 = arith.constant 0 : i32
    %c0_i32_1 = arith.constant 0 : i32
    return %c0_i32, %c0_i32_0 : i32, i32
  }
  func.func @transform_2(%arg0: i32) -> (i32, i32, i32) {
    %c0_i32 = arith.constant 0 : i32
    %c0_i32_0 = arith.constant 0 : i32
    %c0_i32_1 = arith.constant 0 : i32
    return %arg0, %c0_i32, %c0_i32_0 : i32, i32, i32
  }
}

</mosaic_0001>

<bundles_post_ra>
// kernel: recur_pallas.1
= control target key start
LH: loop header
LB: loop body
LE: loop exit
PB: predicated region body
PF: predicated region fallthrough
CT: control target
= control target key end

     0   :  { %v10021_v0 = vmov 0.0|0.0   ;;  %vm10022_vm0 = vmmov 0   ;;  %v10023_v4 = vmov 0.0   ;;  %s11640_s1 = inlined_call_operand.vmem [shape: f32[128,128], index: 1, kind: input, shape index: {}]   ;;  %s11641_s0 = inlined_call_operand.vmem [shape: f32[64,8,128], index: 0, kind: input, shape index: {}]   ;;  %s11642_s2 = inlined_call_operand.vmem [shape: f32[64,8,128], index: 2, kind: output, shape index: {}]  }
   0x1   :  { %8354 = vmatprep.subr.bf16.mxu0 %v10021_v0  ;;  %v17_v1 = vld [vmem:[%s11640_s1] sm:$0xff]  ;;  %v18_v2 = vld [vmem:[%s11640_s1 + $0x8] sm:$0xff]  ;;  %v19_v3 = vld [vmem:[%s11640_s1 + $0x10] sm:$0xff]  ;;  %6146 = vmatprep.mubr.msk.f32.mxu0 %vm10022_vm0, %v10023_v4 }
   0x2   :  { %v10051_v5 = vpack.c.bf16 %v18_v2, %v17_v1  ;;  %v20_v6 = vld [vmem:[%s11640_s1 + $0x18] sm:$0xff]  ;;  %8378 = vmatprep.subr.bf16.mxu1 %v10021_v0  ;;  %6181 = vmatprep.mubr.msk.f32.mxu1 %vm10022_vm0, %v10023_v4  ;;  %v21_v8 = vld [vmem:[%s11640_s1 + $0x20] sm:$0xff]  ;;  %v22_v9 = vld [vmem:[%s11640_s1 + $0x28] sm:$0xff] }
   0x3   :  { %v10060_v7 = vpack.c.bf16 %v20_v6, %v19_v3  ;;  %v10072_v10 = vpack.c.bf16 %v22_v9, %v21_v8  ;;  %v23_v11 = vld [vmem:[%s11640_s1 + $0x30] sm:$0xff]  ;;  %v24_v12 = vld [vmem:[%s11640_s1 + $0x38] sm:$0xff]  ;;  %v25_v14 = vld [vmem:[%s11640_s1 + $0x40] sm:$0xff] }
   0x4   :  { %8356 = vmatpush3.bf16.msra.mxu0 %v10051_v5  ;;  %8380 = vmatpush3.bf16.msra.mxu1 %v10051_v5  ;;  %v10084_v13 = vpack.c.bf16 %v24_v12, %v23_v11  ;;  %v26_v15 = vld [vmem:[%s11640_s1 + $0x48] sm:$0xff]  ;;  %v27_v17 = vld [vmem:[%s11640_s1 + $0x50] sm:$0xff]  ;;  %v28_v18 = vld [vmem:[%s11640_s1 + $0x58] sm:$0xff] }
   0x5   :  { %8357 = vmatprep.subr.bf16.mxu0 %v10021_v0  ;;  %8381 = vmatprep.subr.bf16.mxu1 %v10021_v0  ;;  %v10096_v16 = vpack.c.bf16 %v26_v15, %v25_v14  ;;  %v10108_v19 = vpack.c.bf16 %v28_v18, %v27_v17  ;;  %v29_v20 = vld [vmem:[%s11640_s1 + $0x60] sm:$0xff]  ;;  %v30_v21 = vld [vmem:[%s11640_s1 + $0x68] sm:$0xff]  ;;  %v31_v23 = vld [vmem:[%s11640_s1 + $0x70] sm:$0xff] }
   0x6   :  { %v10120_v22 = vpack.c.bf16 %v30_v21, %v29_v20  ;;  %v32_v24 = vld [vmem:[%s11640_s1 + $0x78] sm:$0xff]  ;;  %v33_v26 = vld [vmem:[%s11641_s0] sm:$0xff]  ;;  %v4900_v31 = vld [vmem:[%s11641_s0 + $0x8] sm:$0xff] }
   0x7   :  { %v10132_v25 = vpack.c.bf16 %v32_v24, %v31_v23  ;;  %v4902_v36 = vld [vmem:[%s11641_s0 + $0x10] sm:$0xff]  ;;  %v4904_v41 = vld [vmem:[%s11641_s0 + $0x18] sm:$0xff]  ;;  %v4906_v46 = vld [vmem:[%s11641_s0 + $0x20] sm:$0xff] }
   0x8   :  { %8359 = vmatpush3.bf16.msra.mxu0 %v10060_v7  ;;  %8383 = vmatpush3.bf16.msra.mxu1 %v10060_v7  ;;  %v4908_v51 = vld [vmem:[%s11641_s0 + $0x28] sm:$0xff]  ;;  %v4910_v56 = vld [vmem:[%s11641_s0 + $0x30] sm:$0xff]  ;;  %v4912_v61 = vld [vmem:[%s11641_s0 + $0x38] sm:$0xff] }
   0x9   :  { %8360 = vmatprep.subr.bf16.mxu0 %v10021_v0  ;;  %8384 = vmatprep.subr.bf16.mxu1 %v10021_v0  ;;  %v4914_v3 = vld [vmem:[%s11641_s0 + $0x40] sm:$0xff]  ;;  %v4916_v12 = vld [vmem:[%s11641_s0 + $0x48] sm:$0xff]  ;;  %v4918_v20 = vld [vmem:[%s11641_s0 + $0x50] sm:$0xff] }
   0xc   :  { %8362 = vmatpush3.bf16.msra.mxu0 %v10072_v10  ;;  %8386 = vmatpush3.bf16.msra.mxu1 %v10072_v10 }
   0xd   :  { %8363 = vmatprep.subr.bf16.mxu0 %v10021_v0  ;;  %8387 = vmatprep.subr.bf16.mxu1 %v10021_v0 }
  0x10   :  { %8365 = vmatpush3.bf16.msra.mxu0 %v10084_v13  ;;  %8389 = vmatpush3.bf16.msra.mxu1 %v10084_v13 }
  0x11   :  { %8366 = vmatprep.subr.bf16.mxu0 %v10021_v0  ;;  %8390 = vmatprep.subr.bf16.mxu1 %v10021_v0 }
  0x14   :  { %8368 = vmatpush3.bf16.msra.mxu0 %v10096_v16  ;;  %8392 = vmatpush3.bf16.msra.mxu1 %v10096_v16 }
  0x15   :  { %8369 = vmatprep.subr.bf16.mxu0 %v10021_v0  ;;  %8393 = vmatprep.subr.bf16.mxu1 %v10021_v0 }
  0x18   :  { %8371 = vmatpush3.bf16.msra.mxu0 %v10108_v19  ;;  %8395 = vmatpush3.bf16.msra.mxu1 %v10108_v19 }
  0x19   :  { %8372 = vmatprep.subr.bf16.mxu0 %v10021_v0  ;;  %8396 = vmatprep.subr.bf16.mxu1 %v10021_v0 }
  0x1c   :  { %8374 = vmatpush3.bf16.msra.mxu0 %v10120_v22  ;;  %8398 = vmatpush3.bf16.msra.mxu1 %v10120_v22 }
  0x1d   :  { %8375 = vmatprep.subr.bf16.mxu0 %v10021_v0  ;;  %8399 = vmatprep.subr.bf16.mxu1 %v10021_v0 }
  0x20   :  { %8377 = vmatpush3.bf16.msra.mxu0 %v10132_v25  ;;  %8401 = vmatpush3.bf16.msra.mxu1 %v10132_v25 }
  0x21   :  { %8402 = vmatprep.subr.bf16.mxu0 %v10021_v0  ;;  %8426 = vmatprep.subr.bf16.mxu1 %v10021_v0 }
  0x23   :  { %6147 = vmatmul.mubr.f32.vlgmr.msra.gmra.mrb[0].mxu0 %v10023_v4 }
  0x24   :  { %8404 = vmatpush3.bf16.msra.mxu0 %v10051_v5  ;;  %6216 = vmatprep.mubr.msk.f32.mxu0 %vm10022_vm0, %v10023_v4 }
  0x25   :  { %8405 = vmatprep.subr.bf16.mxu0 %v10021_v0 }
  0x28   :  { %8407 = vmatpush3.bf16.msra.mxu0 %v10060_v7 }
  0x29   :  { %8408 = vmatprep.subr.bf16.mxu0 %v10021_v0 }
  0x2c   :  { %8410 = vmatpush3.bf16.msra.mxu0 %v10072_v10 }
  0x2d   :  { %8411 = vmatprep.subr.bf16.mxu0 %v10021_v0 }
  0x30   :  { %8413 = vmatpush3.bf16.msra.mxu0 %v10084_v13 }
  0x31   :  { %8414 = vmatprep.subr.bf16.mxu0 %v10021_v0 }
  0x34   :  { %8416 = vmatpush3.bf16.msra.mxu0 %v10096_v16 }
  0x35   :  { %8417 = vmatprep.subr.bf16.mxu0 %v10021_v0 }
  0x38   :  { %8419 = vmatpush3.bf16.msra.mxu0 %v10108_v19 }
  0x39   :  { %8420 = vmatprep.subr.bf16.mxu0 %v10021_v0 }
  0x3c   :  { %8422 = vmatpush3.bf16.msra.mxu0 %v10120_v22 }
  0x3d   :  { %8423 = vmatprep.subr.bf16.mxu0 %v10021_v0 }
  0x40   :  { %8425 = vmatpush3.bf16.msra.mxu0 %v10132_v25 }
  0x41   :  { %8450 = vmatprep.subr.bf16.mxu0 %v10021_v0 }
  0xf6   :  { %v100_v27 = vpop.f32.mrb[0].mxu0 }
  0xf7   :  { %v104_v28 = vadd.f32 %v100_v27, %v33_v26  ;;  %v6148_v29 = vpop.f32.mrb[1].mxu0  ;;  %v4920_v27 = vld [vmem:[%s11641_s0 + $0x58] sm:$0xff] }
  0xf9   :  { %9893 = vtanh.f32 %v104_v28 }
 0x103   :  { %v9894_v30 = vpop.eup %9893 }
 0x104   :  { %106 = vst [vmem:[%s11642_s2] sm:$0xff] %v9894_v30  ;;  %6182 = vmatmul.mubr.f32.vlgmr.msra.gmra.mrb[0].mxu1 %v9894_v30 }
 0x105   :  { %8428 = vmatpush3.bf16.msra.mxu1 %v10051_v5  ;;  %6251 = vmatprep.mubr.msk.f32.mxu1 %vm10022_vm0, %v10023_v4 }
 0x106   :  { %8429 = vmatprep.subr.bf16.mxu1 %v10021_v0 }
 0x109   :  { %8431 = vmatpush3.bf16.msra.mxu1 %v10060_v7 }
 0x10a   :  { %8432 = vmatprep.subr.bf16.mxu1 %v10021_v0 }
 0x10d   :  { %8434 = vmatpush3.bf16.msra.mxu1 %v10072_v10 }
 0x10e   :  { %8435 = vmatprep.subr.bf16.mxu1 %v10021_v0 }
 0x111   :  { %8437 = vmatpush3.bf16.msra.mxu1 %v10084_v13 }
 0x112   :  { %8438 = vmatprep.subr.bf16.mxu1 %v10021_v0 }
 0x115   :  { %8440 = vmatpush3.bf16.msra.mxu1 %v10096_v16 }
 0x116   :  { %8441 = vmatprep.subr.bf16.mxu1 %v10021_v0 }
 0x119   :  { %8443 = vmatpush3.bf16.msra.mxu1 %v10108_v19 }
 0x11a   :  { %8444 = vmatprep.subr.bf16.mxu1 %v10021_v0 }
 0x11d   :  { %8446 = vmatpush3.bf16.msra.mxu1 %v10120_v22 }
 0x11e   :  { %8447 = vmatprep.subr.bf16.mxu1 %v10021_v0 }
 0x121   :  { %8449 = vmatpush3.bf16.msra.mxu1 %v10132_v25 }
 0x122   :  { %8474 = vmatprep.subr.bf16.mxu1 %v10021_v0 }
 0x1d7   :  { %v175_v32 = vpop.f32.mrb[0].mxu1 }
 0x1d8   :  { %v179_v33 = vadd.f32 %v4900_v31, %v175_v32  ;;  %v6183_v34 = vpop.f32.mrb[1].mxu1  ;;  %v4922_v32 = vld [vmem:[%s11641_s0 + $0x60] sm:$0xff] }
 0x1da   :  { %9895 = vtanh.f32 %v179_v33 }
 0x1e4   :  { %v9896_v35 = vpop.eup %9895 }
 0x1e5   :  { %4901 = vst [vmem:[%s11642_s2 + $0x8] sm:$0xff] %v9896_v35  ;;  %6217 = vmatmul.mubr.f32.vlgmr.msra.gmra.mrb[2].mxu0 %v9896_v35 }
 0x1e6   :  { %8452 = vmatpush3.bf16.msra.mxu0 %v10051_v5  ;;  %6286 = vmatprep.mubr.msk.f32.mxu0 %vm10022_vm0, %v10023_v4 }
 0x1e7   :  { %8453 = vmatprep.subr.bf16.mxu0 %v10021_v0 }
 0x1ea   :  { %8455 = vmatpush3.bf16.msra.mxu0 %v10060_v7 }
 0x1eb   :  { %8456 = vmatprep.subr.bf16.mxu0 %v10021_v0 }
 0x1ee   :  { %8458 = vmatpush3.bf16.msra.mxu0 %v10072_v10 }
 0x1ef   :  { %8459 = vmatprep.subr.bf16.mxu0 %v10021_v0 }
 0x1f2   :  { %8461 = vmatpush3.bf16.msra.mxu0 %v10084_v13 }
 0x1f3   :  { %8462 = vmatprep.subr.bf16.mxu0 %v10021_v0 }
 0x1f6   :  { %8464 = vmatpush3.bf16.msra.mxu0 %v10096_v16 }
 0x1f7   :  { %8465 = vmatprep.subr.bf16.mxu0 %v10021_v0 }
 0x1fa   :  { %8467 = vmatpush3.bf16.msra.mxu0 %v10108_v19 }
 0x1fb   :  { %8468 = vmatprep.subr.bf16.mxu0 %v10021_v0 }
 0x1fe   :  { %8470 = vmatpush3.bf16.msra.mxu0 %v10120_v22 }
 0x1ff   :  { %8471 = vmatprep.subr.bf16.mxu0 %v10021_v0 }
 0x202   :  { %8473 = vmatpush3.bf16.msra.mxu0 %v10132_v25 }
 0x203   :  { %8498 = vmatprep.subr.bf16.mxu0 %v10021_v0 }
 0x2b8   :  { %v251_v37 = vpop.f32.mrb[2].mxu0 }
 0x2b9   :  { %v255_v38 = vadd.f32 %v4902_v36, %v251_v37  ;;  %v6218_v39 = vpop.f32.mrb[3].mxu0  ;;  %v4924_v37 = vld [vmem:[%s11641_s0 + $0x68] sm:$0xff] }
 0x2bb   :  { %9897 = vtanh.f32 %v255_v38 }
 0x2c5   :  { %v9898_v40 = vpop.eup %9897 }
 0x2c6   :  { %4903 = vst [vmem:[%s11642_s2 + $0x10] sm:$0xff] %v9898_v40  ;;  %6252 = vmatmul.mubr.f32.vlgmr.msra.gmra.mrb[2].mxu1 %v9898_v40 }
 0x2c7   :  { %8476 = vmatpush3.bf16.msra.mxu1 %v10051_v5  ;;  %6321 = vmatprep.mubr.msk.f32.mxu1 %vm10022_vm0, %v10023_v4 }
 0x2c8   :  { %8477 = vmatprep.subr.bf16.mxu1 %v10021_v0 }
 0x2cb   :  { %8479 = vmatpush3.bf16.msra.mxu1 %v10060_v7 }
 0x2cc   :  { %8480 = vmatprep.subr.bf16.mxu1 %v10021_v0 }
 0x2cf   :  { %8482 = vmatpush3.bf16.msra.mxu1 %v10072_v10 }
 0x2d0   :  { %8483 = vmatprep.subr.bf16.mxu1 %v10021_v0 }
 0x2d3   :  { %8485 = vmatpush3.bf16.msra.mxu1 %v10084_v13 }
 0x2d4   :  { %8486 = vmatprep.subr.bf16.mxu1 %v10021_v0 }
 0x2d7   :  { %8488 = vmatpush3.bf16.msra.mxu1 %v10096_v16 }
 0x2d8   :  { %8489 = vmatprep.subr.bf16.mxu1 %v10021_v0 }
 0x2db   :  { %8491 = vmatpush3.bf16.msra.mxu1 %v10108_v19 }
 0x2dc   :  { %8492 = vmatprep.subr.bf16.mxu1 %v10021_v0 }
 0x2df   :  { %8494 = vmatpush3.bf16.msra.mxu1 %v10120_v22 }
 0x2e0   :  { %8495 = vmatprep.subr.bf16.mxu1 %v10021_v0 }
 0x2e3   :  { %8497 = vmatpush3.bf16.msra.mxu1 %v10132_v25 }
 0x2e4   :  { %8522 = vmatprep.subr.bf16.mxu1 %v10021_v0 }
 0x399   :  { %v327_v42 = vpop.f32.mrb[2].mxu1 }
 0x39a   :  { %v331_v43 = vadd.f32 %v4904_v41, %v327_v42  ;;  %v6253_v44 = vpop.f32.mrb[3].mxu1  ;;  %v4926_v42 = vld [vmem:[%s11641_s0 + $0x70] sm:$0xff] }
 0x39c   :  { %9899 = vtanh.f32 %v331_v43 }
 0x3a6   :  { %v9900_v45 = vpop.eup %9899 }
 0x3a7   :  { %4905 = vst [vmem:[%s11642_s2 + $0x18] sm:$0xff] %v9900_v45  ;;  %6287 = vmatmul.mubr.f32.vlgmr.msra.gmra.mrb[4].mxu0 %v9900_v45 }
 0x3a8   :  { %8500 = vmatpush3.bf16.msra.mxu0 %v10051_v5  ;;  %6356 = vmatprep.mubr.msk.f32.mxu0 %vm10022_vm0, %v10023_v4 }
 0x3a9   :  { %8501 = vmatprep.subr.bf16.mxu0 %v10021_v0 }
 0x3ac   :  { %8503 = vmatpush3.bf16.msra.mxu0 %v10060_v7 }
 0x3ad   :  { %8504 = vmatprep.subr.bf16.mxu0 %v10021_v0 }
 0x3b0   :  { %8506 = vmatpush3.bf16.msra.mxu0 %v10072_v10 }
 0x3b1   :  { %8507 = vmatprep.subr.bf16.mxu0 %v10021_v0 }
 0x3b4   :  { %8509 = vmatpush3.bf16.msra.mxu0 %v10084_v13 }
 0x3b5   :  { %8510 = vmatprep.subr.bf16.mxu0 %v10021_v0 }
 0x3b8   :  { %8512 = vmatpush3.bf16.msra.mxu0 %v10096_v16 }
 0x3b9   :  { %8513 = vmatprep.subr.bf16.mxu0 %v10021_v0 }
 0x3bc   :  { %8515 = vmatpush3.bf16.msra.mxu0 %v10108_v19 }
 0x3bd   :  { %8516 = vmatprep.subr.bf16.mxu0 %v10021_v0 }
 0x3c0   :  { %8518 = vmatpush3.bf16.msra.mxu0 %v10120_v22 }
 0x3c1   :  { %8519 = vmatprep.subr.bf16.mxu0 %v10021_v0 }
 0x3c4   :  { %8521 = vmatpush3.bf16.msra.mxu0 %v10132_v25 }
 0x3c5   :  { %8546 = vmatprep.subr.bf16.mxu0 %v10021_v0 }
 0x47a   :  { %v403_v47 = vpop.f32.mrb[4].mxu0 }
 0x47b   :  { %v407_v48 = vadd.f32 %v4906_v46, %v403_v47  ;;  %v6288_v49 = vpop.f32.mrb[5].mxu0  ;;  %v4928_v47 = vld [vmem:[%s11641_s0 + $0x78] sm:$0xff] }
 0x47d   :  { %9901 = vtanh.f32 %v407_v48 }
 0x487   :  { %v9902_v50 = vpop.eup %9901 }
 0x488   :  { %4907 = vst [vmem:[%s11642_s2 + $0x20] sm:$0xff] %v9902_v50  ;;  %6322 = vmatmul.mubr.f32.vlgmr.msra.gmra.mrb[4].mxu1 %v9902_v50 }
 0x489   :  { %8524 = vmatpush3.bf16.msra.mxu1 %v10051_v5  ;;  %6391 = vmatprep.mubr.msk.f32.mxu1 %vm10022_vm0, %v10023_v4 }
 0x48a   :  { %8525 = vmatprep.subr.bf16.mxu1 %v10021_v0 }
 0x48d   :  { %8527 = vmatpush3.bf16.msra.mxu1 %v10060_v7 }
 0x48e   :  { %8528 = vmatprep.subr.bf16.mxu1 %v10021_v0 }
 0x491   :  { %8530 = vmatpush3.bf16.msra.mxu1 %v10072_v10 }
 0x492   :  { %8531 = vmatprep.subr.bf16.mxu1 %v10021_v0 }
 0x495   :  { %8533 = vmatpush3.bf16.msra.mxu1 %v10084_v13 }
 0x496   :  { %8534 = vmatprep.subr.bf16.mxu1 %v10021_v0 }
 0x499   :  { %8536 = vmatpush3.bf16.msra.mxu1 %v10096_v16 }
 0x49a   :  { %8537 = vmatprep.subr.bf16.mxu1 %v10021_v0 }
 0x49d   :  { %8539 = vmatpush3.bf16.msra.mxu1 %v10108_v19 }
 0x49e   :  { %8540 = vmatprep.subr.bf16.mxu1 %v10021_v0 }
 0x4a1   :  { %8542 = vmatpush3.bf16.msra.mxu1 %v10120_v22 }
 0x4a2   :  { %8543 = vmatprep.subr.bf16.mxu1 %v10021_v0 }
 0x4a5   :  { %8545 = vmatpush3.bf16.msra.mxu1 %v10132_v25 }
 0x4a6   :  { %8570 = vmatprep.subr.bf16.mxu1 %v10021_v0 }
 0x55b   :  { %v479_v52 = vpop.f32.mrb[4].mxu1 }
 0x55c   :  { %v483_v53 = vadd.f32 %v4908_v51, %v479_v52  ;;  %v6323_v54 = vpop.f32.mrb[5].mxu1  ;;  %v4930_v52 = vld [vmem:[%s11641_s0 + $0x80] sm:$0xff] }
 0x55e   :  { %9903 = vtanh.f32 %v483_v53 }
 0x568   :  { %v9904_v55 = vpop.eup %9903 }
 0x569   :  { %4909 = vst [vmem:[%s11642_s2 + $0x28] sm:$0xff] %v9904_v55  ;;  %6357 = vmatmul.mubr.f32.vlgmr.msra.gmra.mrb[6].mxu0 %v9904_v55 }
 0x56a   :  { %8548 = vmatpush3.bf16.msra.mxu0 %v10051_v5  ;;  %6426 = vmatprep.mubr.msk.f32.mxu0 %vm10022_vm0, %v10023_v4 }
 0x56b   :  { %8549 = vmatprep.subr.bf16.mxu0 %v10021_v0 }
 0x56e   :  { %8551 = vmatpush3.bf16.msra.mxu0 %v10060_v7 }
 0x56f   :  { %8552 = vmatprep.subr.bf16.mxu0 %v10021_v0 }
 0x572   :  { %8554 = vmatpush3.bf16.msra.mxu0 %v10072_v10 }
 0x573   :  { %8555 = vmatprep.subr.bf16.mxu0 %v10021_v0 }
 0x576   :  { %8557 = vmatpush3.bf16.msra.mxu0 %v10084_v13 }
 0x577   :  { %8558 = vmatprep.subr.bf16.mxu0 %v10021_v0 }
 0x57a   :  { %8560 = vmatpush3.bf16.msra.mxu0 %v10096_v16 }
 0x57b   :  { %8561 = vmatprep.subr.bf16.mxu0 %v10021_v0 }
 0x57e   :  { %8563 = vmatpush3.bf16.msra.mxu0 %v10108_v19 }
 0x57f   :  { %8564 = vmatprep.subr.bf16.mxu0 %v10021_v0 }
 0x582   :  { %8566 = vmatpush3.bf16.msra.mxu0 %v10120_v22 }
 0x583   :  { %8567 = vmatprep.subr.bf16.mxu0 %v10021_v0 }
 0x586   :  { %8569 = vmatpush3.bf16.msra.mxu0 %v10132_v25 }
 0x587   :  { %8594 = vmatprep.subr.bf16.mxu0 %v10021_v0 }
 0x63c   :  { %v555_v57 = vpop.f32.mrb[6].mxu0 }
 0x63d   :  { %v559_v58 = vadd.f32 %v4910_v56, %v555_v57  ;;  %v6358_v59 = vpop.f32.mrb[7].mxu0  ;;  %v4932_v57 = vld [vmem:[%s11641_s0 + $0x88] sm:$0xff] }
 0x63f   :  { %9905 = vtanh.f32 %v559_v58 }
 0x649   :  { %v9906_v60 = vpop.eup %9905 }
 0x64a   :  { %4911 = vst [vmem:[%s11642_s2 + $0x30] sm:$0xff] %v9906_v60  ;;  %6392 = vmatmul.mubr.f32.vlgmr.msra.gmra.mrb[6].mxu1 %v9906_v60 }
 0x64b   :  { %8572 = vmatpush3.bf16.msra.mxu1 %v10051_v5  ;;  %6461 = vmatprep.mubr.msk.f32.mxu1 %vm10022_vm0, %v10023_v4 }
 0x64c   :  { %8573 = vmatprep.subr.bf16.mxu1 %v10021_v0 }
 0x64f   :  { %8575 = vmatpush3.bf16.msra.mxu1 %v10060_v7 }
 0x650   :  { %8576 = vmatprep.subr.bf16.mxu1 %v10021_v0 }
 0x653   :  { %8578 = vmatpush3.bf16.msra.mxu1 %v10072_v10 }
 0x654   :  { %8579 = vmatprep.subr.bf16.mxu1 %v10021_v0 }
 0x657   :  { %8581 = vmatpush3.bf16.msra.mxu1 %v10084_v13 }
 0x658   :  { %8582 = vmatprep.subr.bf16.mxu1 %v10021_v0 }
 0x65b   :  { %8584 = vmatpush3.bf16.msra.mxu1 %v10096_v16 }
 0x65c   :  { %8585 = vmatprep.subr.bf16.mxu1 %v10021_v0 }
 0x65f   :  { %8587 = vmatpush3.bf16.msra.mxu1 %v10108_v19 }
 0x660   :  { %8588 = vmatprep.subr.bf16.mxu1 %v10021_v0 }
 0x663   :  { %8590 = vmatpush3.bf16.msra.mxu1 %v10120_v22 }
 0x664   :  { %8591 = vmatprep.subr.bf16.mxu1 %v10021_v0 }
 0x667   :  { %8593 = vmatpush3.bf16.msra.mxu1 %v10132_v25 }
 0x668   :  { %8618 = vmatprep.subr.bf16.mxu1 %v10021_v0 }
 0x71d   :  { %v631_v62 = vpop.f32.mrb[6].mxu1 }
 0x71e   :  { %v635_v63 = vadd.f32 %v4912_v61, %v631_v62  ;;  %v6393_v1 = vpop.f32.mrb[7].mxu1  ;;  %v4934_v62 = vld [vmem:[%s11641_s0 + $0x90] sm:$0xff] }
 0x720   :  { %9907 = vtanh.f32 %v635_v63 }
 0x72a   :  { %v9908_v2 = vpop.eup %9907 }
 0x72b   :  { %4913 = vst [vmem:[%s11642_s2 + $0x38] sm:$0xff] %v9908_v2  ;;  %6427 = vmatmul.mubr.f32.vlgmr.msra.gmra.mrb[8].mxu0 %v9908_v2 }
 0x72c   :  { %8596 = vmatpush3.bf16.msra.mxu0 %v10051_v5  ;;  %6496 = vmatprep.mubr.msk.f32.mxu0 %vm10022_vm0, %v10023_v4 }
 0x72d   :  { %8597 = vmatprep.subr.bf16.mxu0 %v10021_v0 }
 0x730   :  { %8599 = vmatpush3.bf16.msra.mxu0 %v10060_v7 }
 0x731   :  { %8600 = vmatprep.subr.bf16.mxu0 %v10021_v0 }
 0x734   :  { %8602 = vmatpush3.bf16.msra.mxu0 %v10072_v10 }
 0x735   :  { %8603 = vmatprep.subr.bf16.mxu0 %v10021_v0 }
 0x738   :  { %8605 = vmatpush3.bf16.msra.mxu0 %v10084_v13 }
 0x739   :  { %8606 = vmatprep.subr.bf16.mxu0 %v10021_v0 }
 0x73c   :  { %8608 = vmatpush3.bf16.msra.mxu0 %v10096_v16 }
 0x73d   :  { %8609 = vmatprep.subr.bf16.mxu0 %v10021_v0 }
 0x740   :  { %8611 = vmatpush3.bf16.msra.mxu0 %v10108_v19 }
 0x741   :  { %8612 = vmatprep.subr.bf16.mxu0 %v10021_v0 }
 0x744   :  { %8614 = vmatpush3.bf16.msra.mxu0 %v10120_v22 }
 0x745   :  { %8615 = vmatprep.subr.bf16.mxu0 %v10021_v0 }
 0x748   :  { %8617 = vmatpush3.bf16.msra.mxu0 %v10132_v25 }
 0x749   :  { %8642 = vmatprep.subr.bf16.mxu0 %v10021_v0 }
 0x7fe   :  { %v707_v6 = vpop.f32.mrb[8].mxu0 }
 0x7ff   :  { %v711_v8 = vadd.f32 %v4914_v3, %v707_v6  ;;  %v6428_v9 = vpop.f32.mrb[9].mxu0  ;;  %v4936_v6 = vld [vmem:[%s11641_s0 + $0x98] sm:$0xff] }
 0x801   :  { %9909 = vtanh.f32 %v711_v8 }
 0x80b   :  { %v9910_v11 = vpop.eup %9909 }
 0x80c   :  { %4915 = vst [vmem:[%s11642_s2 + $0x40] sm:$0xff] %v9910_v11  ;;  %6462 = vmatmul.mubr.f32.vlgmr.msra.gmra.mrb[8].mxu1 %v9910_v11 }
 0x80d   :  { %8620 = vmatpush3.bf16.msra.mxu1 %v10051_v5  ;;  %6531 = vmatprep.mubr.msk.f32.mxu1 %vm10022_vm0, %v10023_v4 }
 0x80e   :  { %8621 = vmatprep.subr.bf16.mxu1 %v10021_v0 }
 0x811   :  { %8623 = vmatpush3.bf16.msra.mxu1 %v10060_v7 }
 0x812   :  { %8624 = vmatprep.subr.bf16.mxu1 %v10021_v0 }
 0x815   :  { %8626 = vmatpush3.bf16.msra.mxu1 %v10072_v10 }
 0x816   :  { %8627 = vmatprep.subr.bf16.mxu1 %v10021_v0 }
 0x819   :  { %8629 = vmatpush3.bf16.msra.mxu1 %v10084_v13 }
 0x81a   :  { %8630 = vmatprep.subr.bf16.mxu1 %v10021_v0 }
 0x81d   :  { %8632 = vmatpush3.bf16.msra.mxu1 %v10096_v16 }
 0x81e   :  { %8633 = vmatprep.subr.bf16.mxu1 %v10021_v0 }
 0x821   :  { %8635 = vmatpush3.bf16.msra.mxu1 %v10108_v19 }
 0x822   :  { %8636 = vmatprep.subr.bf16.mxu1 %v10021_v0 }
 0x825   :  { %8638 = vmatpush3.bf16.msra.mxu1 %v10120_v22 }
 0x826   :  { %8639 = vmatprep.subr.bf16.mxu1 %v10021_v0 }
 0x829   :  { %8641 = vmatpush3.bf16.msra.mxu1 %v10132_v25 }
 0x82a   :  { %8666 = vmatprep.subr.bf16.mxu1 %v10021_v0 }
 0x8df   :  { %v783_v14 = vpop.f32.mrb[8].mxu1 }
 0x8e0   :  { %v787_v15 = vadd.f32 %v4916_v12, %v783_v14  ;;  %v6463_v17 = vpop.f32.mrb[9].mxu1  ;;  %v4938_v14 = vld [vmem:[%s11641_s0 + $0xa0] sm:$0xff] }
 0x8e2   :  { %9911 = vtanh.f32 %v787_v15 }
 0x8ec   :  { %v9912_v18 = vpop.eup %9911 }
 0x8ed   :  { %4917 = vst [vmem:[%s11642_s2 + $0x48] sm:$0xff] %v9912_v18  ;;  %6497 = vmatmul.mubr.f32.vlgmr.msra.gmra.mrb[10].mxu0 %v9912_v18 }
 0x8ee   :  { %8644 = vmatpush3.bf16.msra.mxu0 %v10051_v5  ;;  %6566 = vmatprep.mubr.msk.f32.mxu0 %vm10022_vm0, %v10023_v4 }
 0x8ef   :  { %8645 = vmatprep.subr.bf16.mxu0 %v10021_v0 }
 0x8f2   :  { %8647 = vmatpush3.bf16.msra.mxu0 %v10060_v7 }
 0x8f3   :  { %8648 = vmatprep.subr.bf16.mxu0 %v10021_v0 }
 0x8f6   :  { %8650 = vmatpush3.bf16.msra.mxu0 %v10072_v10 }
 0x8f7   :  { %8651 = vmatprep.subr.bf16.mxu0 %v10021_v0 }
 0x8fa   :  { %8653 = vmatpush3.bf16.msra.mxu0 %v10084_v13 }
 0x8fb   :  { %8654 = vmatprep.subr.bf16.mxu0 %v10021_v0 }
 0x8fe   :  { %8656 = vmatpush3.bf16.msra.mxu0 %v10096_v16 }
 0x8ff   :  { %8657 = vmatprep.subr.bf16.mxu0 %v10021_v0 }
 0x902   :  { %8659 = vmatpush3.bf16.msra.mxu0 %v10108_v19 }
 0x903   :  { %8660 = vmatprep.subr.bf16.mxu0 %v10021_v0 }
 0x906   :  { %8662 = vmatpush3.bf16.msra.mxu0 %v10120_v22 }
 0x907   :  { %8663 = vmatprep.subr.bf16.mxu0 %v10021_v0 }
 0x90a   :  { %8665 = vmatpush3.bf16.msra.mxu0 %v10132_v25 }
 0x90b   :  { %8690 = vmatprep.subr.bf16.mxu0 %v10021_v0 }
 0x9c0   :  { %v859_v21 = vpop.f32.mrb[10].mxu0 }
 0x9c1   :  { %v863_v23 = vadd.f32 %v4918_v20, %v859_v21  ;;  %v6498_v24 = vpop.f32.mrb[11].mxu0  ;;  %v4940_v21 = vld [vmem:[%s11641_s0 + $0xa8] sm:$0xff] }
 0x9c3   :  { %9913 = vtanh.f32 %v863_v23 }
 0x9cd   :  { %v9914_v26 = vpop.eup %9913 }
 0x9ce   :  { %4919 = vst [vmem:[%s11642_s2 + $0x50] sm:$0xff] %v9914_v26  ;;  %6532 = vmatmul.mubr.f32.vlgmr.msra.gmra.mrb[10].mxu1 %v9914_v26 }
 0x9cf   :  { %8668 = vmatpush3.bf16.msra.mxu1 %v10051_v5  ;;  %6601 = vmatprep.mubr.msk.f32.mxu1 %vm10022_vm0, %v10023_v4 }
 0x9d0   :  { %8669 = vmatprep.subr.bf16.mxu1 %v10021_v0 }
 0x9d3   :  { %8671 = vmatpush3.bf16.msra.mxu1 %v10060_v7 }
 0x9d4   :  { %8672 = vmatprep.subr.bf16.mxu1 %v10021_v0 }
 0x9d7   :  { %8674 = vmatpush3.bf16.msra.mxu1 %v10072_v10 }
 0x9d8   :  { %8675 = vmatprep.subr.bf16.mxu1 %v10021_v0 }
 0x9db   :  { %8677 = vmatpush3.bf16.msra.mxu1 %v10084_v13 }
 0x9dc   :  { %8678 = vmatprep.subr.bf16.mxu1 %v10021_v0 }
 0x9df   :  { %8680 = vmatpush3.bf16.msra.mxu1 %v10096_v16 }
 0x9e0   :  { %8681 = vmatprep.subr.bf16.mxu1 %v10021_v0 }
 0x9e3   :  { %8683 = vmatpush3.bf16.msra.mxu1 %v10108_v19 }
 0x9e4   :  { %8684 = vmatprep.subr.bf16.mxu1 %v10021_v0 }
 0x9e7   :  { %8686 = vmatpush3.bf16.msra.mxu1 %v10120_v22 }
 0x9e8   :  { %8687 = vmatprep.subr.bf16.mxu1 %v10021_v0 }
 0x9eb   :  { %8689 = vmatpush3.bf16.msra.mxu1 %v10132_v25 }
 0x9ec   :  { %8714 = vmatprep.subr.bf16.mxu1 %v10021_v0 }
 0xaa1   :  { %v935_v28 = vpop.f32.mrb[10].mxu1 }
 0xaa2   :  { %v939_v29 = vadd.f32 %v4920_v27, %v935_v28  ;;  %v6533_v30 = vpop.f32.mrb[11].mxu1  ;;  %v4942_v28 = vld [vmem:[%s11641_s0 + $0xb0] sm:$0xff] }
 0xaa4   :  { %9915 = vtanh.f32 %v939_v29 }
 0xaae   :  { %v9916_v31 = vpop.eup %9915 }
 0xaaf   :  { %4921 = vst [vmem:[%s11642_s2 + $0x58] sm:$0xff] %v9916_v31  ;;  %6567 = vmatmul.mubr.f32.vlgmr.msra.gmra.mrb[12].mxu0 %v9916_v31 }
 0xab0   :  { %8692 = vmatpush3.bf16.msra.mxu0 %v10051_v5  ;;  %6636 = vmatprep.mubr.msk.f32.mxu0 %vm10022_vm0, %v10023_v4 }
 0xab1   :  { %8693 = vmatprep.subr.bf16.mxu0 %v10021_v0 }
 0xab4   :  { %8695 = vmatpush3.bf16.msra.mxu0 %v10060_v7 }
 0xab5   :  { %8696 = vmatprep.subr.bf16.mxu0 %v10021_v0 }
 0xab8   :  { %8698 = vmatpush3.bf16.msra.mxu0 %v10072_v10 }
 0xab9   :  { %8699 = vmatprep.subr.bf16.mxu0 %v10021_v0 }
 0xabc   :  { %8701 = vmatpush3.bf16.msra.mxu0 %v10084_v13 }
 0xabd   :  { %8702 = vmatprep.subr.bf16.mxu0 %v10021_v0 }
 0xac0   :  { %8704 = vmatpush3.bf16.msra.mxu0 %v10096_v16 }
 0xac1   :  { %8705 = vmatprep.subr.bf16.mxu0 %v10021_v0 }
 0xac4   :  { %8707 = vmatpush3.bf16.msra.mxu0 %v10108_v19 }
 0xac5   :  { %8708 = vmatprep.subr.bf16.mxu0 %v10021_v0 }
 0xac8   :  { %8710 = vmatpush3.bf16.msra.mxu0 %v10120_v22 }
 0xac9   :  { %8711 = vmatprep.subr.bf16.mxu0 %v10021_v0 }
 0xacc   :  { %8713 = vmatpush3.bf16.msra.mxu0 %v10132_v25 }
 0xacd   :  { %8738 = vmatprep.subr.bf16.mxu0 %v10021_v0 }
 0xb82   :  { %v1011_v33 = vpop.f32.mrb[12].mxu0 }
 0xb83   :  { %v1015_v34 = vadd.f32 %v4922_v32, %v1011_v33  ;;  %v6568_v35 = vpop.f32.mrb[13].mxu0  ;;  %v4944_v33 = vld [vmem:[%s11641_s0 + $0xb8] sm:$0xff] }
 0xb85   :  { %9917 = vtanh.f32 %v1015_v34 }
 0xb8f   :  { %v9918_v36 = vpop.eup %9917 }
 0xb90   :  { %4923 = vst [vmem:[%s11642_s2 + $0x60] sm:$0xff] %v9918_v36  ;;  %6602 = vmatmul.mubr.f32.vlgmr.msra.gmra.mrb[12].mxu1 %v9918_v36 }
 0xb91   :  { %8716 = vmatpush3.bf16.msra.mxu1 %v10051_v5  ;;  %6671 = vmatprep.mubr.msk.f32.mxu1 %vm10022_vm0, %v10023_v4 }
 0xb92   :  { %8717 = vmatprep.subr.bf16.mxu1 %v10021_v0 }
 0xb95   :  { %8719 = vmatpush3.bf16.msra.mxu1 %v10060_v7 }
 0xb96   :  { %8720 = vmatprep.subr.bf16.mxu1 %v10021_v0 }
 0xb99   :  { %8722 = vmatpush3.bf16.msra.mxu1 %v10072_v10 }
 0xb9a   :  { %8723 = vmatprep.subr.bf16.mxu1 %v10021_v0 }
 0xb9d   :  { %8725 = vmatpush3.bf16.msra.mxu1 %v10084_v13 }
 0xb9e   :  { %8726 = vmatprep.subr.bf16.mxu1 %v10021_v0 }
 0xba1   :  { %8728 = vmatpush3.bf16.msra.mxu1 %v10096_v16 }
 0xba2   :  { %8729 = vmatprep.subr.bf16.mxu1 %v10021_v0 }
 0xba5   :  { %8731 = vmatpush3.bf16.msra.mxu1 %v10108_v19 }
 0xba6   :  { %8732 = vmatprep.subr.bf16.mxu1 %v10021_v0 }
 0xba9   :  { %8734 = vmatpush3.bf16.msra.mxu1 %v10120_v22 }
 0xbaa   :  { %8735 = vmatprep.subr.bf16.mxu1 %v10021_v0 }
 0xbad   :  { %8737 = vmatpush3.bf16.msra.mxu1 %v10132_v25 }
 0xbae   :  { %8762 = vmatprep.subr.bf16.mxu1 %v10021_v0 }
 0xc63   :  { %v1087_v38 = vpop.f32.mrb[12].mxu1 }
 0xc64   :  { %v1091_v39 = vadd.f32 %v4924_v37, %v1087_v38  ;;  %v6603_v40 = vpop.f32.mrb[13].mxu1  ;;  %v4946_v38 = vld [vmem:[%s11641_s0 + $0xc0] sm:$0xff] }
 0xc66   :  { %9919 = vtanh.f32 %v1091_v39 }
 0xc70   :  { %v9920_v41 = vpop.eup %9919 }
 0xc71   :  { %4925 = vst [vmem:[%s11642_s2 + $0x68] sm:$0xff] %v9920_v41  ;;  %6637 = vmatmul.mubr.f32.vlgmr.msra.gmra.mrb[14].mxu0 %v9920_v41 }
 0xc72   :  { %8740 = vmatpush3.bf16.msra.mxu0 %v10051_v5  ;;  %6706 = vmatprep.mubr.msk.f32.mxu0 %vm10022_vm0, %v10023_v4 }
 0xc73   :  { %8741 = vmatprep.subr.bf16.mxu0 %v10021_v0 }
 0xc76   :  { %8743 = vmatpush3.bf16.msra.mxu0 %v10060_v7 }
 0xc77   :  { %8744 = vmatprep.subr.bf16.mxu0 %v10021_v0 }
 0xc7a   :  { %8746 = vmatpush3.bf16.msra.mxu0 %v10072_v10 }
 0xc7b   :  { %8747 = vmatprep.subr.bf16.mxu0 %v10021_v0 }
 0xc7e   :  { %8749 = vmatpush3.bf16.msra.mxu0 %v10084_v13 }
 0xc7f   :  { %8750 = vmatprep.subr.bf16.mxu0 %v10021_v0 }
 0xc82   :  { %8752 = vmatpush3.bf16.msra.mxu0 %v10096_v16 }
 0xc83   :  { %8753 = vmatprep.subr.bf16.mxu0 %v10021_v0 }
 0xc86   :  { %8755 = vmatpush3.bf16.msra.mxu0 %v10108_v19 }
 0xc87   :  { %8756 = vmatprep.subr.bf16.mxu0 %v10021_v0 }
 0xc8a   :  { %8758 = vmatpush3.bf16.msra.mxu0 %v10120_v22 }
 0xc8b   :  { %8759 = vmatprep.subr.bf16.mxu0 %v10021_v0 }
 0xc8e   :  { %8761 = vmatpush3.bf16.msra.mxu0 %v10132_v25 }
 0xc8f   :  { %8786 = vmatprep.subr.bf16.mxu0 %v10021_v0 }
 0xd44   :  { %v1163_v43 = vpop.f32.mrb[14].mxu0 }
 0xd45   :  { %v1167_v44 = vadd.f32 %v4926_v42, %v1163_v43  ;;  %v6638_v45 = vpop.f32.mrb[15].mxu0  ;;  %v4948_v43 = vld [vmem:[%s11641_s0 + $0xc8] sm:$0xff] }
 0xd47   :  { %9921 = vtanh.f32 %v1167_v44 }
 0xd51   :  { %v9922_v46 = vpop.eup %9921 }
 0xd52   :  { %4927 = vst [vmem:[%s11642_s2 + $0x70] sm:$0xff] %v9922_v46  ;;  %6672 = vmatmul.mubr.f32.vlgmr.msra.gmra.mrb[14].mxu1 %v9922_v46 }
 0xd53   :  { %8764 = vmatpush3.bf16.msra.mxu1 %v10051_v5  ;;  %6741 = vmatprep.mubr.msk.f32.mxu1 %vm10022_vm0, %v10023_v4 }
 0xd54   :  { %8765 = vmatprep.subr.bf16.mxu1 %v10021_v0 }
 0xd57   :  { %8767 = vmatpush3.bf16.msra.mxu1 %v10060_v7 }
 0xd58   :  { %8768 = vmatprep.subr.bf16.mxu1 %v10021_v0 }
 0xd5b   :  { %8770 = vmatpush3.bf16.msra.mxu1 %v10072_v10 }
 0xd5c   :  { %8771 = vmatprep.subr.bf16.mxu1 %v10021_v0 }
 0xd5f   :  { %8773 = vmatpush3.bf16.msra.mxu1 %v10084_v13 }
 0xd60   :  { %8774 = vmatprep.subr.bf16.mxu1 %v10021_v0 }
 0xd63   :  { %8776 = vmatpush3.bf16.msra.mxu1 %v10096_v16 }
 0xd64   :  { %8777 = vmatprep.subr.bf16.mxu1 %v10021_v0 }
 0xd67   :  { %8779 = vmatpush3.bf16.msra.mxu1 %v10108_v19 }
 0xd68   :  { %8780 = vmatprep.subr.bf16.mxu1 %v10021_v0 }
 0xd6b   :  { %8782 = vmatpush3.bf16.msra.mxu1 %v10120_v22 }
 0xd6c   :  { %8783 = vmatprep.subr.bf16.mxu1 %v10021_v0 }
 0xd6f   :  { %8785 = vmatpush3.bf16.msra.mxu1 %v10132_v25 }
 0xd70   :  { %8810 = vmatprep.subr.bf16.mxu1 %v10021_v0 }
 0xe25   :  { %v1239_v48 = vpop.f32.mrb[14].mxu1 }
 0xe26   :  { %v1243_v49 = vadd.f32 %v4928_v47, %v1239_v48  ;;  %v6673_v50 = vpop.f32.mrb[15].mxu1  ;;  %v4950_v48 = vld [vmem:[%s11641_s0 + $0xd0] sm:$0xff] }
 0xe28   :  { %9923 = vtanh.f32 %v1243_v49 }
 0xe32   :  { %v9924_v51 = vpop.eup %9923 }
 0xe33   :  { %4929 = vst [vmem:[%s11642_s2 + $0x78] sm:$0xff] %v9924_v51  ;;  %6707 = vmatmul.mubr.f32.vlgmr.msra.gmra.mrb[16].mxu0 %v9924_v51 }
 0xe34   :  { %8788 = vmatpush3.bf16.msra.mxu0 %v10051_v5  ;;  %6776 = vmatprep.mubr.msk.f32.mxu0 %vm10022_vm0, %v10023_v4 }
 0xe35   :  { %8789 = vmatprep.subr.bf16.mxu0 %v10021_v0 }
 0xe38   :  { %8791 = vmatpush3.bf16.msra.mxu0 %v10060_v7 }
 0xe39   :  { %8792 = vmatprep.subr.bf16.mxu0 %v10021_v0 }
 0xe3c   :  { %8794 = vmatpush3.bf16.msra.mxu0 %v10072_v10 }
 0xe3d   :  { %8795 = vmatprep.subr.bf16.mxu0 %v10021_v0 }
 0xe40   :  { %8797 = vmatpush3.bf16.msra.mxu0 %v10084_v13 }
 0xe41   :  { %8798 = vmatprep.subr.bf16.mxu0 %v10021_v0 }
 0xe44   :  { %8800 = vmatpush3.bf16.msra.mxu0 %v10096_v16 }
 0xe45   :  { %8801 = vmatprep.subr.bf16.mxu0 %v10021_v0 }
 0xe48   :  { %8803 = vmatpush3.bf16.msra.mxu0 %v10108_v19 }
 0xe49   :  { %8804 = vmatprep.subr.bf16.mxu0 %v10021_v0 }
 0xe4c   :  { %8806 = vmatpush3.bf16.msra.mxu0 %v10120_v22 }
 0xe4d   :  { %8807 = vmatprep.subr.bf16.mxu0 %v10021_v0 }
 0xe50   :  { %8809 = vmatpush3.bf16.msra.mxu0 %v10132_v25 }
 0xe51   :  { %8834 = vmatprep.subr.bf16.mxu0 %v10021_v0 }
 0xf06   :  { %v1315_v53 = vpop.f32.mrb[16].mxu0 }
 0xf07   :  { %v1319_v54 = vadd.f32 %v4930_v52, %v1315_v53  ;;  %v6708_v55 = vpop.f32.mrb[17].mxu0  ;;  %v4952_v53 = vld [vmem:[%s11641_s0 + $0xd8] sm:$0xff] }
 0xf09   :  { %9925 = vtanh.f32 %v1319_v54 }
 0xf13   :  { %v9926_v56 = vpop.eup %9925 }
 0xf14   :  { %4931 = vst [vmem:[%s11642_s2 + $0x80] sm:$0xff] %v9926_v56  ;;  %6742 = vmatmul.mubr.f32.vlgmr.msra.gmra.mrb[16].mxu1 %v9926_v56 }
 0xf15   :  { %8812 = vmatpush3.bf16.msra.mxu1 %v10051_v5  ;;  %6811 = vmatprep.mubr.msk.f32.mxu1 %vm10022_vm0, %v10023_v4 }
 0xf16   :  { %8813 = vmatprep.subr.bf16.mxu1 %v10021_v0 }
 0xf19   :  { %8815 = vmatpush3.bf16.msra.mxu1 %v10060_v7 }
 0xf1a   :  { %8816 = vmatprep.subr.bf16.mxu1 %v10021_v0 }
 0xf1d   :  { %8818 = vmatpush3.bf16.msra.mxu1 %v10072_v10 }
 0xf1e   :  { %8819 = vmatprep.subr.bf16.mxu1 %v10021_v0 }
 0xf21   :  { %8821 = vmatpush3.bf16.msra.mxu1 %v10084_v13 }
 0xf22   :  { %8822 = vmatprep.subr.bf16.mxu1 %v10021_v0 }
 0xf25   :  { %8824 = vmatpush3.bf16.msra.mxu1 %v10096_v16 }
 0xf26   :  { %8825 = vmatprep.subr.bf16.mxu1 %v10021_v0 }
 0xf29   :  { %8827 = vmatpush3.bf16.msra.mxu1 %v10108_v19 }
 0xf2a   :  { %8828 = vmatprep.subr.bf16.mxu1 %v10021_v0 }
 0xf2d   :  { %8830 = vmatpush3.bf16.msra.mxu1 %v10120_v22 }
 0xf2e   :  { %8831 = vmatprep.subr.bf16.mxu1 %v10021_v0 }
 0xf31   :  { %8833 = vmatpush3.bf16.msra.mxu1 %v10132_v25 }
 0xf32   :  { %8858 = vmatprep.subr.bf16.mxu1 %v10021_v0 }
 0xfe7   :  { %v1391_v58 = vpop.f32.mrb[16].mxu1 }
 0xfe8   :  { %v1395_v59 = vadd.f32 %v4932_v57, %v1391_v58  ;;  %v6743_v60 = vpop.f32.mrb[17].mxu1  ;;  %v4954_v58 = vld [vmem:[%s11641_s0 + $0xe0] sm:$0xff] }
 0xfea   :  { %9927 = vtanh.f32 %v1395_v59 }
 0xff4   :  { %v9928_v61 = vpop.eup %9927 }
 0xff5   :  { %4933 = vst [vmem:[%s11642_s2 + $0x88] sm:$0xff] %v9928_v61  ;;  %6777 = vmatmul.mubr.f32.vlgmr.msra.gmra.mrb[18].mxu0 %v9928_v61 }
 0xff6   :  { %8836 = vmatpush3.bf16.msra.mxu0 %v10051_v5  ;;  %6846 = vmatprep.mubr.msk.f32.mxu0 %vm10022_vm0, %v10023_v4 }
 0xff7   :  { %8837 = vmatprep.subr.bf16.mxu0 %v10021_v0 }
 0xffa   :  { %8839 = vmatpush3.bf16.msra.mxu0 %v10060_v7 }
 0xffb   :  { %8840 = vmatprep.subr.bf16.mxu0 %v10021_v0 }
 0xffe   :  { %8842 = vmatpush3.bf16.msra.mxu0 %v10072_v10 }
 0xfff   :  { %8843 = vmatprep.subr.bf16.mxu0 %v10021_v0 }
0x1002   :  { %8845 = vmatpush3.bf16.msra.mxu0 %v10084_v13 }
0x1003   :  { %8846 = vmatprep.subr.bf16.mxu0 %v10021_v0 }
0x1006   :  { %8848 = vmatpush3.bf16.msra.mxu0 %v10096_v16 }
0x1007   :  { %8849 = vmatprep.subr.bf16.mxu0 %v10021_v0 }
0x100a   :  { %8851 = vmatpush3.bf16.msra.mxu0 %v10108_v19 }
0x100b   :  { %8852 = vmatprep.subr.bf16.mxu0 %v10021_v0 }
0x100e   :  { %8854 = vmatpush3.bf16.msra.mxu0 %v10120_v22 }
0x100f   :  { %8855 = vmatprep.subr.bf16.mxu0 %v10021_v0 }
0x1012   :  { %8857 = vmatpush3.bf16.msra.mxu0 %v10132_v25 }
0x1013   :  { %8882 = vmatprep.subr.bf16.mxu0 %v10021_v0 }
0x10c8   :  { %v1467_v63 = vpop.f32.mrb[18].mxu0 }
0x10c9   :  { %v1471_v1 = vadd.f32 %v4934_v62, %v1467_v63  ;;  %v6778_v2 = vpop.f32.mrb[19].mxu0  ;;  %v4956_v63 = vld [vmem:[%s11641_s0 + $0xe8] sm:$0xff] }
0x10cb   :  { %9929 = vtanh.f32 %v1471_v1 }
0x10d5   :  { %v9930_v3 = vpop.eup %9929 }
0x10d6   :  { %4935 = vst [vmem:[%s11642_s2 + $0x90] sm:$0xff] %v9930_v3  ;;  %6812 = vmatmul.mubr.f32.vlgmr.msra.gmra.mrb[18].mxu1 %v9930_v3 }
0x10d7   :  { %8860 = vmatpush3.bf16.msra.mxu1 %v10051_v5  ;;  %6881 = vmatprep.mubr.msk.f32.mxu1 %vm10022_vm0, %v10023_v4 }
0x10d8   :  { %8861 = vmatprep.subr.bf16.mxu1 %v10021_v0 }
0x10db   :  { %8863 = vmatpush3.bf16.msra.mxu1 %v10060_v7 }
0x10dc   :  { %8864 = vmatprep.subr.bf16.mxu1 %v10021_v0 }
0x10df   :  { %8866 = vmatpush3.bf16.msra.mxu1 %v10072_v10 }
0x10e0   :  { %8867 = vmatprep.subr.bf16.mxu1 %v10021_v0 }
0x10e3   :  { %8869 = vmatpush3.bf16.msra.mxu1 %v10084_v13 }
0x10e4   :  { %8870 = vmatprep.subr.bf16.mxu1 %v10021_v0 }
0x10e7   :  { %8872 = vmatpush3.bf16.msra.mxu1 %v10096_v16 }
0x10e8   :  { %8873 = vmatprep.subr.bf16.mxu1 %v10021_v0 }
0x10eb   :  { %8875 = vmatpush3.bf16.msra.mxu1 %v10108_v19 }
0x10ec   :  { %8876 = vmatprep.subr.bf16.mxu1 %v10021_v0 }
0x10ef   :  { %8878 = vmatpush3.bf16.msra.mxu1 %v10120_v22 }
0x10f0   :  { %8879 = vmatprep.subr.bf16.mxu1 %v10021_v0 }
0x10f3   :  { %8881 = vmatpush3.bf16.msra.mxu1 %v10132_v25 }
0x10f4   :  { %8906 = vmatprep.subr.bf16.mxu1 %v10021_v0 }
0x11a9   :  { %v1543_v8 = vpop.f32.mrb[18].mxu1 }
0x11aa   :  { %v1547_v9 = vadd.f32 %v4936_v6, %v1543_v8  ;;  %v6813_v11 = vpop.f32.mrb[19].mxu1  ;;  %v4958_v8 = vld [vmem:[%s11641_s0 + $0xf0] sm:$0xff] }
0x11ac   :  { %9931 = vtanh.f32 %v1547_v9 }
0x11b6   :  { %v9932_v12 = vpop.eup %9931 }
0x11b7   :  { %4937 = vst [vmem:[%s11642_s2 + $0x98] sm:$0xff] %v9932_v12  ;;  %6847 = vmatmul.mubr.f32.vlgmr.msra.gmra.mrb[20].mxu0 %v9932_v12 }
0x11b8   :  { %8884 = vmatpush3.bf16.msra.mxu0 %v10051_v5  ;;  %6916 = vmatprep.mubr.msk.f32.mxu0 %vm10022_vm0, %v10023_v4 }
0x11b9   :  { %8885 = vmatprep.subr.bf16.mxu0 %v10021_v0 }
0x11bc   :  { %8887 = vmatpush3.bf16.msra.mxu0 %v10060_v7 }
0x11bd   :  { %8888 = vmatprep.subr.bf16.mxu0 %v10021_v0 }
0x11c0   :  { %8890 = vmatpush3.bf16.msra.mxu0 %v10072_v10 }
0x11c1   :  { %8891 = vmatprep.subr.bf16.mxu0 %v10021_v0 }
0x11c4   :  { %8893 = vmatpush3.bf16.msra.mxu0 %v10084_v13 }
0x11c5   :  { %8894 = vmatprep.subr.bf16.mxu0 %v10021_v0 }
0x11c8   :  { %8896 = vmatpush3.bf16.msra.mxu0 %v10096_v16 }
0x11c9   :  { %8897 = vmatprep.subr.bf16.mxu0 %v10021_v0 }
0x11cc   :  { %8899 = vmatpush3.bf16.msra.mxu0 %v10108_v19 }
0x11cd   :  { %8900 = vmatprep.subr.bf16.mxu0 %v10021_v0 }
0x11d0   :  { %8902 = vmatpush3.bf16.msra.mxu0 %v10120_v22 }
0x11d1   :  { %8903 = vmatprep.subr.bf16.mxu0 %v10021_v0 }
0x11d4   :  { %8905 = vmatpush3.bf16.msra.mxu0 %v10132_v25 }
0x11d5   :  { %8930 = vmatprep.subr.bf16.mxu0 %v10021_v0 }
0x128a   :  { %v1619_v15 = vpop.f32.mrb[20].mxu0 }
0x128b   :  { %v1623_v17 = vadd.f32 %v4938_v14, %v1619_v15  ;;  %v6848_v18 = vpop.f32.mrb[21].mxu0  ;;  %v4960_v15 = vld [vmem:[%s11641_s0 + $0xf8] sm:$0xff] }
0x128d   :  { %9933 = vtanh.f32 %v1623_v17 }
0x1297   :  { %v9934_v20 = vpop.eup %9933 }
0x1298   :  { %4939 = vst [vmem:[%s11642_s2 + $0xa0] sm:$0xff] %v9934_v20  ;;  %6882 = vmatmul.mubr.f32.vlgmr.msra.gmra.mrb[20].mxu1 %v9934_v20 }
0x1299   :  { %8908 = vmatpush3.bf16.msra.mxu1 %v10051_v5  ;;  %6951 = vmatprep.mubr.msk.f32.mxu1 %vm10022_vm0, %v10023_v4 }
0x129a   :  { %8909 = vmatprep.subr.bf16.mxu1 %v10021_v0 }
0x129d   :  { %8911 = vmatpush3.bf16.msra.mxu1 %v10060_v7 }
0x129e   :  { %8912 = vmatprep.subr.bf16.mxu1 %v10021_v0 }
0x12a1   :  { %8914 = vmatpush3.bf16.msra.mxu1 %v10072_v10 }
0x12a2   :  { %8915 = vmatprep.subr.bf16.mxu1 %v10021_v0 }
0x12a5   :  { %8917 = vmatpush3.bf16.msra.mxu1 %v10084_v13 }
0x12a6   :  { %8918 = vmatprep.subr.bf16.mxu1 %v10021_v0 }
0x12a9   :  { %8920 = vmatpush3.bf16.msra.mxu1 %v10096_v16 }
0x12aa   :  { %8921 = vmatprep.subr.bf16.mxu1 %v10021_v0 }
0x12ad   :  { %8923 = vmatpush3.bf16.msra.mxu1 %v10108_v19 }
0x12ae   :  { %8924 = vmatprep.subr.bf16.mxu1 %v10021_v0 }
0x12b1   :  { %8926 = vmatpush3.bf16.msra.mxu1 %v10120_v22 }
0x12b2   :  { %8927 = vmatprep.subr.bf16.mxu1 %v10021_v0 }
0x12b5   :  { %8929 = vmatpush3.bf16.msra.mxu1 %v10132_v25 }
0x12b6   :  { %8954 = vmatprep.subr.bf16.mxu1 %v10021_v0 }
0x136b   :  { %v1695_v23 = vpop.f32.mrb[20].mxu1 }
0x136c   :  { %v1699_v24 = vadd.f32 %v4940_v21, %v1695_v23  ;;  %v6883_v26 = vpop.f32.mrb[21].mxu1  ;;  %v4962_v23 = vld [vmem:[%s11641_s0 + $0x100] sm:$0xff] }
0x136e   :  { %9935 = vtanh.f32 %v1699_v24 }
0x1378   :  { %v9936_v27 = vpop.eup %9935 }
0x1379   :  { %4941 = vst [vmem:[%s11642_s2 + $0xa8] sm:$0xff] %v9936_v27  ;;  %6917 = vmatmul.mubr.f32.vlgmr.msra.gmra.mrb[22].mxu0 %v9936_v27 }
0x137a   :  { %8932 = vmatpush3.bf16.msra.mxu0 %v10051_v5  ;;  %6986 = vmatprep.mubr.msk.f32.mxu0 %vm10022_vm0, %v10023_v4 }
0x137b   :  { %8933 = vmatprep.subr.bf16.mxu0 %v10021_v0 }
0x137e   :  { %8935 = vmatpush3.bf16.msra.mxu0 %v10060_v7 }
0x137f   :  { %8936 = vmatprep.subr.bf16.mxu0 %v10021_v0 }
0x1382   :  { %8938 = vmatpush3.bf16.msra.mxu0 %v10072_v10 }
0x1383   :  { %8939 = vmatprep.subr.bf16.mxu0 %v10021_v0 }
0x1386   :  { %8941 = vmatpush3.bf16.msra.mxu0 %v10084_v13 }
0x1387   :  { %8942 = vmatprep.subr.bf16.mxu0 %v10021_v0 }
0x138a   :  { %8944 = vmatpush3.bf16.msra.mxu0 %v10096_v16 }
0x138b   :  { %8945 = vmatprep.subr.bf16.mxu0 %v10021_v0 }
0x138e   :  { %8947 = vmatpush3.bf16.msra.mxu0 %v10108_v19 }
0x138f   :  { %8948 = vmatprep.subr.bf16.mxu0 %v10021_v0 }
0x1392   :  { %8950 = vmatpush3.bf16.msra.mxu0 %v10120_v22 }
0x1393   :  { %8951 = vmatprep.subr.bf16.mxu0 %v10021_v0 }
0x1396   :  { %8953 = vmatpush3.bf16.msra.mxu0 %v10132_v25 }
0x1397   :  { %8978 = vmatprep.subr.bf16.mxu0 %v10021_v0 }
0x144c   :  { %v1771_v29 = vpop.f32.mrb[22].mxu0 }
0x144d   :  { %v1775_v30 = vadd.f32 %v4942_v28, %v1771_v29  ;;  %v6918_v31 = vpop.f32.mrb[23].mxu0  ;;  %v4964_v29 = vld [vmem:[%s11641_s0 + $0x108] sm:$0xff] }
0x144f   :  { %9937 = vtanh.f32 %v1775_v30 }
0x1459   :  { %v9938_v32 = vpop.eup %9937 }
0x145a   :  { %4943 = vst [vmem:[%s11642_s2 + $0xb0] sm:$0xff] %v9938_v32  ;;  %6952 = vmatmul.mubr.f32.vlgmr.msra.gmra.mrb[22].mxu1 %v9938_v32 }
0x145b   :  { %8956 = vmatpush3.bf16.msra.mxu1 %v10051_v5  ;;  %7021 = vmatprep.mubr.msk.f32.mxu1 %vm10022_vm0, %v10023_v4 }
0x145c   :  { %8957 = vmatprep.subr.bf16.mxu1 %v10021_v0 }
0x145f   :  { %8959 = vmatpush3.bf16.msra.mxu1 %v10060_v7 }
0x1460   :  { %8960 = vmatprep.subr.bf16.mxu1 %v10021_v0 }
0x1463   :  { %8962 = vmatpush3.bf16.msra.mxu1 %v10072_v10 }
0x1464   :  { %8963 = vmatprep.subr.bf16.mxu1 %v10021_v0 }
0x1467   :  { %8965 = vmatpush3.bf16.msra.mxu1 %v10084_v13 }
0x1468   :  { %8966 = vmatprep.subr.bf16.mxu1 %v10021_v0 }
0x146b   :  { %8968 = vmatpush3.bf16.msra.mxu1 %v10096_v16 }
0x146c   :  { %8969 = vmatprep.subr.bf16.mxu1 %v10021_v0 }
0x146f   :  { %8971 = vmatpush3.bf16.msra.mxu1 %v10108_v19 }
0x1470   :  { %8972 = vmatprep.subr.bf16.mxu1 %v10021_v0 }
0x1473   :  { %8974 = vmatpush3.bf16.msra.mxu1 %v10120_v22 }
0x1474   :  { %8975 = vmatprep.subr.bf16.mxu1 %v10021_v0 }
0x1477   :  { %8977 = vmatpush3.bf16.msra.mxu1 %v10132_v25 }
0x1478   :  { %9002 = vmatprep.subr.bf16.mxu1 %v10021_v0 }
0x152d   :  { %v1847_v34 = vpop.f32.mrb[22].mxu1 }
0x152e   :  { %v1851_v35 = vadd.f32 %v4944_v33, %v1847_v34  ;;  %v6953_v36 = vpop.f32.mrb[23].mxu1  ;;  %v4966_v34 = vld [vmem:[%s11641_s0 + $0x110] sm:$0xff] }
0x1530   :  { %9939 = vtanh.f32 %v1851_v35 }
0x153a   :  { %v9940_v37 = vpop.eup %9939 }
0x153b   :  { %4945 = vst [vmem:[%s11642_s2 + $0xb8] sm:$0xff] %v9940_v37  ;;  %6987 = vmatmul.mubr.f32.vlgmr.msra.gmra.mrb[24].mxu0 %v9940_v37 }
0x153c   :  { %8980 = vmatpush3.bf16.msra.mxu0 %v10051_v5  ;;  %7056 = vmatprep.mubr.msk.f32.mxu0 %vm10022_vm0, %v10023_v4 }
0x153d   :  { %8981 = vmatprep.subr.bf16.mxu0 %v10021_v0 }
0x1540   :  { %8983 = vmatpush3.bf16.msra.mxu0 %v10060_v7 }
0x1541   :  { %8984 = vmatprep.subr.bf16.mxu0 %v10021_v0 }
0x1544   :  { %8986 = vmatpush3.bf16.msra.mxu0 %v10072_v10 }
0x1545   :  { %8987 = vmatprep.subr.bf16.mxu0 %v10021_v0 }
0x1548   :  { %8989 = vmatpush3.bf16.msra.mxu0 %v10084_v13 }
0x1549   :  { %8990 = vmatprep.subr.bf16.mxu0 %v10021_v0 }
0x154c   :  { %8992 = vmatpush3.bf16.msra.mxu0 %v10096_v16 }
0x154d   :  { %8993 = vmatprep.subr.bf16.mxu0 %v10021_v0 }
0x1550   :  { %8995 = vmatpush3.bf16.msra.mxu0 %v10108_v19 }
0x1551   :  { %8996 = vmatprep.subr.bf16.mxu0 %v10021_v0 }
0x1554   :  { %8998 = vmatpush3.bf16.msra.mxu0 %v10120_v22 }
0x1555   :  { %8999 = vmatprep.subr.bf16.mxu0 %v10021_v0 }
0x1558   :  { %9001 = vmatpush3.bf16.msra.mxu0 %v10132_v25 }
0x1559   :  { %9026 = vmatprep.subr.bf16.mxu0 %v10021_v0 }
0x160e   :  { %v1923_v39 = vpop.f32.mrb[24].mxu0 }
0x160f   :  { %v1927_v40 = vadd.f32 %v4946_v38, %v1923_v39  ;;  %v6988_v41 = vpop.f32.mrb[25].mxu0  ;;  %v4968_v39 = vld [vmem:[%s11641_s0 + $0x118] sm:$0xff] }
0x1611   :  { %9941 = vtanh.f32 %v1927_v40 }
0x161b   :  { %v9942_v42 = vpop.eup %9941 }
0x161c   :  { %4947 = vst [vmem:[%s11642_s2 + $0xc0] sm:$0xff] %v9942_v42  ;;  %7022 = vmatmul.mubr.f32.vlgmr.msra.gmra.mrb[24].mxu1 %v9942_v42 }
0x161d   :  { %9004 = vmatpush3.bf16.msra.mxu1 %v10051_v5  ;;  %7091 = vmatprep.mubr.msk.f32.mxu1 %vm10022_vm0, %v10023_v4 }
0x161e   :  { %9005 = vmatprep.subr.bf16.mxu1 %v10021_v0 }
0x1621   :  { %9007 = vmatpush3.bf16.msra.mxu1 %v10060_v7 }
0x1622   :  { %9008 = vmatprep.subr.bf16.mxu1 %v10021_v0 }
0x1625   :  { %9010 = vmatpush3.bf16.msra.mxu1 %v10072_v10 }
0x1626   :  { %9011 = vmatprep.subr.bf16.mxu1 %v10021_v0 }
0x1629   :  { %9013 = vmatpush3.bf16.msra.mxu1 %v10084_v13 }
0x162a   :  { %9014 = vmatprep.subr.bf16.mxu1 %v10021_v0 }
0x162d   :  { %9016 = vmatpush3.bf16.msra.mxu1 %v10096_v16 }
0x162e   :  { %9017 = vmatprep.subr.bf16.mxu1 %v10021_v0 }
0x1631   :  { %9019 = vmatpush3.bf16.msra.mxu1 %v10108_v19 }
0x1632   :  { %9020 = vmatprep.subr.bf16.mxu1 %v10021_v0 }
0x1635   :  { %9022 = vmatpush3.bf16.msra.mxu1 %v10120_v22 }
0x1636   :  { %9023 = vmatprep.subr.bf16.mxu1 %v10021_v0 }
0x1639   :  { %9025 = vmatpush3.bf16.msra.mxu1 %v10132_v25 }
0x163a   :  { %9050 = vmatprep.subr.bf16.mxu1 %v10021_v0 }
0x16ef   :  { %v1999_v44 = vpop.f32.mrb[24].mxu1 }
0x16f0   :  { %v2003_v45 = vadd.f32 %v4948_v43, %v1999_v44  ;;  %v7023_v46 = vpop.f32.mrb[25].mxu1  ;;  %v4970_v44 = vld [vmem:[%s11641_s0 + $0x120] sm:$0xff] }
0x16f2   :  { %9943 = vtanh.f32 %v2003_v45 }
0x16fc   :  { %v9944_v47 = vpop.eup %9943 }
0x16fd   :  { %4949 = vst [vmem:[%s11642_s2 + $0xc8] sm:$0xff] %v9944_v47  ;;  %7057 = vmatmul.mubr.f32.vlgmr.msra.gmra.mrb[26].mxu0 %v9944_v47 }
0x16fe   :  { %9028 = vmatpush3.bf16.msra.mxu0 %v10051_v5  ;;  %7126 = vmatprep.mubr.msk.f32.mxu0 %vm10022_vm0, %v10023_v4 }
0x16ff   :  { %9029 = vmatprep.subr.bf16.mxu0 %v10021_v0 }
0x1702   :  { %9031 = vmatpush3.bf16.msra.mxu0 %v10060_v7 }
0x1703   :  { %9032 = vmatprep.subr.bf16.mxu0 %v10021_v0 }
0x1706   :  { %9034 = vmatpush3.bf16.msra.mxu0 %v10072_v10 }
0x1707   :  { %9035 = vmatprep.subr.bf16.mxu0 %v10021_v0 }
0x170a   :  { %9037 = vmatpush3.bf16.msra.mxu0 %v10084_v13 }
0x170b   :  { %9038 = vmatprep.subr.bf16.mxu0 %v10021_v0 }
0x170e   :  { %9040 = vmatpush3.bf16.msra.mxu0 %v10096_v16 }
0x170f   :  { %9041 = vmatprep.subr.bf16.mxu0 %v10021_v0 }
0x1712   :  { %9043 = vmatpush3.bf16.msra.mxu0 %v10108_v19 }
0x1713   :  { %9044 = vmatprep.subr.bf16.mxu0 %v10021_v0 }
0x1716   :  { %9046 = vmatpush3.bf16.msra.mxu0 %v10120_v22 }
0x1717   :  { %9047 = vmatprep.subr.bf16.mxu0 %v10021_v0 }
0x171a   :  { %9049 = vmatpush3.bf16.msra.mxu0 %v10132_v25 }
0x171b   :  { %9074 = vmatprep.subr.bf16.mxu0 %v10021_v0 }
0x17d0   :  { %v2075_v49 = vpop.f32.mrb[26].mxu0 }
0x17d1   :  { %v2079_v50 = vadd.f32 %v4950_v48, %v2075_v49  ;;  %v7058_v51 = vpop.f32.mrb[27].mxu0  ;;  %v4972_v49 = vld [vmem:[%s11641_s0 + $0x128] sm:$0xff] }
0x17d3   :  { %9945 = vtanh.f32 %v2079_v50 }
0x17dd   :  { %v9946_v52 = vpop.eup %9945 }
0x17de   :  { %4951 = vst [vmem:[%s11642_s2 + $0xd0] sm:$0xff] %v9946_v52  ;;  %7092 = vmatmul.mubr.f32.vlgmr.msra.gmra.mrb[26].mxu1 %v9946_v52 }
0x17df   :  { %9052 = vmatpush3.bf16.msra.mxu1 %v10051_v5  ;;  %7161 = vmatprep.mubr.msk.f32.mxu1 %vm10022_vm0, %v10023_v4 }
0x17e0   :  { %9053 = vmatprep.subr.bf16.mxu1 %v10021_v0 }
0x17e3   :  { %9055 = vmatpush3.bf16.msra.mxu1 %v10060_v7 }
0x17e4   :  { %9056 = vmatprep.subr.bf16.mxu1 %v10021_v0 }
0x17e7   :  { %9058 = vmatpush3.bf16.msra.mxu1 %v10072_v10 }
0x17e8   :  { %9059 = vmatprep.subr.bf16.mxu1 %v10021_v0 }
0x17eb   :  { %9061 = vmatpush3.bf16.msra.mxu1 %v10084_v13 }
0x17ec   :  { %9062 = vmatprep.subr.bf16.mxu1 %v10021_v0 }
0x17ef   :  { %9064 = vmatpush3.bf16.msra.mxu1 %v10096_v16 }
0x17f0   :  { %9065 = vmatprep.subr.bf16.mxu1 %v10021_v0 }
0x17f3   :  { %9067 = vmatpush3.bf16.msra.mxu1 %v10108_v19 }
0x17f4   :  { %9068 = vmatprep.subr.bf16.mxu1 %v10021_v0 }
0x17f7   :  { %9070 = vmatpush3.bf16.msra.mxu1 %v10120_v22 }
0x17f8   :  { %9071 = vmatprep.subr.bf16.mxu1 %v10021_v0 }
0x17fb   :  { %9073 = vmatpush3.bf16.msra.mxu1 %v10132_v25 }
0x17fc   :  { %9098 = vmatprep.subr.bf16.mxu1 %v10021_v0 }
0x18b1   :  { %v2151_v54 = vpop.f32.mrb[26].mxu1 }
0x18b2   :  { %v2155_v55 = vadd.f32 %v4952_v53, %v2151_v54  ;;  %v7093_v56 = vpop.f32.mrb[27].mxu1  ;;  %v4974_v54 = vld [vmem:[%s11641_s0 + $0x130] sm:$0xff] }
0x18b4   :  { %9947 = vtanh.f32 %v2155_v55 }
0x18be   :  { %v9948_v57 = vpop.eup %9947 }
0x18bf   :  { %4953 = vst [vmem:[%s11642_s2 + $0xd8] sm:$0xff] %v9948_v57  ;;  %7127 = vmatmul.mubr.f32.vlgmr.msra.gmra.mrb[28].mxu0 %v9948_v57 }
0x18c0   :  { %9076 = vmatpush3.bf16.msra.mxu0 %v10051_v5  ;;  %7196 = vmatprep.mubr.msk.f32.mxu0 %vm10022_vm0, %v10023_v4 }
0x18c1   :  { %9077 = vmatprep.subr.bf16.mxu0 %v10021_v0 }
0x18c4   :  { %9079 = vmatpush3.bf16.msra.mxu0 %v10060_v7 }
0x18c5   :  { %9080 = vmatprep.subr.bf16.mxu0 %v10021_v0 }
0x18c8   :  { %9082 = vmatpush3.bf16.msra.mxu0 %v10072_v10 }
0x18c9   :  { %9083 = vmatprep.subr.bf16.mxu0 %v10021_v0 }
0x18cc   :  { %9085 = vmatpush3.bf16.msra.mxu0 %v10084_v13 }
0x18cd   :  { %9086 = vmatprep.subr.bf16.mxu0 %v10021_v0 }
0x18d0   :  { %9088 = vmatpush3.bf16.msra.mxu0 %v10096_v16 }
0x18d1   :  { %9089 = vmatprep.subr.bf16.mxu0 %v10021_v0 }
0x18d4   :  { %9091 = vmatpush3.bf16.msra.mxu0 %v10108_v19 }
0x18d5   :  { %9092 = vmatprep.subr.bf16.mxu0 %v10021_v0 }
0x18d8   :  { %9094 = vmatpush3.bf16.msra.mxu0 %v10120_v22 }
0x18d9   :  { %9095 = vmatprep.subr.bf16.mxu0 %v10021_v0 }
0x18dc   :  { %9097 = vmatpush3.bf16.msra.mxu0 %v10132_v25 }
0x18dd   :  { %9122 = vmatprep.subr.bf16.mxu0 %v10021_v0 }
0x1992   :  { %v2227_v59 = vpop.f32.mrb[28].mxu0 }
0x1993   :  { %v2231_v60 = vadd.f32 %v4954_v58, %v2227_v59  ;;  %v7128_v61 = vpop.f32.mrb[29].mxu0  ;;  %v4976_v59 = vld [vmem:[%s11641_s0 + $0x138] sm:$0xff] }
0x1995   :  { %9949 = vtanh.f32 %v2231_v60 }
0x199f   :  { %v9950_v62 = vpop.eup %9949 }
0x19a0   :  { %4955 = vst [vmem:[%s11642_s2 + $0xe0] sm:$0xff] %v9950_v62  ;;  %7162 = vmatmul.mubr.f32.vlgmr.msra.gmra.mrb[28].mxu1 %v9950_v62 }
0x19a1   :  { %9100 = vmatpush3.bf16.msra.mxu1 %v10051_v5  ;;  %7231 = vmatprep.mubr.msk.f32.mxu1 %vm10022_vm0, %v10023_v4 }
0x19a2   :  { %9101 = vmatprep.subr.bf16.mxu1 %v10021_v0 }
0x19a5   :  { %9103 = vmatpush3.bf16.msra.mxu1 %v10060_v7 }
0x19a6   :  { %9104 = vmatprep.subr.bf16.mxu1 %v10021_v0 }
0x19a9   :  { %9106 = vmatpush3.bf16.msra.mxu1 %v10072_v10 }
0x19aa   :  { %9107 = vmatprep.subr.bf16.mxu1 %v10021_v0 }
0x19ad   :  { %9109 = vmatpush3.bf16.msra.mxu1 %v10084_v13 }
0x19ae   :  { %9110 = vmatprep.subr.bf16.mxu1 %v10021_v0 }
0x19b1   :  { %9112 = vmatpush3.bf16.msra.mxu1 %v10096_v16 }
0x19b2   :  { %9113 = vmatprep.subr.bf16.mxu1 %v10021_v0 }
0x19b5   :  { %9115 = vmatpush3.bf16.msra.mxu1 %v10108_v19 }
0x19b6   :  { %9116 = vmatprep.subr.bf16.mxu1 %v10021_v0 }
0x19b9   :  { %9118 = vmatpush3.bf16.msra.mxu1 %v10120_v22 }
0x19ba   :  { %9119 = vmatprep.subr.bf16.mxu1 %v10021_v0 }
0x19bd   :  { %9121 = vmatpush3.bf16.msra.mxu1 %v10132_v25 }
0x19be   :  { %9146 = vmatprep.subr.bf16.mxu1 %v10021_v0 }
0x1a73   :  { %v2303_v1 = vpop.f32.mrb[28].mxu1 }
0x1a74   :  { %v2307_v2 = vadd.f32 %v4956_v63, %v2303_v1  ;;  %v7163_v3 = vpop.f32.mrb[29].mxu1  ;;  %v4978_v1 = vld [vmem:[%s11641_s0 + $0x140] sm:$0xff] }
0x1a76   :  { %9951 = vtanh.f32 %v2307_v2 }
0x1a80   :  { %v9952_v6 = vpop.eup %9951 }
0x1a81   :  { %4957 = vst [vmem:[%s11642_s2 + $0xe8] sm:$0xff] %v9952_v6  ;;  %7197 = vmatmul.mubr.f32.vlgmr.msra.gmra.mrb[30].mxu0 %v9952_v6 }
0x1a82   :  { %9124 = vmatpush3.bf16.msra.mxu0 %v10051_v5  ;;  %7266 = vmatprep.mubr.msk.f32.mxu0 %vm10022_vm0, %v10023_v4 }
0x1a83   :  { %9125 = vmatprep.subr.bf16.mxu0 %v10021_v0 }
0x1a86   :  { %9127 = vmatpush3.bf16.msra.mxu0 %v10060_v7 }
0x1a87   :  { %9128 = vmatprep.subr.bf16.mxu0 %v10021_v0 }
0x1a8a   :  { %9130 = vmatpush3.bf16.msra.mxu0 %v10072_v10 }
0x1a8b   :  { %9131 = vmatprep.subr.bf16.mxu0 %v10021_v0 }
0x1a8e   :  { %9133 = vmatpush3.bf16.msra.mxu0 %v10084_v13 }
0x1a8f   :  { %9134 = vmatprep.subr.bf16.mxu0 %v10021_v0 }
0x1a92   :  { %9136 = vmatpush3.bf16.msra.mxu0 %v10096_v16 }
0x1a93   :  { %9137 = vmatprep.subr.bf16.mxu0 %v10021_v0 }
0x1a96   :  { %9139 = vmatpush3.bf16.msra.mxu0 %v10108_v19 }
0x1a97   :  { %9140 = vmatprep.subr.bf16.mxu0 %v10021_v0 }
0x1a9a   :  { %9142 = vmatpush3.bf16.msra.mxu0 %v10120_v22 }
0x1a9b   :  { %9143 = vmatprep.subr.bf16.mxu0 %v10021_v0 }
0x1a9e   :  { %9145 = vmatpush3.bf16.msra.mxu0 %v10132_v25 }
0x1a9f   :  { %9170 = vmatprep.subr.bf16.mxu0 %v10021_v0 }
0x1b54   :  { %v2379_v9 = vpop.f32.mrb[30].mxu0 }
0x1b55   :  { %v2383_v11 = vadd.f32 %v4958_v8, %v2379_v9  ;;  %v7198_v12 = vpop.f32.mrb[31].mxu0  ;;  %v4980_v9 = vld [vmem:[%s11641_s0 + $0x148] sm:$0xff] }
0x1b57   :  { %9953 = vtanh.f32 %v2383_v11 }
0x1b61   :  { %v9954_v14 = vpop.eup %9953 }
0x1b62   :  { %4959 = vst [vmem:[%s11642_s2 + $0xf0] sm:$0xff] %v9954_v14  ;;  %7232 = vmatmul.mubr.f32.vlgmr.msra.gmra.mrb[30].mxu1 %v9954_v14 }
0x1b63   :  { %9148 = vmatpush3.bf16.msra.mxu1 %v10051_v5  ;;  %7301 = vmatprep.mubr.msk.f32.mxu1 %vm10022_vm0, %v10023_v4 }
0x1b64   :  { %9149 = vmatprep.subr.bf16.mxu1 %v10021_v0 }
0x1b67   :  { %9151 = vmatpush3.bf16.msra.mxu1 %v10060_v7 }
0x1b68   :  { %9152 = vmatprep.subr.bf16.mxu1 %v10021_v0 }
0x1b6b   :  { %9154 = vmatpush3.bf16.msra.mxu1 %v10072_v10 }
0x1b6c   :  { %9155 = vmatprep.subr.bf16.mxu1 %v10021_v0 }
0x1b6f   :  { %9157 = vmatpush3.bf16.msra.mxu1 %v10084_v13 }
0x1b70   :  { %9158 = vmatprep.subr.bf16.mxu1 %v10021_v0 }
0x1b73   :  { %9160 = vmatpush3.bf16.msra.mxu1 %v10096_v16 }
0x1b74   :  { %9161 = vmatprep.subr.bf16.mxu1 %v10021_v0 }
0x1b77   :  { %9163 = vmatpush3.bf16.msra.mxu1 %v10108_v19 }
0x1b78   :  { %9164 = vmatprep.subr.bf16.mxu1 %v10021_v0 }
0x1b7b   :  { %9166 = vmatpush3.bf16.msra.mxu1 %v10120_v22 }
0x1b7c   :  { %9167 = vmatprep.subr.bf16.mxu1 %v10021_v0 }
0x1b7f   :  { %9169 = vmatpush3.bf16.msra.mxu1 %v10132_v25 }
0x1b80   :  { %9194 = vmatprep.subr.bf16.mxu1 %v10021_v0 }
0x1c35   :  { %v2455_v17 = vpop.f32.mrb[30].mxu1 }
0x1c36   :  { %v2459_v18 = vadd.f32 %v4960_v15, %v2455_v17  ;;  %v7233_v20 = vpop.f32.mrb[31].mxu1  ;;  %v4982_v17 = vld [vmem:[%s11641_s0 + $0x150] sm:$0xff] }
0x1c38   :  { %9955 = vtanh.f32 %v2459_v18 }
0x1c42   :  { %v9956_v21 = vpop.eup %9955 }
0x1c43   :  { %4961 = vst [vmem:[%s11642_s2 + $0xf8] sm:$0xff] %v9956_v21  ;;  %7267 = vmatmul.mubr.f32.vlgmr.msra.gmra.mrb[32].mxu0 %v9956_v21 }
0x1c44   :  { %9172 = vmatpush3.bf16.msra.mxu0 %v10051_v5  ;;  %7336 = vmatprep.mubr.msk.f32.mxu0 %vm10022_vm0, %v10023_v4 }
0x1c45   :  { %9173 = vmatprep.subr.bf16.mxu0 %v10021_v0 }
0x1c48   :  { %9175 = vmatpush3.bf16.msra.mxu0 %v10060_v7 }
0x1c49   :  { %9176 = vmatprep.subr.bf16.mxu0 %v10021_v0 }
0x1c4c   :  { %9178 = vmatpush3.bf16.msra.mxu0 %v10072_v10 }
0x1c4d   :  { %9179 = vmatprep.subr.bf16.mxu0 %v10021_v0 }
0x1c50   :  { %9181 = vmatpush3.bf16.msra.mxu0 %v10084_v13 }
0x1c51   :  { %9182 = vmatprep.subr.bf16.mxu0 %v10021_v0 }
0x1c54   :  { %9184 = vmatpush3.bf16.msra.mxu0 %v10096_v16 }
0x1c55   :  { %9185 = vmatprep.subr.bf16.mxu0 %v10021_v0 }
0x1c58   :  { %9187 = vmatpush3.bf16.msra.mxu0 %v10108_v19 }
0x1c59   :  { %9188 = vmatprep.subr.bf16.mxu0 %v10021_v0 }
0x1c5c   :  { %9190 = vmatpush3.bf16.msra.mxu0 %v10120_v22 }
0x1c5d   :  { %9191 = vmatprep.subr.bf16.mxu0 %v10021_v0 }
0x1c60   :  { %9193 = vmatpush3.bf16.msra.mxu0 %v10132_v25 }
0x1c61   :  { %9218 = vmatprep.subr.bf16.mxu0 %v10021_v0 }
0x1d16   :  { %v2531_v24 = vpop.f32.mrb[32].mxu0 }
0x1d17   :  { %v2535_v26 = vadd.f32 %v4962_v23, %v2531_v24  ;;  %v7268_v27 = vpop.f32.mrb[33].mxu0  ;;  %v4984_v24 = vld [vmem:[%s11641_s0 + $0x158] sm:$0xff] }
0x1d19   :  { %9957 = vtanh.f32 %v2535_v26 }
0x1d23   :  { %v9958_v28 = vpop.eup %9957 }
0x1d24   :  { %4963 = vst [vmem:[%s11642_s2 + $0x100] sm:$0xff] %v9958_v28  ;;  %7302 = vmatmul.mubr.f32.vlgmr.msra.gmra.mrb[32].mxu1 %v9958_v28 }
0x1d25   :  { %9196 = vmatpush3.bf16.msra.mxu1 %v10051_v5  ;;  %7371 = vmatprep.mubr.msk.f32.mxu1 %vm10022_vm0, %v10023_v4 }
0x1d26   :  { %9197 = vmatprep.subr.bf16.mxu1 %v10021_v0 }
0x1d29   :  { %9199 = vmatpush3.bf16.msra.mxu1 %v10060_v7 }
0x1d2a   :  { %9200 = vmatprep.subr.bf16.mxu1 %v10021_v0 }
0x1d2d   :  { %9202 = vmatpush3.bf16.msra.mxu1 %v10072_v10 }
0x1d2e   :  { %9203 = vmatprep.subr.bf16.mxu1 %v10021_v0 }
0x1d31   :  { %9205 = vmatpush3.bf16.msra.mxu1 %v10084_v13 }
0x1d32   :  { %9206 = vmatprep.subr.bf16.mxu1 %v10021_v0 }
0x1d35   :  { %9208 = vmatpush3.bf16.msra.mxu1 %v10096_v16 }
0x1d36   :  { %9209 = vmatprep.subr.bf16.mxu1 %v10021_v0 }
0x1d39   :  { %9211 = vmatpush3.bf16.msra.mxu1 %v10108_v19 }
0x1d3a   :  { %9212 = vmatprep.subr.bf16.mxu1 %v10021_v0 }
0x1d3d   :  { %9214 = vmatpush3.bf16.msra.mxu1 %v10120_v22 }
0x1d3e   :  { %9215 = vmatprep.subr.bf16.mxu1 %v10021_v0 }
0x1d41   :  { %9217 = vmatpush3.bf16.msra.mxu1 %v10132_v25 }
0x1d42   :  { %9242 = vmatprep.subr.bf16.mxu1 %v10021_v0 }
0x1df7   :  { %v2607_v30 = vpop.f32.mrb[32].mxu1 }
0x1df8   :  { %v2611_v31 = vadd.f32 %v4964_v29, %v2607_v30  ;;  %v7303_v32 = vpop.f32.mrb[33].mxu1  ;;  %v4986_v30 = vld [vmem:[%s11641_s0 + $0x160] sm:$0xff] }
0x1dfa   :  { %9959 = vtanh.f32 %v2611_v31 }
0x1e04   :  { %v9960_v33 = vpop.eup %9959 }
0x1e05   :  { %4965 = vst [vmem:[%s11642_s2 + $0x108] sm:$0xff] %v9960_v33  ;;  %7337 = vmatmul.mubr.f32.vlgmr.msra.gmra.mrb[34].mxu0 %v9960_v33 }
0x1e06   :  { %9220 = vmatpush3.bf16.msra.mxu0 %v10051_v5  ;;  %7406 = vmatprep.mubr.msk.f32.mxu0 %vm10022_vm0, %v10023_v4 }
0x1e07   :  { %9221 = vmatprep.subr.bf16.mxu0 %v10021_v0 }
0x1e0a   :  { %9223 = vmatpush3.bf16.msra.mxu0 %v10060_v7 }
0x1e0b   :  { %9224 = vmatprep.subr.bf16.mxu0 %v10021_v0 }
0x1e0e   :  { %9226 = vmatpush3.bf16.msra.mxu0 %v10072_v10 }
0x1e0f   :  { %9227 = vmatprep.subr.bf16.mxu0 %v10021_v0 }
0x1e12   :  { %9229 = vmatpush3.bf16.msra.mxu0 %v10084_v13 }
0x1e13   :  { %9230 = vmatprep.subr.bf16.mxu0 %v10021_v0 }
0x1e16   :  { %9232 = vmatpush3.bf16.msra.mxu0 %v10096_v16 }
0x1e17   :  { %9233 = vmatprep.subr.bf16.mxu0 %v10021_v0 }
0x1e1a   :  { %9235 = vmatpush3.bf16.msra.mxu0 %v10108_v19 }
0x1e1b   :  { %9236 = vmatprep.subr.bf16.mxu0 %v10021_v0 }
0x1e1e   :  { %9238 = vmatpush3.bf16.msra.mxu0 %v10120_v22 }
0x1e1f   :  { %9239 = vmatprep.subr.bf16.mxu0 %v10021_v0 }
0x1e22   :  { %9241 = vmatpush3.bf16.msra.mxu0 %v10132_v25 }
0x1e23   :  { %9266 = vmatprep.subr.bf16.mxu0 %v10021_v0 }
0x1ed8   :  { %v2683_v35 = vpop.f32.mrb[34].mxu0 }
0x1ed9   :  { %v2687_v36 = vadd.f32 %v4966_v34, %v2683_v35  ;;  %v7338_v37 = vpop.f32.mrb[35].mxu0  ;;  %v4988_v35 = vld [vmem:[%s11641_s0 + $0x168] sm:$0xff] }
0x1edb   :  { %9961 = vtanh.f32 %v2687_v36 }
0x1ee5   :  { %v9962_v38 = vpop.eup %9961 }
0x1ee6   :  { %4967 = vst [vmem:[%s11642_s2 + $0x110] sm:$0xff] %v9962_v38  ;;  %7372 = vmatmul.mubr.f32.vlgmr.msra.gmra.mrb[34].mxu1 %v9962_v38 }
0x1ee7   :  { %9244 = vmatpush3.bf16.msra.mxu1 %v10051_v5  ;;  %7441 = vmatprep.mubr.msk.f32.mxu1 %vm10022_vm0, %v10023_v4 }
0x1ee8   :  { %9245 = vmatprep.subr.bf16.mxu1 %v10021_v0 }
0x1eeb   :  { %9247 = vmatpush3.bf16.msra.mxu1 %v10060_v7 }
0x1eec   :  { %9248 = vmatprep.subr.bf16.mxu1 %v10021_v0 }
0x1eef   :  { %9250 = vmatpush3.bf16.msra.mxu1 %v10072_v10 }
0x1ef0   :  { %9251 = vmatprep.subr.bf16.mxu1 %v10021_v0 }
0x1ef3   :  { %9253 = vmatpush3.bf16.msra.mxu1 %v10084_v13 }
0x1ef4   :  { %9254 = vmatprep.subr.bf16.mxu1 %v10021_v0 }
0x1ef7   :  { %9256 = vmatpush3.bf16.msra.mxu1 %v10096_v16 }
0x1ef8   :  { %9257 = vmatprep.subr.bf16.mxu1 %v10021_v0 }
0x1efb   :  { %9259 = vmatpush3.bf16.msra.mxu1 %v10108_v19 }
0x1efc   :  { %9260 = vmatprep.subr.bf16.mxu1 %v10021_v0 }
0x1eff   :  { %9262 = vmatpush3.bf16.msra.mxu1 %v10120_v22 }
0x1f00   :  { %9263 = vmatprep.subr.bf16.mxu1 %v10021_v0 }
0x1f03   :  { %9265 = vmatpush3.bf16.msra.mxu1 %v10132_v25 }
0x1f04   :  { %9290 = vmatprep.subr.bf16.mxu1 %v10021_v0 }
0x1fb9   :  { %v2759_v40 = vpop.f32.mrb[34].mxu1 }
0x1fba   :  { %v2763_v41 = vadd.f32 %v4968_v39, %v2759_v40  ;;  %v7373_v42 = vpop.f32.mrb[35].mxu1  ;;  %v4990_v40 = vld [vmem:[%s11641_s0 + $0x170] sm:$0xff] }
0x1fbc   :  { %9963 = vtanh.f32 %v2763_v41 }
0x1fc6   :  { %v9964_v43 = vpop.eup %9963 }
0x1fc7   :  { %4969 = vst [vmem:[%s11642_s2 + $0x118] sm:$0xff] %v9964_v43  ;;  %7407 = vmatmul.mubr.f32.vlgmr.msra.gmra.mrb[36].mxu0 %v9964_v43 }
0x1fc8   :  { %9268 = vmatpush3.bf16.msra.mxu0 %v10051_v5  ;;  %7476 = vmatprep.mubr.msk.f32.mxu0 %vm10022_vm0, %v10023_v4 }
0x1fc9   :  { %9269 = vmatprep.subr.bf16.mxu0 %v10021_v0 }
0x1fcc   :  { %9271 = vmatpush3.bf16.msra.mxu0 %v10060_v7 }
0x1fcd   :  { %9272 = vmatprep.subr.bf16.mxu0 %v10021_v0 }
0x1fd0   :  { %9274 = vmatpush3.bf16.msra.mxu0 %v10072_v10 }
0x1fd1   :  { %9275 = vmatprep.subr.bf16.mxu0 %v10021_v0 }
0x1fd4   :  { %9277 = vmatpush3.bf16.msra.mxu0 %v10084_v13 }
0x1fd5   :  { %9278 = vmatprep.subr.bf16.mxu0 %v10021_v0 }
0x1fd8   :  { %9280 = vmatpush3.bf16.msra.mxu0 %v10096_v16 }
0x1fd9   :  { %9281 = vmatprep.subr.bf16.mxu0 %v10021_v0 }
0x1fdc   :  { %9283 = vmatpush3.bf16.msra.mxu0 %v10108_v19 }
0x1fdd   :  { %9284 = vmatprep.subr.bf16.mxu0 %v10021_v0 }
0x1fe0   :  { %9286 = vmatpush3.bf16.msra.mxu0 %v10120_v22 }
0x1fe1   :  { %9287 = vmatprep.subr.bf16.mxu0 %v10021_v0 }
0x1fe4   :  { %9289 = vmatpush3.bf16.msra.mxu0 %v10132_v25 }
0x1fe5   :  { %9314 = vmatprep.subr.bf16.mxu0 %v10021_v0 }
0x209a   :  { %v2835_v45 = vpop.f32.mrb[36].mxu0 }
0x209b   :  { %v2839_v46 = vadd.f32 %v4970_v44, %v2835_v45  ;;  %v7408_v47 = vpop.f32.mrb[37].mxu0  ;;  %v4992_v45 = vld [vmem:[%s11641_s0 + $0x178] sm:$0xff] }
0x209d   :  { %9965 = vtanh.f32 %v2839_v46 }
0x20a7   :  { %v9966_v48 = vpop.eup %9965 }
0x20a8   :  { %4971 = vst [vmem:[%s11642_s2 + $0x120] sm:$0xff] %v9966_v48  ;;  %7442 = vmatmul.mubr.f32.vlgmr.msra.gmra.mrb[36].mxu1 %v9966_v48 }
0x20a9   :  { %9292 = vmatpush3.bf16.msra.mxu1 %v10051_v5  ;;  %7511 = vmatprep.mubr.msk.f32.mxu1 %vm10022_vm0, %v10023_v4 }
0x20aa   :  { %9293 = vmatprep.subr.bf16.mxu1 %v10021_v0 }
0x20ad   :  { %9295 = vmatpush3.bf16.msra.mxu1 %v10060_v7 }
0x20ae   :  { %9296 = vmatprep.subr.bf16.mxu1 %v10021_v0 }
0x20b1   :  { %9298 = vmatpush3.bf16.msra.mxu1 %v10072_v10 }
0x20b2   :  { %9299 = vmatprep.subr.bf16.mxu1 %v10021_v0 }
0x20b5   :  { %9301 = vmatpush3.bf16.msra.mxu1 %v10084_v13 }
0x20b6   :  { %9302 = vmatprep.subr.bf16.mxu1 %v10021_v0 }
0x20b9   :  { %9304 = vmatpush3.bf16.msra.mxu1 %v10096_v16 }
0x20ba   :  { %9305 = vmatprep.subr.bf16.mxu1 %v10021_v0 }
0x20bd   :  { %9307 = vmatpush3.bf16.msra.mxu1 %v10108_v19 }
0x20be   :  { %9308 = vmatprep.subr.bf16.mxu1 %v10021_v0 }
0x20c1   :  { %9310 = vmatpush3.bf16.msra.mxu1 %v10120_v22 }
0x20c2   :  { %9311 = vmatprep.subr.bf16.mxu1 %v10021_v0 }
0x20c5   :  { %9313 = vmatpush3.bf16.msra.mxu1 %v10132_v25 }
0x20c6   :  { %9338 = vmatprep.subr.bf16.mxu1 %v10021_v0 }
0x217b   :  { %v2911_v50 = vpop.f32.mrb[36].mxu1 }
0x217c   :  { %v2915_v51 = vadd.f32 %v4972_v49, %v2911_v50  ;;  %v7443_v52 = vpop.f32.mrb[37].mxu1  ;;  %v4994_v50 = vld [vmem:[%s11641_s0 + $0x180] sm:$0xff] }
0x217e   :  { %9967 = vtanh.f32 %v2915_v51 }
0x2188   :  { %v9968_v53 = vpop.eup %9967 }
0x2189   :  { %4973 = vst [vmem:[%s11642_s2 + $0x128] sm:$0xff] %v9968_v53  ;;  %7477 = vmatmul.mubr.f32.vlgmr.msra.gmra.mrb[38].mxu0 %v9968_v53 }
0x218a   :  { %9316 = vmatpush3.bf16.msra.mxu0 %v10051_v5  ;;  %7546 = vmatprep.mubr.msk.f32.mxu0 %vm10022_vm0, %v10023_v4 }
0x218b   :  { %9317 = vmatprep.subr.bf16.mxu0 %v10021_v0 }
0x218e   :  { %9319 = vmatpush3.bf16.msra.mxu0 %v10060_v7 }
0x218f   :  { %9320 = vmatprep.subr.bf16.mxu0 %v10021_v0 }
0x2192   :  { %9322 = vmatpush3.bf16.msra.mxu0 %v10072_v10 }
0x2193   :  { %9323 = vmatprep.subr.bf16.mxu0 %v10021_v0 }
0x2196   :  { %9325 = vmatpush3.bf16.msra.mxu0 %v10084_v13 }
0x2197   :  { %9326 = vmatprep.subr.bf16.mxu0 %v10021_v0 }
0x219a   :  { %9328 = vmatpush3.bf16.msra.mxu0 %v10096_v16 }
0x219b   :  { %9329 = vmatprep.subr.bf16.mxu0 %v10021_v0 }
0x219e   :  { %9331 = vmatpush3.bf16.msra.mxu0 %v10108_v19 }
0x219f   :  { %9332 = vmatprep.subr.bf16.mxu0 %v10021_v0 }
0x21a2   :  { %9334 = vmatpush3.bf16.msra.mxu0 %v10120_v22 }
0x21a3   :  { %9335 = vmatprep.subr.bf16.mxu0 %v10021_v0 }
0x21a6   :  { %9337 = vmatpush3.bf16.msra.mxu0 %v10132_v25 }
0x21a7   :  { %9362 = vmatprep.subr.bf16.mxu0 %v10021_v0 }
0x225c   :  { %v2987_v55 = vpop.f32.mrb[38].mxu0 }
0x225d   :  { %v2991_v56 = vadd.f32 %v4974_v54, %v2987_v55  ;;  %v7478_v57 = vpop.f32.mrb[39].mxu0  ;;  %v4996_v55 = vld [vmem:[%s11641_s0 + $0x188] sm:$0xff] }
0x225f   :  { %9969 = vtanh.f32 %v2991_v56 }
0x2269   :  { %v9970_v58 = vpop.eup %9969 }
0x226a   :  { %4975 = vst [vmem:[%s11642_s2 + $0x130] sm:$0xff] %v9970_v58  ;;  %7512 = vmatmul.mubr.f32.vlgmr.msra.gmra.mrb[38].mxu1 %v9970_v58 }
0x226b   :  { %9340 = vmatpush3.bf16.msra.mxu1 %v10051_v5  ;;  %7581 = vmatprep.mubr.msk.f32.mxu1 %vm10022_vm0, %v10023_v4 }
0x226c   :  { %9341 = vmatprep.subr.bf16.mxu1 %v10021_v0 }
0x226f   :  { %9343 = vmatpush3.bf16.msra.mxu1 %v10060_v7 }
0x2270   :  { %9344 = vmatprep.subr.bf16.mxu1 %v10021_v0 }
0x2273   :  { %9346 = vmatpush3.bf16.msra.mxu1 %v10072_v10 }
0x2274   :  { %9347 = vmatprep.subr.bf16.mxu1 %v10021_v0 }
0x2277   :  { %9349 = vmatpush3.bf16.msra.mxu1 %v10084_v13 }
0x2278   :  { %9350 = vmatprep.subr.bf16.mxu1 %v10021_v0 }
0x227b   :  { %9352 = vmatpush3.bf16.msra.mxu1 %v10096_v16 }
0x227c   :  { %9353 = vmatprep.subr.bf16.mxu1 %v10021_v0 }
0x227f   :  { %9355 = vmatpush3.bf16.msra.mxu1 %v10108_v19 }
0x2280   :  { %9356 = vmatprep.subr.bf16.mxu1 %v10021_v0 }
0x2283   :  { %9358 = vmatpush3.bf16.msra.mxu1 %v10120_v22 }
0x2284   :  { %9359 = vmatprep.subr.bf16.mxu1 %v10021_v0 }
0x2287   :  { %9361 = vmatpush3.bf16.msra.mxu1 %v10132_v25 }
0x2288   :  { %9386 = vmatprep.subr.bf16.mxu1 %v10021_v0 }
0x233d   :  { %v3063_v60 = vpop.f32.mrb[38].mxu1 }
0x233e   :  { %v3067_v61 = vadd.f32 %v4976_v59, %v3063_v60  ;;  %v7513_v62 = vpop.f32.mrb[39].mxu1  ;;  %v4998_v60 = vld [vmem:[%s11641_s0 + $0x190] sm:$0xff] }
0x2340   :  { %9971 = vtanh.f32 %v3067_v61 }
0x234a   :  { %v9972_v63 = vpop.eup %9971 }
0x234b   :  { %4977 = vst [vmem:[%s11642_s2 + $0x138] sm:$0xff] %v9972_v63  ;;  %7547 = vmatmul.mubr.f32.vlgmr.msra.gmra.mrb[40].mxu0 %v9972_v63 }
0x234c   :  { %9364 = vmatpush3.bf16.msra.mxu0 %v10051_v5  ;;  %7616 = vmatprep.mubr.msk.f32.mxu0 %vm10022_vm0, %v10023_v4 }
0x234d   :  { %9365 = vmatprep.subr.bf16.mxu0 %v10021_v0 }
0x2350   :  { %9367 = vmatpush3.bf16.msra.mxu0 %v10060_v7 }
0x2351   :  { %9368 = vmatprep.subr.bf16.mxu0 %v10021_v0 }
0x2354   :  { %9370 = vmatpush3.bf16.msra.mxu0 %v10072_v10 }
0x2355   :  { %9371 = vmatprep.subr.bf16.mxu0 %v10021_v0 }
0x2358   :  { %9373 = vmatpush3.bf16.msra.mxu0 %v10084_v13 }
0x2359   :  { %9374 = vmatprep.subr.bf16.mxu0 %v10021_v0 }
0x235c   :  { %9376 = vmatpush3.bf16.msra.mxu0 %v10096_v16 }
0x235d   :  { %9377 = vmatprep.subr.bf16.mxu0 %v10021_v0 }
0x2360   :  { %9379 = vmatpush3.bf16.msra.mxu0 %v10108_v19 }
0x2361   :  { %9380 = vmatprep.subr.bf16.mxu0 %v10021_v0 }
0x2364   :  { %9382 = vmatpush3.bf16.msra.mxu0 %v10120_v22 }
0x2365   :  { %9383 = vmatprep.subr.bf16.mxu0 %v10021_v0 }
0x2368   :  { %9385 = vmatpush3.bf16.msra.mxu0 %v10132_v25 }
0x2369   :  { %9410 = vmatprep.subr.bf16.mxu0 %v10021_v0 }
0x241e   :  { %v3139_v2 = vpop.f32.mrb[40].mxu0 }
0x241f   :  { %v3143_v3 = vadd.f32 %v4978_v1, %v3139_v2  ;;  %v7548_v6 = vpop.f32.mrb[41].mxu0  ;;  %v5000_v2 = vld [vmem:[%s11641_s0 + $0x198] sm:$0xff] }
0x2421   :  { %9973 = vtanh.f32 %v3143_v3 }
0x242b   :  { %v9974_v8 = vpop.eup %9973 }
0x242c   :  { %4979 = vst [vmem:[%s11642_s2 + $0x140] sm:$0xff] %v9974_v8  ;;  %7582 = vmatmul.mubr.f32.vlgmr.msra.gmra.mrb[40].mxu1 %v9974_v8 }
0x242d   :  { %9388 = vmatpush3.bf16.msra.mxu1 %v10051_v5  ;;  %7651 = vmatprep.mubr.msk.f32.mxu1 %vm10022_vm0, %v10023_v4 }
0x242e   :  { %9389 = vmatprep.subr.bf16.mxu1 %v10021_v0 }
0x2431   :  { %9391 = vmatpush3.bf16.msra.mxu1 %v10060_v7 }
0x2432   :  { %9392 = vmatprep.subr.bf16.mxu1 %v10021_v0 }
0x2435   :  { %9394 = vmatpush3.bf16.msra.mxu1 %v10072_v10 }
0x2436   :  { %9395 = vmatprep.subr.bf16.mxu1 %v10021_v0 }
0x2439   :  { %9397 = vmatpush3.bf16.msra.mxu1 %v10084_v13 }
0x243a   :  { %9398 = vmatprep.subr.bf16.mxu1 %v10021_v0 }
0x243d   :  { %9400 = vmatpush3.bf16.msra.mxu1 %v10096_v16 }
0x243e   :  { %9401 = vmatprep.subr.bf16.mxu1 %v10021_v0 }
0x2441   :  { %9403 = vmatpush3.bf16.msra.mxu1 %v10108_v19 }
0x2442   :  { %9404 = vmatprep.subr.bf16.mxu1 %v10021_v0 }
0x2445   :  { %9406 = vmatpush3.bf16.msra.mxu1 %v10120_v22 }
0x2446   :  { %9407 = vmatprep.subr.bf16.mxu1 %v10021_v0 }
0x2449   :  { %9409 = vmatpush3.bf16.msra.mxu1 %v10132_v25 }
0x244a   :  { %9434 = vmatprep.subr.bf16.mxu1 %v10021_v0 }
0x24ff   :  { %v3215_v11 = vpop.f32.mrb[40].mxu1 }
0x2500   :  { %v3219_v12 = vadd.f32 %v4980_v9, %v3215_v11  ;;  %v7583_v14 = vpop.f32.mrb[41].mxu1  ;;  %v5002_v11 = vld [vmem:[%s11641_s0 + $0x1a0] sm:$0xff] }
0x2502   :  { %9975 = vtanh.f32 %v3219_v12 }
0x250c   :  { %v9976_v15 = vpop.eup %9975 }
0x250d   :  { %4981 = vst [vmem:[%s11642_s2 + $0x148] sm:$0xff] %v9976_v15  ;;  %7617 = vmatmul.mubr.f32.vlgmr.msra.gmra.mrb[42].mxu0 %v9976_v15 }
0x250e   :  { %9412 = vmatpush3.bf16.msra.mxu0 %v10051_v5  ;;  %7686 = vmatprep.mubr.msk.f32.mxu0 %vm10022_vm0, %v10023_v4 }
0x250f   :  { %9413 = vmatprep.subr.bf16.mxu0 %v10021_v0 }
0x2512   :  { %9415 = vmatpush3.bf16.msra.mxu0 %v10060_v7 }
0x2513   :  { %9416 = vmatprep.subr.bf16.mxu0 %v10021_v0 }
0x2516   :  { %9418 = vmatpush3.bf16.msra.mxu0 %v10072_v10 }
0x2517   :  { %9419 = vmatprep.subr.bf16.mxu0 %v10021_v0 }
0x251a   :  { %9421 = vmatpush3.bf16.msra.mxu0 %v10084_v13 }
0x251b   :  { %9422 = vmatprep.subr.bf16.mxu0 %v10021_v0 }
0x251e   :  { %9424 = vmatpush3.bf16.msra.mxu0 %v10096_v16 }
0x251f   :  { %9425 = vmatprep.subr.bf16.mxu0 %v10021_v0 }
0x2522   :  { %9427 = vmatpush3.bf16.msra.mxu0 %v10108_v19 }
0x2523   :  { %9428 = vmatprep.subr.bf16.mxu0 %v10021_v0 }
0x2526   :  { %9430 = vmatpush3.bf16.msra.mxu0 %v10120_v22 }
0x2527   :  { %9431 = vmatprep.subr.bf16.mxu0 %v10021_v0 }
0x252a   :  { %9433 = vmatpush3.bf16.msra.mxu0 %v10132_v25 }
0x252b   :  { %9458 = vmatprep.subr.bf16.mxu0 %v10021_v0 }
0x25e0   :  { %v3291_v18 = vpop.f32.mrb[42].mxu0 }
0x25e1   :  { %v3295_v20 = vadd.f32 %v4982_v17, %v3291_v18  ;;  %v7618_v21 = vpop.f32.mrb[43].mxu0  ;;  %v5004_v18 = vld [vmem:[%s11641_s0 + $0x1a8] sm:$0xff] }
0x25e3   :  { %9977 = vtanh.f32 %v3295_v20 }
0x25ed   :  { %v9978_v23 = vpop.eup %9977 }
0x25ee   :  { %4983 = vst [vmem:[%s11642_s2 + $0x150] sm:$0xff] %v9978_v23  ;;  %7652 = vmatmul.mubr.f32.vlgmr.msra.gmra.mrb[42].mxu1 %v9978_v23 }
0x25ef   :  { %9436 = vmatpush3.bf16.msra.mxu1 %v10051_v5  ;;  %7721 = vmatprep.mubr.msk.f32.mxu1 %vm10022_vm0, %v10023_v4 }
0x25f0   :  { %9437 = vmatprep.subr.bf16.mxu1 %v10021_v0 }
0x25f3   :  { %9439 = vmatpush3.bf16.msra.mxu1 %v10060_v7 }
0x25f4   :  { %9440 = vmatprep.subr.bf16.mxu1 %v10021_v0 }
0x25f7   :  { %9442 = vmatpush3.bf16.msra.mxu1 %v10072_v10 }
0x25f8   :  { %9443 = vmatprep.subr.bf16.mxu1 %v10021_v0 }
0x25fb   :  { %9445 = vmatpush3.bf16.msra.mxu1 %v10084_v13 }
0x25fc   :  { %9446 = vmatprep.subr.bf16.mxu1 %v10021_v0 }
0x25ff   :  { %9448 = vmatpush3.bf16.msra.mxu1 %v10096_v16 }
0x2600   :  { %9449 = vmatprep.subr.bf16.mxu1 %v10021_v0 }
0x2603   :  { %9451 = vmatpush3.bf16.msra.mxu1 %v10108_v19 }
0x2604   :  { %9452 = vmatprep.subr.bf16.mxu1 %v10021_v0 }
0x2607   :  { %9454 = vmatpush3.bf16.msra.mxu1 %v10120_v22 }
0x2608   :  { %9455 = vmatprep.subr.bf16.mxu1 %v10021_v0 }
0x260b   :  { %9457 = vmatpush3.bf16.msra.mxu1 %v10132_v25 }
0x260c   :  { %9482 = vmatprep.subr.bf16.mxu1 %v10021_v0 }
0x26c1   :  { %v3367_v26 = vpop.f32.mrb[42].mxu1 }
0x26c2   :  { %v3371_v27 = vadd.f32 %v4984_v24, %v3367_v26  ;;  %v7653_v28 = vpop.f32.mrb[43].mxu1  ;;  %v5006_v26 = vld [vmem:[%s11641_s0 + $0x1b0] sm:$0xff] }
0x26c4   :  { %9979 = vtanh.f32 %v3371_v27 }
0x26ce   :  { %v9980_v29 = vpop.eup %9979 }
0x26cf   :  { %4985 = vst [vmem:[%s11642_s2 + $0x158] sm:$0xff] %v9980_v29  ;;  %7687 = vmatmul.mubr.f32.vlgmr.msra.gmra.mrb[44].mxu0 %v9980_v29 }
0x26d0   :  { %9460 = vmatpush3.bf16.msra.mxu0 %v10051_v5  ;;  %7756 = vmatprep.mubr.msk.f32.mxu0 %vm10022_vm0, %v10023_v4 }
0x26d1   :  { %9461 = vmatprep.subr.bf16.mxu0 %v10021_v0 }
0x26d4   :  { %9463 = vmatpush3.bf16.msra.mxu0 %v10060_v7 }
0x26d5   :  { %9464 = vmatprep.subr.bf16.mxu0 %v10021_v0 }
0x26d8   :  { %9466 = vmatpush3.bf16.msra.mxu0 %v10072_v10 }
0x26d9   :  { %9467 = vmatprep.subr.bf16.mxu0 %v10021_v0 }
0x26dc   :  { %9469 = vmatpush3.bf16.msra.mxu0 %v10084_v13 }
0x26dd   :  { %9470 = vmatprep.subr.bf16.mxu0 %v10021_v0 }
0x26e0   :  { %9472 = vmatpush3.bf16.msra.mxu0 %v10096_v16 }
0x26e1   :  { %9473 = vmatprep.subr.bf16.mxu0 %v10021_v0 }
0x26e4   :  { %9475 = vmatpush3.bf16.msra.mxu0 %v10108_v19 }
0x26e5   :  { %9476 = vmatprep.subr.bf16.mxu0 %v10021_v0 }
0x26e8   :  { %9478 = vmatpush3.bf16.msra.mxu0 %v10120_v22 }
0x26e9   :  { %9479 = vmatprep.subr.bf16.mxu0 %v10021_v0 }
0x26ec   :  { %9481 = vmatpush3.bf16.msra.mxu0 %v10132_v25 }
0x26ed   :  { %9506 = vmatprep.subr.bf16.mxu0 %v10021_v0 }
0x27a2   :  { %v3443_v31 = vpop.f32.mrb[44].mxu0 }
0x27a3   :  { %v3447_v32 = vadd.f32 %v4986_v30, %v3443_v31  ;;  %v7688_v33 = vpop.f32.mrb[45].mxu0  ;;  %v5008_v31 = vld [vmem:[%s11641_s0 + $0x1b8] sm:$0xff] }
0x27a5   :  { %9981 = vtanh.f32 %v3447_v32 }
0x27af   :  { %v9982_v34 = vpop.eup %9981 }
0x27b0   :  { %4987 = vst [vmem:[%s11642_s2 + $0x160] sm:$0xff] %v9982_v34  ;;  %7722 = vmatmul.mubr.f32.vlgmr.msra.gmra.mrb[44].mxu1 %v9982_v34 }
0x27b1   :  { %9484 = vmatpush3.bf16.msra.mxu1 %v10051_v5  ;;  %7791 = vmatprep.mubr.msk.f32.mxu1 %vm10022_vm0, %v10023_v4 }
0x27b2   :  { %9485 = vmatprep.subr.bf16.mxu1 %v10021_v0 }
0x27b5   :  { %9487 = vmatpush3.bf16.msra.mxu1 %v10060_v7 }
0x27b6   :  { %9488 = vmatprep.subr.bf16.mxu1 %v10021_v0 }
0x27b9   :  { %9490 = vmatpush3.bf16.msra.mxu1 %v10072_v10 }
0x27ba   :  { %9491 = vmatprep.subr.bf16.mxu1 %v10021_v0 }
0x27bd   :  { %9493 = vmatpush3.bf16.msra.mxu1 %v10084_v13 }
0x27be   :  { %9494 = vmatprep.subr.bf16.mxu1 %v10021_v0 }
0x27c1   :  { %9496 = vmatpush3.bf16.msra.mxu1 %v10096_v16 }
0x27c2   :  { %9497 = vmatprep.subr.bf16.mxu1 %v10021_v0 }
0x27c5   :  { %9499 = vmatpush3.bf16.msra.mxu1 %v10108_v19 }
0x27c6   :  { %9500 = vmatprep.subr.bf16.mxu1 %v10021_v0 }
0x27c9   :  { %9502 = vmatpush3.bf16.msra.mxu1 %v10120_v22 }
0x27ca   :  { %9503 = vmatprep.subr.bf16.mxu1 %v10021_v0 }
0x27cd   :  { %9505 = vmatpush3.bf16.msra.mxu1 %v10132_v25 }
0x27ce   :  { %9530 = vmatprep.subr.bf16.mxu1 %v10021_v0 }
0x2883   :  { %v3519_v36 = vpop.f32.mrb[44].mxu1 }
0x2884   :  { %v3523_v37 = vadd.f32 %v4988_v35, %v3519_v36  ;;  %v7723_v38 = vpop.f32.mrb[45].mxu1  ;;  %v5010_v36 = vld [vmem:[%s11641_s0 + $0x1c0] sm:$0xff] }
0x2886   :  { %9983 = vtanh.f32 %v3523_v37 }
0x2890   :  { %v9984_v39 = vpop.eup %9983 }
0x2891   :  { %4989 = vst [vmem:[%s11642_s2 + $0x168] sm:$0xff] %v9984_v39  ;;  %7757 = vmatmul.mubr.f32.vlgmr.msra.gmra.mrb[46].mxu0 %v9984_v39 }
0x2892   :  { %9508 = vmatpush3.bf16.msra.mxu0 %v10051_v5  ;;  %7826 = vmatprep.mubr.msk.f32.mxu0 %vm10022_vm0, %v10023_v4 }
0x2893   :  { %9509 = vmatprep.subr.bf16.mxu0 %v10021_v0 }
0x2896   :  { %9511 = vmatpush3.bf16.msra.mxu0 %v10060_v7 }
0x2897   :  { %9512 = vmatprep.subr.bf16.mxu0 %v10021_v0 }
0x289a   :  { %9514 = vmatpush3.bf16.msra.mxu0 %v10072_v10 }
0x289b   :  { %9515 = vmatprep.subr.bf16.mxu0 %v10021_v0 }
0x289e   :  { %9517 = vmatpush3.bf16.msra.mxu0 %v10084_v13 }
0x289f   :  { %9518 = vmatprep.subr.bf16.mxu0 %v10021_v0 }
0x28a2   :  { %9520 = vmatpush3.bf16.msra.mxu0 %v10096_v16 }
0x28a3   :  { %9521 = vmatprep.subr.bf16.mxu0 %v10021_v0 }
0x28a6   :  { %9523 = vmatpush3.bf16.msra.mxu0 %v10108_v19 }
0x28a7   :  { %9524 = vmatprep.subr.bf16.mxu0 %v10021_v0 }
0x28aa   :  { %9526 = vmatpush3.bf16.msra.mxu0 %v10120_v22 }
0x28ab   :  { %9527 = vmatprep.subr.bf16.mxu0 %v10021_v0 }
0x28ae   :  { %9529 = vmatpush3.bf16.msra.mxu0 %v10132_v25 }
0x28af   :  { %9554 = vmatprep.subr.bf16.mxu0 %v10021_v0 }
0x2964   :  { %v3595_v41 = vpop.f32.mrb[46].mxu0 }
0x2965   :  { %v3599_v42 = vadd.f32 %v4990_v40, %v3595_v41  ;;  %v7758_v43 = vpop.f32.mrb[47].mxu0  ;;  %v5012_v41 = vld [vmem:[%s11641_s0 + $0x1c8] sm:$0xff] }
0x2967   :  { %9985 = vtanh.f32 %v3599_v42 }
0x2971   :  { %v9986_v44 = vpop.eup %9985 }
0x2972   :  { %4991 = vst [vmem:[%s11642_s2 + $0x170] sm:$0xff] %v9986_v44  ;;  %7792 = vmatmul.mubr.f32.vlgmr.msra.gmra.mrb[46].mxu1 %v9986_v44 }
0x2973   :  { %9532 = vmatpush3.bf16.msra.mxu1 %v10051_v5  ;;  %7861 = vmatprep.mubr.msk.f32.mxu1 %vm10022_vm0, %v10023_v4 }
0x2974   :  { %9533 = vmatprep.subr.bf16.mxu1 %v10021_v0 }
0x2977   :  { %9535 = vmatpush3.bf16.msra.mxu1 %v10060_v7 }
0x2978   :  { %9536 = vmatprep.subr.bf16.mxu1 %v10021_v0 }
0x297b   :  { %9538 = vmatpush3.bf16.msra.mxu1 %v10072_v10 }
0x297c   :  { %9539 = vmatprep.subr.bf16.mxu1 %v10021_v0 }
0x297f   :  { %9541 = vmatpush3.bf16.msra.mxu1 %v10084_v13 }
0x2980   :  { %9542 = vmatprep.subr.bf16.mxu1 %v10021_v0 }
0x2983   :  { %9544 = vmatpush3.bf16.msra.mxu1 %v10096_v16 }
0x2984   :  { %9545 = vmatprep.subr.bf16.mxu1 %v10021_v0 }
0x2987   :  { %9547 = vmatpush3.bf16.msra.mxu1 %v10108_v19 }
0x2988   :  { %9548 = vmatprep.subr.bf16.mxu1 %v10021_v0 }
0x298b   :  { %9550 = vmatpush3.bf16.msra.mxu1 %v10120_v22 }
0x298c   :  { %9551 = vmatprep.subr.bf16.mxu1 %v10021_v0 }
0x298f   :  { %9553 = vmatpush3.bf16.msra.mxu1 %v10132_v25 }
0x2990   :  { %9578 = vmatprep.subr.bf16.mxu1 %v10021_v0 }
0x2a45   :  { %v3671_v46 = vpop.f32.mrb[46].mxu1 }
0x2a46   :  { %v3675_v47 = vadd.f32 %v4992_v45, %v3671_v46  ;;  %v7793_v48 = vpop.f32.mrb[47].mxu1  ;;  %v5014_v46 = vld [vmem:[%s11641_s0 + $0x1d0] sm:$0xff] }
0x2a48   :  { %9987 = vtanh.f32 %v3675_v47 }
0x2a52   :  { %v9988_v49 = vpop.eup %9987 }
0x2a53   :  { %4993 = vst [vmem:[%s11642_s2 + $0x178] sm:$0xff] %v9988_v49  ;;  %7827 = vmatmul.mubr.f32.vlgmr.msra.gmra.mrb[48].mxu0 %v9988_v49 }
0x2a54   :  { %9556 = vmatpush3.bf16.msra.mxu0 %v10051_v5  ;;  %7896 = vmatprep.mubr.msk.f32.mxu0 %vm10022_vm0, %v10023_v4 }
0x2a55   :  { %9557 = vmatprep.subr.bf16.mxu0 %v10021_v0 }
0x2a58   :  { %9559 = vmatpush3.bf16.msra.mxu0 %v10060_v7 }
0x2a59   :  { %9560 = vmatprep.subr.bf16.mxu0 %v10021_v0 }
0x2a5c   :  { %9562 = vmatpush3.bf16.msra.mxu0 %v10072_v10 }
0x2a5d   :  { %9563 = vmatprep.subr.bf16.mxu0 %v10021_v0 }
0x2a60   :  { %9565 = vmatpush3.bf16.msra.mxu0 %v10084_v13 }
0x2a61   :  { %9566 = vmatprep.subr.bf16.mxu0 %v10021_v0 }
0x2a64   :  { %9568 = vmatpush3.bf16.msra.mxu0 %v10096_v16 }
0x2a65   :  { %9569 = vmatprep.subr.bf16.mxu0 %v10021_v0 }
0x2a68   :  { %9571 = vmatpush3.bf16.msra.mxu0 %v10108_v19 }
0x2a69   :  { %9572 = vmatprep.subr.bf16.mxu0 %v10021_v0 }
0x2a6c   :  { %9574 = vmatpush3.bf16.msra.mxu0 %v10120_v22 }
0x2a6d   :  { %9575 = vmatprep.subr.bf16.mxu0 %v10021_v0 }
0x2a70   :  { %9577 = vmatpush3.bf16.msra.mxu0 %v10132_v25 }
0x2a71   :  { %9602 = vmatprep.subr.bf16.mxu0 %v10021_v0 }
0x2b26   :  { %v3747_v51 = vpop.f32.mrb[48].mxu0 }
0x2b27   :  { %v3751_v52 = vadd.f32 %v4994_v50, %v3747_v51  ;;  %v7828_v53 = vpop.f32.mrb[49].mxu0  ;;  %v5016_v51 = vld [vmem:[%s11641_s0 + $0x1d8] sm:$0xff] }
0x2b29   :  { %9989 = vtanh.f32 %v3751_v52 }
0x2b33   :  { %v9990_v54 = vpop.eup %9989 }
0x2b34   :  { %4995 = vst [vmem:[%s11642_s2 + $0x180] sm:$0xff] %v9990_v54  ;;  %7862 = vmatmul.mubr.f32.vlgmr.msra.gmra.mrb[48].mxu1 %v9990_v54 }
0x2b35   :  { %9580 = vmatpush3.bf16.msra.mxu1 %v10051_v5  ;;  %7931 = vmatprep.mubr.msk.f32.mxu1 %vm10022_vm0, %v10023_v4 }
0x2b36   :  { %9581 = vmatprep.subr.bf16.mxu1 %v10021_v0 }
0x2b39   :  { %9583 = vmatpush3.bf16.msra.mxu1 %v10060_v7 }
0x2b3a   :  { %9584 = vmatprep.subr.bf16.mxu1 %v10021_v0 }
0x2b3d   :  { %9586 = vmatpush3.bf16.msra.mxu1 %v10072_v10 }
0x2b3e   :  { %9587 = vmatprep.subr.bf16.mxu1 %v10021_v0 }
0x2b41   :  { %9589 = vmatpush3.bf16.msra.mxu1 %v10084_v13 }
0x2b42   :  { %9590 = vmatprep.subr.bf16.mxu1 %v10021_v0 }
0x2b45   :  { %9592 = vmatpush3.bf16.msra.mxu1 %v10096_v16 }
0x2b46   :  { %9593 = vmatprep.subr.bf16.mxu1 %v10021_v0 }
0x2b49   :  { %9595 = vmatpush3.bf16.msra.mxu1 %v10108_v19 }
0x2b4a   :  { %9596 = vmatprep.subr.bf16.mxu1 %v10021_v0 }
0x2b4d   :  { %9598 = vmatpush3.bf16.msra.mxu1 %v10120_v22 }
0x2b4e   :  { %9599 = vmatprep.subr.bf16.mxu1 %v10021_v0 }
0x2b51   :  { %9601 = vmatpush3.bf16.msra.mxu1 %v10132_v25 }
0x2b52   :  { %9626 = vmatprep.subr.bf16.mxu1 %v10021_v0 }
0x2c07   :  { %v3823_v56 = vpop.f32.mrb[48].mxu1 }
0x2c08   :  { %v3827_v57 = vadd.f32 %v4996_v55, %v3823_v56  ;;  %v7863_v58 = vpop.f32.mrb[49].mxu1  ;;  %v5018_v56 = vld [vmem:[%s11641_s0 + $0x1e0] sm:$0xff] }
0x2c0a   :  { %9991 = vtanh.f32 %v3827_v57 }
0x2c14   :  { %v9992_v59 = vpop.eup %9991 }
0x2c15   :  { %4997 = vst [vmem:[%s11642_s2 + $0x188] sm:$0xff] %v9992_v59  ;;  %7897 = vmatmul.mubr.f32.vlgmr.msra.gmra.mrb[50].mxu0 %v9992_v59 }
0x2c16   :  { %9604 = vmatpush3.bf16.msra.mxu0 %v10051_v5  ;;  %7966 = vmatprep.mubr.msk.f32.mxu0 %vm10022_vm0, %v10023_v4 }
0x2c17   :  { %9605 = vmatprep.subr.bf16.mxu0 %v10021_v0 }
0x2c1a   :  { %9607 = vmatpush3.bf16.msra.mxu0 %v10060_v7 }
0x2c1b   :  { %9608 = vmatprep.subr.bf16.mxu0 %v10021_v0 }
0x2c1e   :  { %9610 = vmatpush3.bf16.msra.mxu0 %v10072_v10 }
0x2c1f   :  { %9611 = vmatprep.subr.bf16.mxu0 %v10021_v0 }
0x2c22   :  { %9613 = vmatpush3.bf16.msra.mxu0 %v10084_v13 }
0x2c23   :  { %9614 = vmatprep.subr.bf16.mxu0 %v10021_v0 }
0x2c26   :  { %9616 = vmatpush3.bf16.msra.mxu0 %v10096_v16 }
0x2c27   :  { %9617 = vmatprep.subr.bf16.mxu0 %v10021_v0 }
0x2c2a   :  { %9619 = vmatpush3.bf16.msra.mxu0 %v10108_v19 }
0x2c2b   :  { %9620 = vmatprep.subr.bf16.mxu0 %v10021_v0 }
0x2c2e   :  { %9622 = vmatpush3.bf16.msra.mxu0 %v10120_v22 }
0x2c2f   :  { %9623 = vmatprep.subr.bf16.mxu0 %v10021_v0 }
0x2c32   :  { %9625 = vmatpush3.bf16.msra.mxu0 %v10132_v25 }
0x2c33   :  { %9650 = vmatprep.subr.bf16.mxu0 %v10021_v0 }
0x2ce8   :  { %v3899_v61 = vpop.f32.mrb[50].mxu0 }
0x2ce9   :  { %v3903_v62 = vadd.f32 %v4998_v60, %v3899_v61  ;;  %v7898_v63 = vpop.f32.mrb[51].mxu0  ;;  %v5024_v61 = vld [vmem:[%s11641_s0 + $0x1f8] sm:$0xff] }
0x2ceb   :  { %9993 = vtanh.f32 %v3903_v62 }
0x2cf5   :  { %v9994_v1 = vpop.eup %9993 }
0x2cf6   :  { %4999 = vst [vmem:[%s11642_s2 + $0x190] sm:$0xff] %v9994_v1  ;;  %7932 = vmatmul.mubr.f32.vlgmr.msra.gmra.mrb[50].mxu1 %v9994_v1 }
0x2cf7   :  { %9628 = vmatpush3.bf16.msra.mxu1 %v10051_v5  ;;  %8001 = vmatprep.mubr.msk.f32.mxu1 %vm10022_vm0, %v10023_v4 }
0x2cf8   :  { %9629 = vmatprep.subr.bf16.mxu1 %v10021_v0 }
0x2cfb   :  { %9631 = vmatpush3.bf16.msra.mxu1 %v10060_v7 }
0x2cfc   :  { %9632 = vmatprep.subr.bf16.mxu1 %v10021_v0 }
0x2cff   :  { %9634 = vmatpush3.bf16.msra.mxu1 %v10072_v10 }
0x2d00   :  { %9635 = vmatprep.subr.bf16.mxu1 %v10021_v0 }
0x2d03   :  { %9637 = vmatpush3.bf16.msra.mxu1 %v10084_v13 }
0x2d04   :  { %9638 = vmatprep.subr.bf16.mxu1 %v10021_v0 }
0x2d07   :  { %9640 = vmatpush3.bf16.msra.mxu1 %v10096_v16 }
0x2d08   :  { %9641 = vmatprep.subr.bf16.mxu1 %v10021_v0 }
0x2d0b   :  { %9643 = vmatpush3.bf16.msra.mxu1 %v10108_v19 }
0x2d0c   :  { %9644 = vmatprep.subr.bf16.mxu1 %v10021_v0 }
0x2d0f   :  { %9646 = vmatpush3.bf16.msra.mxu1 %v10120_v22 }
0x2d10   :  { %9647 = vmatprep.subr.bf16.mxu1 %v10021_v0 }
0x2d13   :  { %9649 = vmatpush3.bf16.msra.mxu1 %v10132_v25 }
0x2d14   :  { %9674 = vmatprep.subr.bf16.mxu1 %v10021_v0 }
0x2dc9   :  { %v3975_v3 = vpop.f32.mrb[50].mxu1 }
0x2dca   :  { %v3979_v6 = vadd.f32 %v5000_v2, %v3975_v3  ;;  %v7933_v8 = vpop.f32.mrb[51].mxu1 }
0x2dcc   :  { %9995 = vtanh.f32 %v3979_v6 }
0x2dd6   :  { %v9996_v9 = vpop.eup %9995 }
0x2dd7   :  { %5001 = vst [vmem:[%s11642_s2 + $0x198] sm:$0xff] %v9996_v9  ;;  %7967 = vmatmul.mubr.f32.vlgmr.msra.gmra.mrb[52].mxu0 %v9996_v9 }
0x2dd8   :  { %9652 = vmatpush3.bf16.msra.mxu0 %v10051_v5  ;;  %8036 = vmatprep.mubr.msk.f32.mxu0 %vm10022_vm0, %v10023_v4 }
0x2dd9   :  { %9653 = vmatprep.subr.bf16.mxu0 %v10021_v0 }
0x2ddc   :  { %9655 = vmatpush3.bf16.msra.mxu0 %v10060_v7 }
0x2ddd   :  { %9656 = vmatprep.subr.bf16.mxu0 %v10021_v0 }
0x2de0   :  { %9658 = vmatpush3.bf16.msra.mxu0 %v10072_v10 }
0x2de1   :  { %9659 = vmatprep.subr.bf16.mxu0 %v10021_v0 }
0x2de4   :  { %9661 = vmatpush3.bf16.msra.mxu0 %v10084_v13 }
0x2de5   :  { %9662 = vmatprep.subr.bf16.mxu0 %v10021_v0 }
0x2de8   :  { %9664 = vmatpush3.bf16.msra.mxu0 %v10096_v16 }
0x2de9   :  { %9665 = vmatprep.subr.bf16.mxu0 %v10021_v0 }
0x2dec   :  { %9667 = vmatpush3.bf16.msra.mxu0 %v10108_v19 }
0x2ded   :  { %9668 = vmatprep.subr.bf16.mxu0 %v10021_v0 }
0x2df0   :  { %9670 = vmatpush3.bf16.msra.mxu0 %v10120_v22 }
0x2df1   :  { %9671 = vmatprep.subr.bf16.mxu0 %v10021_v0 }
0x2df4   :  { %9673 = vmatpush3.bf16.msra.mxu0 %v10132_v25 }
0x2df5   :  { %9698 = vmatprep.subr.bf16.mxu0 %v10021_v0 }
0x2eaa   :  { %v4051_v12 = vpop.f32.mrb[52].mxu0 }
0x2eab   :  { %v4055_v14 = vadd.f32 %v5002_v11, %v4051_v12  ;;  %v7968_v15 = vpop.f32.mrb[53].mxu0 }
0x2ead   :  { %9997 = vtanh.f32 %v4055_v14 }
0x2eb7   :  { %v9998_v17 = vpop.eup %9997 }
0x2eb8   :  { %5003 = vst [vmem:[%s11642_s2 + $0x1a0] sm:$0xff] %v9998_v17  ;;  %8002 = vmatmul.mubr.f32.vlgmr.msra.gmra.mrb[52].mxu1 %v9998_v17 }
0x2eb9   :  { %9676 = vmatpush3.bf16.msra.mxu1 %v10051_v5  ;;  %8071 = vmatprep.mubr.msk.f32.mxu1 %vm10022_vm0, %v10023_v4 }
0x2eba   :  { %9677 = vmatprep.subr.bf16.mxu1 %v10021_v0 }
0x2ebd   :  { %9679 = vmatpush3.bf16.msra.mxu1 %v10060_v7 }
0x2ebe   :  { %9680 = vmatprep.subr.bf16.mxu1 %v10021_v0 }
0x2ec1   :  { %9682 = vmatpush3.bf16.msra.mxu1 %v10072_v10 }
0x2ec2   :  { %9683 = vmatprep.subr.bf16.mxu1 %v10021_v0 }
0x2ec5   :  { %9685 = vmatpush3.bf16.msra.mxu1 %v10084_v13 }
0x2ec6   :  { %9686 = vmatprep.subr.bf16.mxu1 %v10021_v0 }
0x2ec9   :  { %9688 = vmatpush3.bf16.msra.mxu1 %v10096_v16 }
0x2eca   :  { %9689 = vmatprep.subr.bf16.mxu1 %v10021_v0 }
0x2ecd   :  { %9691 = vmatpush3.bf16.msra.mxu1 %v10108_v19 }
0x2ece   :  { %9692 = vmatprep.subr.bf16.mxu1 %v10021_v0 }
0x2ed1   :  { %9694 = vmatpush3.bf16.msra.mxu1 %v10120_v22 }
0x2ed2   :  { %9695 = vmatprep.subr.bf16.mxu1 %v10021_v0 }
0x2ed5   :  { %9697 = vmatpush3.bf16.msra.mxu1 %v10132_v25 }
0x2ed6   :  { %9722 = vmatprep.subr.bf16.mxu1 %v10021_v0 }
0x2f8b   :  { %v4127_v20 = vpop.f32.mrb[52].mxu1 }
0x2f8c   :  { %v4131_v21 = vadd.f32 %v5004_v18, %v4127_v20  ;;  %v8003_v23 = vpop.f32.mrb[53].mxu1 }
0x2f8e   :  { %9999 = vtanh.f32 %v4131_v21 }
0x2f98   :  { %v10000_v24 = vpop.eup %9999 }
0x2f99   :  { %5005 = vst [vmem:[%s11642_s2 + $0x1a8] sm:$0xff] %v10000_v24  ;;  %8037 = vmatmul.mubr.f32.vlgmr.msra.gmra.mrb[54].mxu0 %v10000_v24 }
0x2f9a   :  { %9700 = vmatpush3.bf16.msra.mxu0 %v10051_v5  ;;  %8106 = vmatprep.mubr.msk.f32.mxu0 %vm10022_vm0, %v10023_v4 }
0x2f9b   :  { %9701 = vmatprep.subr.bf16.mxu0 %v10021_v0 }
0x2f9e   :  { %9703 = vmatpush3.bf16.msra.mxu0 %v10060_v7 }
0x2f9f   :  { %9704 = vmatprep.subr.bf16.mxu0 %v10021_v0 }
0x2fa2   :  { %9706 = vmatpush3.bf16.msra.mxu0 %v10072_v10 }
0x2fa3   :  { %9707 = vmatprep.subr.bf16.mxu0 %v10021_v0 }
0x2fa6   :  { %9709 = vmatpush3.bf16.msra.mxu0 %v10084_v13 }
0x2fa7   :  { %9710 = vmatprep.subr.bf16.mxu0 %v10021_v0 }
0x2faa   :  { %9712 = vmatpush3.bf16.msra.mxu0 %v10096_v16 }
0x2fab   :  { %9713 = vmatprep.subr.bf16.mxu0 %v10021_v0 }
0x2fae   :  { %9715 = vmatpush3.bf16.msra.mxu0 %v10108_v19 }
0x2faf   :  { %9716 = vmatprep.subr.bf16.mxu0 %v10021_v0 }
0x2fb2   :  { %9718 = vmatpush3.bf16.msra.mxu0 %v10120_v22 }
0x2fb3   :  { %9719 = vmatprep.subr.bf16.mxu0 %v10021_v0 }
0x2fb6   :  { %9721 = vmatpush3.bf16.msra.mxu0 %v10132_v25 }
0x2fb7   :  { %9746 = vmatprep.subr.bf16.mxu0 %v10021_v0 }
0x306c   :  { %v4203_v27 = vpop.f32.mrb[54].mxu0 }
0x306d   :  { %v4207_v28 = vadd.f32 %v5006_v26, %v4203_v27  ;;  %v8038_v29 = vpop.f32.mrb[55].mxu0 }
0x306f   :  { %10001 = vtanh.f32 %v4207_v28 }
0x3079   :  { %v10002_v30 = vpop.eup %10001 }
0x307a   :  { %5007 = vst [vmem:[%s11642_s2 + $0x1b0] sm:$0xff] %v10002_v30  ;;  %8072 = vmatmul.mubr.f32.vlgmr.msra.gmra.mrb[54].mxu1 %v10002_v30 }
0x307b   :  { %9724 = vmatpush3.bf16.msra.mxu1 %v10051_v5  ;;  %8141 = vmatprep.mubr.msk.f32.mxu1 %vm10022_vm0, %v10023_v4 }
0x307c   :  { %9725 = vmatprep.subr.bf16.mxu1 %v10021_v0 }
0x307f   :  { %9727 = vmatpush3.bf16.msra.mxu1 %v10060_v7 }
0x3080   :  { %9728 = vmatprep.subr.bf16.mxu1 %v10021_v0 }
0x3083   :  { %9730 = vmatpush3.bf16.msra.mxu1 %v10072_v10 }
0x3084   :  { %9731 = vmatprep.subr.bf16.mxu1 %v10021_v0 }
0x3087   :  { %9733 = vmatpush3.bf16.msra.mxu1 %v10084_v13 }
0x3088   :  { %9734 = vmatprep.subr.bf16.mxu1 %v10021_v0 }
0x308b   :  { %9736 = vmatpush3.bf16.msra.mxu1 %v10096_v16 }
0x308c   :  { %9737 = vmatprep.subr.bf16.mxu1 %v10021_v0 }
0x308f   :  { %9739 = vmatpush3.bf16.msra.mxu1 %v10108_v19 }
0x3090   :  { %9740 = vmatprep.subr.bf16.mxu1 %v10021_v0 }
0x3093   :  { %9742 = vmatpush3.bf16.msra.mxu1 %v10120_v22 }
0x3094   :  { %9743 = vmatprep.subr.bf16.mxu1 %v10021_v0 }
0x3097   :  { %9745 = vmatpush3.bf16.msra.mxu1 %v10132_v25 }
0x3098   :  { %9770 = vmatprep.subr.bf16.mxu1 %v10021_v0 }
0x314d   :  { %v4279_v32 = vpop.f32.mrb[54].mxu1 }
0x314e   :  { %v4283_v33 = vadd.f32 %v5008_v31, %v4279_v32  ;;  %v8073_v34 = vpop.f32.mrb[55].mxu1 }
0x3150   :  { %10003 = vtanh.f32 %v4283_v33 }
0x315a   :  { %v10004_v35 = vpop.eup %10003 }
0x315b   :  { %5009 = vst [vmem:[%s11642_s2 + $0x1b8] sm:$0xff] %v10004_v35  ;;  %8107 = vmatmul.mubr.f32.vlgmr.msra.gmra.mrb[56].mxu0 %v10004_v35 }
0x315c   :  { %9748 = vmatpush3.bf16.msra.mxu0 %v10051_v5  ;;  %8176 = vmatprep.mubr.msk.f32.mxu0 %vm10022_vm0, %v10023_v4 }
0x315d   :  { %9749 = vmatprep.subr.bf16.mxu0 %v10021_v0 }
0x3160   :  { %9751 = vmatpush3.bf16.msra.mxu0 %v10060_v7 }
0x3161   :  { %9752 = vmatprep.subr.bf16.mxu0 %v10021_v0 }
0x3164   :  { %9754 = vmatpush3.bf16.msra.mxu0 %v10072_v10 }
0x3165   :  { %9755 = vmatprep.subr.bf16.mxu0 %v10021_v0 }
0x3168   :  { %9757 = vmatpush3.bf16.msra.mxu0 %v10084_v13 }
0x3169   :  { %9758 = vmatprep.subr.bf16.mxu0 %v10021_v0 }
0x316c   :  { %9760 = vmatpush3.bf16.msra.mxu0 %v10096_v16 }
0x316d   :  { %9761 = vmatprep.subr.bf16.mxu0 %v10021_v0 }
0x3170   :  { %9763 = vmatpush3.bf16.msra.mxu0 %v10108_v19 }
0x3171   :  { %9764 = vmatprep.subr.bf16.mxu0 %v10021_v0 }
0x3174   :  { %9766 = vmatpush3.bf16.msra.mxu0 %v10120_v22 }
0x3175   :  { %9767 = vmatprep.subr.bf16.mxu0 %v10021_v0 }
0x3178   :  { %9769 = vmatpush3.bf16.msra.mxu0 %v10132_v25 }
0x3179   :  { %9794 = vmatprep.subr.bf16.mxu0 %v10021_v0 }
0x322e   :  { %v4355_v37 = vpop.f32.mrb[56].mxu0 }
0x322f   :  { %v4359_v38 = vadd.f32 %v5010_v36, %v4355_v37  ;;  %v8108_v39 = vpop.f32.mrb[57].mxu0 }
0x3231   :  { %10005 = vtanh.f32 %v4359_v38 }
0x323b   :  { %v10006_v40 = vpop.eup %10005 }
0x323c   :  { %5011 = vst [vmem:[%s11642_s2 + $0x1c0] sm:$0xff] %v10006_v40  ;;  %8142 = vmatmul.mubr.f32.vlgmr.msra.gmra.mrb[56].mxu1 %v10006_v40 }
0x323d   :  { %9772 = vmatpush3.bf16.msra.mxu1 %v10051_v5  ;;  %8211 = vmatprep.mubr.msk.f32.mxu1 %vm10022_vm0, %v10023_v4 }
0x323e   :  { %9773 = vmatprep.subr.bf16.mxu1 %v10021_v0 }
0x3241   :  { %9775 = vmatpush3.bf16.msra.mxu1 %v10060_v7 }
0x3242   :  { %9776 = vmatprep.subr.bf16.mxu1 %v10021_v0 }
0x3245   :  { %9778 = vmatpush3.bf16.msra.mxu1 %v10072_v10 }
0x3246   :  { %9779 = vmatprep.subr.bf16.mxu1 %v10021_v0 }
0x3249   :  { %9781 = vmatpush3.bf16.msra.mxu1 %v10084_v13 }
0x324a   :  { %9782 = vmatprep.subr.bf16.mxu1 %v10021_v0 }
0x324d   :  { %9784 = vmatpush3.bf16.msra.mxu1 %v10096_v16 }
0x324e   :  { %9785 = vmatprep.subr.bf16.mxu1 %v10021_v0 }
0x3251   :  { %9787 = vmatpush3.bf16.msra.mxu1 %v10108_v19 }
0x3252   :  { %9788 = vmatprep.subr.bf16.mxu1 %v10021_v0 }
0x3255   :  { %9790 = vmatpush3.bf16.msra.mxu1 %v10120_v22 }
0x3256   :  { %9791 = vmatprep.subr.bf16.mxu1 %v10021_v0 }
0x3259   :  { %9793 = vmatpush3.bf16.msra.mxu1 %v10132_v25 }
0x325a   :  { %9818 = vmatprep.subr.bf16.mxu1 %v10021_v0 }
0x330f   :  { %v4431_v42 = vpop.f32.mrb[56].mxu1 }
0x3310   :  { %v4435_v43 = vadd.f32 %v5012_v41, %v4431_v42  ;;  %v8143_v44 = vpop.f32.mrb[57].mxu1 }
0x3312   :  { %10007 = vtanh.f32 %v4435_v43 }
0x331c   :  { %v10008_v45 = vpop.eup %10007 }
0x331d   :  { %5013 = vst [vmem:[%s11642_s2 + $0x1c8] sm:$0xff] %v10008_v45  ;;  %8177 = vmatmul.mubr.f32.vlgmr.msra.gmra.mrb[58].mxu0 %v10008_v45 }
0x331e   :  { %9796 = vmatpush3.bf16.msra.mxu0 %v10051_v5  ;;  %8246 = vmatprep.mubr.msk.f32.mxu0 %vm10022_vm0, %v10023_v4 }
0x331f   :  { %9797 = vmatprep.subr.bf16.mxu0 %v10021_v0 }
0x3322   :  { %9799 = vmatpush3.bf16.msra.mxu0 %v10060_v7 }
0x3323   :  { %9800 = vmatprep.subr.bf16.mxu0 %v10021_v0 }
0x3326   :  { %9802 = vmatpush3.bf16.msra.mxu0 %v10072_v10 }
0x3327   :  { %9803 = vmatprep.subr.bf16.mxu0 %v10021_v0 }
0x332a   :  { %9805 = vmatpush3.bf16.msra.mxu0 %v10084_v13 }
0x332b   :  { %9806 = vmatprep.subr.bf16.mxu0 %v10021_v0 }
0x332e   :  { %9808 = vmatpush3.bf16.msra.mxu0 %v10096_v16 }
0x332f   :  { %9809 = vmatprep.subr.bf16.mxu0 %v10021_v0 }
0x3332   :  { %9811 = vmatpush3.bf16.msra.mxu0 %v10108_v19 }
0x3333   :  { %9812 = vmatprep.subr.bf16.mxu0 %v10021_v0 }
0x3336   :  { %9814 = vmatpush3.bf16.msra.mxu0 %v10120_v22 }
0x3337   :  { %9815 = vmatprep.subr.bf16.mxu0 %v10021_v0 }
0x333a   :  { %9817 = vmatpush3.bf16.msra.mxu0 %v10132_v25 }
0x333b   :  { %9842 = vmatprep.subr.bf16.mxu0 %v10021_v0 }
0x33f0   :  { %v4507_v47 = vpop.f32.mrb[58].mxu0 }
0x33f1   :  { %v4511_v48 = vadd.f32 %v5014_v46, %v4507_v47  ;;  %v8178_v49 = vpop.f32.mrb[59].mxu0 }
0x33f3   :  { %10009 = vtanh.f32 %v4511_v48 }
0x33fd   :  { %v10010_v50 = vpop.eup %10009 }
0x33fe   :  { %5015 = vst [vmem:[%s11642_s2 + $0x1d0] sm:$0xff] %v10010_v50  ;;  %8212 = vmatmul.mubr.f32.vlgmr.msra.gmra.mrb[58].mxu1 %v10010_v50 }
0x33ff   :  { %9820 = vmatpush3.bf16.msra.mxu1 %v10051_v5  ;;  %8281 = vmatprep.mubr.msk.f32.mxu1 %vm10022_vm0, %v10023_v4 }
0x3400   :  { %9821 = vmatprep.subr.bf16.mxu1 %v10021_v0 }
0x3403   :  { %9823 = vmatpush3.bf16.msra.mxu1 %v10060_v7 }
0x3404   :  { %9824 = vmatprep.subr.bf16.mxu1 %v10021_v0 }
0x3407   :  { %9826 = vmatpush3.bf16.msra.mxu1 %v10072_v10 }
0x3408   :  { %9827 = vmatprep.subr.bf16.mxu1 %v10021_v0 }
0x340b   :  { %9829 = vmatpush3.bf16.msra.mxu1 %v10084_v13 }
0x340c   :  { %9830 = vmatprep.subr.bf16.mxu1 %v10021_v0 }
0x340f   :  { %9832 = vmatpush3.bf16.msra.mxu1 %v10096_v16 }
0x3410   :  { %9833 = vmatprep.subr.bf16.mxu1 %v10021_v0 }
0x3413   :  { %9835 = vmatpush3.bf16.msra.mxu1 %v10108_v19 }
0x3414   :  { %9836 = vmatprep.subr.bf16.mxu1 %v10021_v0 }
0x3417   :  { %9838 = vmatpush3.bf16.msra.mxu1 %v10120_v22 }
0x3418   :  { %9839 = vmatprep.subr.bf16.mxu1 %v10021_v0 }
0x341b   :  { %9841 = vmatpush3.bf16.msra.mxu1 %v10132_v25 }
0x341c   :  { %9866 = vmatprep.subr.bf16.mxu1 %v10021_v0 }
0x34d1   :  { %v4583_v52 = vpop.f32.mrb[58].mxu1 }
0x34d2   :  { %v4587_v53 = vadd.f32 %v5016_v51, %v4583_v52  ;;  %v8213_v54 = vpop.f32.mrb[59].mxu1 }
0x34d4   :  { %10011 = vtanh.f32 %v4587_v53 }
0x34de   :  { %v10012_v55 = vpop.eup %10011 }
0x34df   :  { %5017 = vst [vmem:[%s11642_s2 + $0x1d8] sm:$0xff] %v10012_v55  ;;  %8247 = vmatmul.mubr.f32.vlgmr.msra.gmra.mrb[60].mxu0 %v10012_v55 }
0x34e0   :  { %9844 = vmatpush3.bf16.msra.mxu0 %v10051_v5  ;;  %8316 = vmatprep.mubr.msk.f32.mxu0 %vm10022_vm0, %v10023_v4 }
0x34e1   :  { %9845 = vmatprep.subr.bf16.mxu0 %v10021_v0 }
0x34e4   :  { %9847 = vmatpush3.bf16.msra.mxu0 %v10060_v7 }
0x34e5   :  { %9848 = vmatprep.subr.bf16.mxu0 %v10021_v0 }
0x34e8   :  { %9850 = vmatpush3.bf16.msra.mxu0 %v10072_v10 }
0x34e9   :  { %9851 = vmatprep.subr.bf16.mxu0 %v10021_v0 }
0x34ec   :  { %9853 = vmatpush3.bf16.msra.mxu0 %v10084_v13 }
0x34ed   :  { %9854 = vmatprep.subr.bf16.mxu0 %v10021_v0 }
0x34f0   :  { %9856 = vmatpush3.bf16.msra.mxu0 %v10096_v16 }
0x34f1   :  { %9857 = vmatprep.subr.bf16.mxu0 %v10021_v0 }
0x34f4   :  { %9859 = vmatpush3.bf16.msra.mxu0 %v10108_v19 }
0x34f5   :  { %9860 = vmatprep.subr.bf16.mxu0 %v10021_v0 }
0x34f8   :  { %9862 = vmatpush3.bf16.msra.mxu0 %v10120_v22 }
0x34f9   :  { %9863 = vmatprep.subr.bf16.mxu0 %v10021_v0 }
0x34fc   :  { %9865 = vmatpush3.bf16.msra.mxu0 %v10132_v25 }
0x35b2   :  { %v4659_v57 = vpop.f32.mrb[60].mxu0 }
0x35b3   :  { %v4663_v58 = vadd.f32 %v5018_v56, %v4659_v57  ;;  %v8248_v59 = vpop.f32.mrb[61].mxu0 }
0x35b5   :  { %10013 = vtanh.f32 %v4663_v58 }
0x35bf   :  { %v10014_v60 = vpop.eup %10013 }
0x35c0   :  { %5019 = vst [vmem:[%s11642_s2 + $0x1e0] sm:$0xff] %v10014_v60  ;;  %8282 = vmatmul.mubr.f32.vlgmr.msra.gmra.mrb[60].mxu1 %v10014_v60 }
0x35c1   :  { %9868 = vmatpush3.bf16.msra.mxu1 %v10051_v5  ;;  %8351 = vmatprep.mubr.msk.f32.mxu1 %vm10022_vm0, %v10023_v4  ;;  %v5020_v4 = vld [vmem:[%s11641_s0 + $0x1e8] sm:$0xff] }
0x35c2   :  { %9869 = vmatprep.subr.bf16.mxu1 %v10021_v0 }
0x35c5   :  { %9871 = vmatpush3.bf16.msra.mxu1 %v10060_v7 }
0x35c6   :  { %9872 = vmatprep.subr.bf16.mxu1 %v10021_v0 }
0x35c9   :  { %9874 = vmatpush3.bf16.msra.mxu1 %v10072_v10 }
0x35ca   :  { %9875 = vmatprep.subr.bf16.mxu1 %v10021_v0 }
0x35cd   :  { %9877 = vmatpush3.bf16.msra.mxu1 %v10084_v13 }
0x35ce   :  { %9878 = vmatprep.subr.bf16.mxu1 %v10021_v0 }
0x35d1   :  { %9880 = vmatpush3.bf16.msra.mxu1 %v10096_v16 }
0x35d2   :  { %9881 = vmatprep.subr.bf16.mxu1 %v10021_v0 }
0x35d5   :  { %9883 = vmatpush3.bf16.msra.mxu1 %v10108_v19 }
0x35d6   :  { %9884 = vmatprep.subr.bf16.mxu1 %v10021_v0 }
0x35d9   :  { %9886 = vmatpush3.bf16.msra.mxu1 %v10120_v22 }
0x35da   :  { %9887 = vmatprep.subr.bf16.mxu1 %v10021_v0  ;;  %v5022_v0 = vld [vmem:[%s11641_s0 + $0x1f0] sm:$0xff] }
0x35dd   :  { %9889 = vmatpush3.bf16.msra.mxu1 %v10132_v25 }
0x3693   :  { %v4735_v5 = vpop.f32.mrb[60].mxu1 }
0x3694   :  { %v4739_v7 = vadd.f32 %v5020_v4, %v4735_v5  ;;  %v8283_v10 = vpop.f32.mrb[61].mxu1 }
0x3696   :  { %10015 = vtanh.f32 %v4739_v7 }
0x36a0   :  { %v10016_v13 = vpop.eup %10015 }
0x36a1   :  { %5021 = vst [vmem:[%s11642_s2 + $0x1e8] sm:$0xff] %v10016_v13  ;;  %8317 = vmatmul.mubr.f32.vlgmr.msra.gmra.mrb[62].mxu0 %v10016_v13 }
0x3774   :  { %v4811_v16 = vpop.f32.mrb[62].mxu0 }
0x3775   :  { %v4815_v19 = vadd.f32 %v5022_v0, %v4811_v16  ;;  %v8318_v22 = vpop.f32.mrb[63].mxu0 }
0x3777   :  { %10017 = vtanh.f32 %v4815_v19 }
0x3781   :  { %v10018_v25 = vpop.eup %10017 }
0x3782   :  { %5023 = vst [vmem:[%s11642_s2 + $0x1f0] sm:$0xff] %v10018_v25  ;;  %8352 = vmatmul.mubr.f32.vlgmr.msra.gmra.mrb[62].mxu1 %v10018_v25 }
0x3855   :  { %v4887_v62 = vpop.f32.mrb[62].mxu1 }
0x3856   :  { %v4891_v63 = vadd.f32 %v5024_v61, %v4887_v62  ;;  %v8353_v1 = vpop.f32.mrb[63].mxu1 }
0x3858   :  { %10019 = vtanh.f32 %v4891_v63 }
0x3862   :  { %v10020_v2 = vpop.eup %10019 }
0x3863   :  { %5025 = vst [vmem:[%s11642_s2 + $0x1f8] sm:$0xff] %v10020_v2 }

</bundles_post_ra>
